<compile_context>
chip_gen: v7x
topology: tpu7x:2x2x1
jax: 0.10.0
libtpu: 0.0.40
codegen_flags: <defaults>
</compile_context>

<pallas_src>
import jax
import jax.numpy as jnp
from jax.experimental import pallas as pl
from jax.experimental.pallas import tpu as pltpu

IN_FEATURES = 3072   # 3 * 32 * 32 (CIFAR)
HIDDEN = 512
OUT = 10
OUT_PAD = 128        # lane-dense output width; sliced back to OUT in wrapper
MAX_TM = 512         # max batch-tile rows (6 MiB f32 x-tile, fits every gen)


def _mlp_kernel(x_ref, w1_ref, b1_ref, w2_ref, b2_ref, o_ref):
    # x streamed as f32, cast to bf16 on the VPU; W1/W2 are bf16 MXU operands.
    x = x_ref[...].astype(jnp.bfloat16)
    h = jnp.dot(x, w1_ref[...], preferred_element_type=jnp.float32)
    h = jnp.maximum(h + b1_ref[...], 0.0)
    y = jnp.dot(h.astype(jnp.bfloat16), w2_ref[...],
                preferred_element_type=jnp.float32)
    o_ref[...] = (y + b2_ref[...]).astype(o_ref.dtype)


def prepare_params(w1, b1, w2, b2):
    """One-time (cacheable) weight conversion/padding — keep out of hot path.

    w1 : (3072, 512) f32, b1 : (512,) f32, w2 : (512, 10) f32, b2 : (10,) f32
    """
    w1_bf16 = w1.astype(jnp.bfloat16)
    w2_pad = jnp.zeros((HIDDEN, OUT_PAD), jnp.bfloat16)
    w2_pad = w2_pad.at[:, :OUT].set(w2.astype(jnp.bfloat16))
    b1_2d = b1.reshape(1, HIDDEN).astype(jnp.float32)
    b2_pad = jnp.zeros((1, OUT_PAD), jnp.float32)
    b2_pad = b2_pad.at[0, :OUT].set(b2.astype(jnp.float32))
    return w1_bf16, b1_2d, w2_pad, b2_pad


def h_forward(x_nchw, prepared_params):
    """Forward pass of module H.

    x_nchw          : (B, 3, 32, 32) float32
    prepared_params : output of prepare_params()
    returns (B, 10) float32
    """
    w1_bf16, b1_2d, w2_pad, b2_pad = prepared_params

    B = x_nchw.shape[0]
    x = x_nchw.reshape(B, -1)                       # == torch x.view(B, -1)
    assert x.shape[1] == IN_FEATURES

    # Batch tiling: one full-array block for B <= MAX_TM (no padding, no
    # masked stores); otherwise 512-row tiles with a zero-padded tail.
    if B <= MAX_TM:
        tm = B
        B_pad = B
    else:
        tm = MAX_TM
        B_pad = ((B + tm - 1) // tm) * tm
        if B_pad != B:
            x = jnp.pad(x, ((0, B_pad - B), (0, 0)))
    num_m = B_pad // tm

    cost = pl.CostEstimate(
        flops=2 * B_pad * (IN_FEATURES * HIDDEN + HIDDEN * OUT_PAD),
        transcendentals=0,
        bytes_accessed=(B_pad * IN_FEATURES * 4        # x streamed as f32
                        + IN_FEATURES * HIDDEN * 2     # W1 bf16, resident once
                        + HIDDEN * OUT_PAD * 2         # W2 bf16, resident once
                        + HIDDEN * 4 + OUT_PAD * 4     # biases
                        + B_pad * OUT_PAD * 4),        # output
    )

    out = pl.pallas_call(
        _mlp_kernel,
        out_shape=jax.ShapeDtypeStruct((B_pad, OUT_PAD), jnp.float32),
        grid_spec=pltpu.PrefetchScalarGridSpec(
            num_scalar_prefetch=0,
            grid=(num_m,),
            in_specs=[
                pl.BlockSpec((tm, IN_FEATURES), lambda i: (i, 0)),      # x tile (f32)
                pl.BlockSpec((IN_FEATURES, HIDDEN), lambda i: (0, 0)),  # W1 resident
                pl.BlockSpec((1, HIDDEN), lambda i: (0, 0)),            # b1 resident
                pl.BlockSpec((HIDDEN, OUT_PAD), lambda i: (0, 0)),      # W2 resident
                pl.BlockSpec((1, OUT_PAD), lambda i: (0, 0)),           # b2 resident
            ],
            out_specs=pl.BlockSpec((tm, OUT_PAD), lambda i: (i, 0)),
        ),
        compiler_params=pltpu.CompilerParams(
            dimension_semantics=("parallel",),
            vmem_limit_bytes=32 * 1024 * 1024,  # covers worst case on v5e default
        ),
        cost_estimate=cost,
    )(x, w1_bf16, b1_2d, w2_pad, b2_pad)

    return out[:B, :OUT]


def init_params(key):
    """Deterministic init mirroring nn.Linear's U(-1/sqrt(fan_in), 1/sqrt(fan_in))."""
    k1, k2, k3, k4 = jax.random.split(key, 4)
    bound1 = 1.0 / jnp.sqrt(IN_FEATURES)
    bound2 = 1.0 / jnp.sqrt(HIDDEN)
    w1 = jax.random.uniform(k1, (IN_FEATURES, HIDDEN), jnp.float32, -bound1, bound1)
    b1 = jax.random.uniform(k2, (HIDDEN,), jnp.float32, -bound1, bound1)
    w2 = jax.random.uniform(k3, (HIDDEN, OUT), jnp.float32, -bound2, bound2)
    b2 = jax.random.uniform(k4, (OUT,), jnp.float32, -bound2, bound2)
    return w1, b1, w2, b2


if __name__ == "__main__":
    key = jax.random.PRNGKey(0)
    kx, kp = jax.random.split(key)

    # CIFAR-shaped input (B, C, H, W) = (2, 3, 32, 32) -> 3072 features/example.
    x = jax.random.normal(kx, (2, 3, 32, 32), jnp.float32)
    w1, b1, w2, b2 = init_params(kp)

    # One-time weight conversion, outside the hot path.
    prepared = prepare_params(w1, b1, w2, b2)

    out = jax.block_until_ready(h_forward(x, prepared))
    assert out.shape == (2, 10)

    # Tight check: plain-JAX reference with matching bf16 inputs / f32 accumulation.
    x_flat_bf = x.reshape(2, -1).astype(jnp.bfloat16)
    h_ref = jnp.maximum(
        jnp.dot(x_flat_bf, w1.astype(jnp.bfloat16),
                preferred_element_type=jnp.float32) + b1, 0.0)
    ref_bf = jnp.dot(h_ref.astype(jnp.bfloat16), w2.astype(jnp.bfloat16),
                     preferred_element_type=jnp.float32) + b2
    assert jnp.allclose(out, ref_bf, atol=2e-3, rtol=2e-3)

    # Loose check against the full-f32 PyTorch-equivalent math.
    ref_f32 = jnp.maximum(x.reshape(2, -1) @ w1 + b1, 0.0) @ w2 + b2
    assert jnp.allclose(out, ref_f32, atol=5e-2, rtol=0.0)

    print("KERNEL_OK")
</pallas_src>

<mosaic_0001>
module attributes {stable_mosaic.version = 11 : i64} {
  func.func @_mlp_kernel(%arg0: i32, %arg1: memref<2x3072xf32, #tpu.memory_space<vmem>>, %arg2: memref<3072x512xbf16, #tpu.memory_space<vmem>>, %arg3: memref<1x512xf32, #tpu.memory_space<vmem>>, %arg4: memref<512x128xbf16, #tpu.memory_space<vmem>>, %arg5: memref<1x128xf32, #tpu.memory_space<vmem>>, %arg6: memref<2x128xf32, #tpu.memory_space<vmem>>) attributes {dimension_semantics = [#tpu.dimension_semantics<parallel>], iteration_bounds = array<i64: 1>, scalar_prefetch = 0 : i64, scratch_operands = 0 : i64, tpu.core_type = #tpu.core_type<tc>, window_params = [{transform_indices = @transform_0, window_bounds = array<i64: 2, 3072>}, {pipeline_mode = #tpu.pipeline_mode<synchronous>, transform_indices = @transform_1, window_bounds = array<i64: 3072, 512>}, {pipeline_mode = #tpu.pipeline_mode<synchronous>, transform_indices = @transform_2, window_bounds = array<i64: 1, 512>}, {pipeline_mode = #tpu.pipeline_mode<synchronous>, transform_indices = @transform_3, window_bounds = array<i64: 512, 128>}, {pipeline_mode = #tpu.pipeline_mode<synchronous>, transform_indices = @transform_4, window_bounds = array<i64: 1, 128>}, {transform_indices = @transform_5, window_bounds = array<i64: 2, 128>}]} {
    %c0 = arith.constant 0 : index
    %c0_0 = arith.constant 0 : index
    %0 = vector.load %arg1[%c0, %c0_0] : memref<2x3072xf32, #tpu.memory_space<vmem>>, vector<2x3072xf32>
    %1 = arith.truncf %0 : vector<2x3072xf32> to vector<2x3072xbf16>
    %c0_1 = arith.constant 0 : index
    %c0_2 = arith.constant 0 : index
    %2 = vector.load %arg2[%c0_1, %c0_2] : memref<3072x512xbf16, #tpu.memory_space<vmem>>, vector<3072x512xbf16>
    %cst = arith.constant dense<0.000000e+00> : vector<2x512xf32>
    %3 = tpu.matmul %1, %2, %cst {dimension_numbers = #tpu.dot_dimension_numbers<[1], [0], [0], [1], [0, 0, 1, 1], [], []>} : vector<2x3072xbf16>, vector<3072x512xbf16>, vector<2x512xf32> -> vector<2x512xf32>
    %c0_3 = arith.constant 0 : index
    %c0_4 = arith.constant 0 : index
    %4 = vector.load %arg3[%c0_3, %c0_4] : memref<1x512xf32, #tpu.memory_space<vmem>>, vector<1x512xf32>
    %5 = vector.broadcast %4 : vector<1x512xf32> to vector<2x512xf32>
    %6 = arith.addf %3, %5 : vector<2x512xf32>
    %cst_5 = arith.constant 0.000000e+00 : f32
    %7 = vector.broadcast %cst_5 : f32 to vector<2x512xf32>
    %8 = arith.maximumf %6, %7 : vector<2x512xf32>
    %9 = arith.truncf %8 : vector<2x512xf32> to vector<2x512xbf16>
    %c0_6 = arith.constant 0 : index
    %c0_7 = arith.constant 0 : index
    %10 = vector.load %arg4[%c0_6, %c0_7] : memref<512x128xbf16, #tpu.memory_space<vmem>>, vector<512x128xbf16>
    %cst_8 = arith.constant dense<0.000000e+00> : vector<2x128xf32>
    %11 = tpu.matmul %9, %10, %cst_8 {dimension_numbers = #tpu.dot_dimension_numbers<[1], [0], [0], [1], [0, 0, 1, 1], [], []>} : vector<2x512xbf16>, vector<512x128xbf16>, vector<2x128xf32> -> vector<2x128xf32>
    %c0_9 = arith.constant 0 : index
    %c0_10 = arith.constant 0 : index
    %12 = vector.load %arg5[%c0_9, %c0_10] : memref<1x128xf32, #tpu.memory_space<vmem>>, vector<1x128xf32>
    %13 = vector.broadcast %12 : vector<1x128xf32> to vector<2x128xf32>
    %14 = arith.addf %11, %13 : vector<2x128xf32>
    %c0_11 = arith.constant 0 : index
    %c0_12 = arith.constant 0 : index
    %15 = vector.load %arg6[%c0_11, %c0_12] : memref<2x128xf32, #tpu.memory_space<vmem>>, vector<2x128xf32>
    tpu.vector_store %arg6[%c0_11, %c0_12], %14 {strides = array<i32>} : memref<2x128xf32, #tpu.memory_space<vmem>>, vector<2x128xf32>,
    return
  }
  func.func @transform_0(%arg0: i32) -> (i32, i32) {
    %c0_i32 = arith.constant 0 : i32
    %c0_i32_0 = arith.constant 0 : i32
    return %arg0, %c0_i32 : i32, i32
  }
  func.func @transform_1(%arg0: i32) -> (i32, i32) {
    %c0_i32 = arith.constant 0 : i32
    %c0_i32_0 = arith.constant 0 : i32
    %c0_i32_1 = arith.constant 0 : i32
    return %c0_i32, %c0_i32_0 : i32, i32
  }
  func.func @transform_2(%arg0: i32) -> (i32, i32) {
    %c0_i32 = arith.constant 0 : i32
    %c0_i32_0 = arith.constant 0 : i32
    %c0_i32_1 = arith.constant 0 : i32
    return %c0_i32, %c0_i32_0 : i32, i32
  }
  func.func @transform_3(%arg0: i32) -> (i32, i32) {
    %c0_i32 = arith.constant 0 : i32
    %c0_i32_0 = arith.constant 0 : i32
    %c0_i32_1 = arith.constant 0 : i32
    return %c0_i32, %c0_i32_0 : i32, i32
  }
  func.func @transform_4(%arg0: i32) -> (i32, i32) {
    %c0_i32 = arith.constant 0 : i32
    %c0_i32_0 = arith.constant 0 : i32
    %c0_i32_1 = arith.constant 0 : i32
    return %c0_i32, %c0_i32_0 : i32, i32
  }
  func.func @transform_5(%arg0: i32) -> (i32, i32) {
    %c0_i32 = arith.constant 0 : i32
    %c0_i32_0 = arith.constant 0 : i32
    return %arg0, %c0_i32 : i32, i32
  }
}

</mosaic_0001>

<bundles_post_ra>
// kernel: tpu_custom_call.1
= control target key start
LH: loop header
LB: loop body
LE: loop exit
PB: predicated region body
PF: predicated region fallthrough
CT: control target
= control target key end

     0   :  { %10 = vsyncpa [#allocation3], 0  ;;  %s8732_s0 = inlined_call_operand.hbm [shape: f32[2,3072], index: 0, kind: input, shape index: {}]   ;;  %s8733_s1 = inlined_call_operand.hbm [shape: bf16[3072,512], index: 1, kind: input, shape index: {}]   ;;  %s8734_s2 = inlined_call_operand.hbm [shape: f32[1,512], index: 2, kind: input, shape index: {}]   ;;  %s8735_s3 = inlined_call_operand.hbm [shape: bf16[512,128], index: 3, kind: input, shape index: {}]   ;;  %s8736_s4 = inlined_call_operand.hbm [shape: f32[1,128], index: 4, kind: input, shape index: {}]   ;;  %s8737_s5 = inlined_call_operand.hbm [shape: f32[2,128], index: 5, kind: output, shape index: {}]  }
   0x1   :  { %11 = vsyncpa [#allocation6], 0 }
   0x2   :  { %12 = vsyncpa [#allocation9], 0 }
   0x3   :  { %13 = vsyncpa [#allocation4], 0  ;;  %s8507_s18 = smov [#allocation5]   ;;  %s8367_s22 = scalar_lea.hbm %s8733_s1, 98304 }
   0x4   :  { %s29_s19 = sshll.u32 %s8507_s18, 4  ;;  %p8368_p0 = scmp.ne.s32.totalorder %s8733_s1, %s8367_s22  ;;  %s30_s19 = int_to_ptr.vmem [resolvable:$true] %s29_s19 }
   0x5   :  { %p8371_p1 = scmp.lt.u32.totalorder %s8367_s22, %s8733_s1 }
   0x7   :  { %p8373_p2 = pnand %p8371_p1, %p8368_p0 }
   0x9   :  { %8376 = shalt.err (!%p8373_p2)
}
   0xa   :  { %s8377_s27 = scalar_lea.vmem %s30_s19, 98304  ;;  %p8382_p4 = scmp.lt.s32.totalorder %s30_s19, %s30_s19 }
   0xb   :  { %p8378_p3 = scmp.ne.s32.totalorder %s30_s19, %s8377_s27  ;;  %p8383_p5 = scmp.lt.s32.totalorder %s8377_s27, %s8377_s27 }
   0xd   :  { %p8384_p6 = por %p8383_p5, %p8382_p4 }
   0xf   :  { %p8385_p7 = pnand %p8384_p6, %p8378_p3 }
  0x11   :  { %8388 = shalt.err (!%p8385_p7)
}
  0x12   :  { %s8508_s28 = smov 256   ;;  %s8509_s29 = smov 16  }
  0x13   :  { %35 = dma.hbm_to_vmem [thread:$0]  %s8733_s1, 98304, %s30_s19, [#allocation6], %s8508_s28, %s8508_s28, %s8509_s29  }
  0x14   :  { %s8510_s7 = smov [#allocation8]   ;;  %s8389_s11 = scalar_lea.hbm %s8735_s3, 4096 }
  0x15   :  { %s51_s8 = sshll.u32 %s8510_s7, 4  ;;  %p8390_p8 = scmp.ne.s32.totalorder %s8735_s3, %s8389_s11  ;;  %s52_s8 = int_to_ptr.vmem [resolvable:$true] %s51_s8 }
  0x16   :  { %p8393_p9 = scmp.lt.u32.totalorder %s8389_s11, %s8735_s3 }
  0x18   :  { %p8395_p10 = pnand %p8393_p9, %p8390_p8 }
  0x1a   :  { %8398 = shalt.err (!%p8395_p10)
}
  0x1b   :  { %s8399_s16 = scalar_lea.vmem %s52_s8, 4096  ;;  %p8404_p12 = scmp.lt.s32.totalorder %s52_s8, %s52_s8 }
  0x1c   :  { %p8400_p11 = scmp.ne.s32.totalorder %s52_s8, %s8399_s16  ;;  %p8405_p13 = scmp.lt.s32.totalorder %s8399_s16, %s8399_s16 }
  0x1e   :  { %p8406_p0 = por %p8405_p13, %p8404_p12 }
  0x20   :  { %p8407_p1 = pnand %p8406_p0, %p8400_p11 }
  0x22   :  { %8410 = shalt.err (!%p8407_p1)
}
  0x23   :  { %s8511_s1 = smov 64   ;;  %s8512_s17 = smov 4  }
  0x24   :  { %57 = dma.hbm_to_vmem [thread:$0]  %s8735_s3, 4096, %s52_s8, [#allocation9], %s8511_s1, %s8511_s1, %s8512_s17  }
  0x25   :  { %s8513_s20 = smov [#allocation2]   ;;  %s8514_s22 = smov [#allocation7]  }
  0x26   :  { %s20_s21 = sshll.u32 %s8513_s20, 4  ;;  %s42_s23 = sshll.u32 %s8514_s22, 4  ;;  %s21_s21 = int_to_ptr.vmem [resolvable:$true] %s20_s21  ;;  %s43_s23 = int_to_ptr.vmem [resolvable:$true] %s42_s23 }
  0x27   :  { %s8411_s26 = scalar_lea.hbm %s8732_s0, 768 }
  0x28   :  { %p8412_p2 = scmp.ne.s32.totalorder %s8732_s0, %s8411_s26  ;;  %p8415_p3 = scmp.lt.u32.totalorder %s8411_s26, %s8732_s0 }
  0x2a   :  { %p8417_p4 = pnand %p8415_p3, %p8412_p2 }
  0x2c   :  { %8420 = shalt.err (!%p8417_p4)
}
  0x2d   :  { %s8421_s3 = scalar_lea.vmem %s21_s21, 768  ;;  %p8426_p6 = scmp.lt.s32.totalorder %s21_s21, %s21_s21 }
  0x2e   :  { %p8422_p5 = scmp.ne.s32.totalorder %s21_s21, %s8421_s3  ;;  %p8427_p7 = scmp.lt.s32.totalorder %s8421_s3, %s8421_s3 }
  0x30   :  { %p8428_p8 = por %p8427_p7, %p8426_p6 }
  0x32   :  { %p8429_p9 = pnand %p8428_p8, %p8422_p5 }
  0x34   :  { %8432 = shalt.err (!%p8429_p9)
}
  0x35   :  { %23 = dma.hbm_to_vmem [thread:$0]  %s8732_s0, 768, %s21_s21, [#allocation3]  }
  0x36   :  { %s8433_s10 = scalar_lea.hbm %s8734_s2, 64 }
  0x37   :  { %p8434_p10 = scmp.ne.s32.totalorder %s8734_s2, %s8433_s10  ;;  %p8437_p11 = scmp.lt.u32.totalorder %s8433_s10, %s8734_s2 }
  0x39   :  { %p8439_p12 = pnand %p8437_p11, %p8434_p10 }
  0x3b   :  { %8442 = shalt.err (!%p8439_p12)
}
  0x3c   :  { %s8443_s15 = scalar_lea.vmem %s43_s23, 64  ;;  %p8448_p0 = scmp.lt.s32.totalorder %s43_s23, %s43_s23 }
  0x3d   :  { %p8444_p13 = scmp.ne.s32.totalorder %s43_s23, %s8443_s15  ;;  %p8449_p1 = scmp.lt.s32.totalorder %s8443_s15, %s8443_s15 }
  0x3f   :  { %p8450_p2 = por %p8449_p1, %p8448_p0 }
  0x41   :  { %p8451_p3 = pnand %p8450_p2, %p8444_p13 }
  0x43   :  { %8454 = shalt.err (!%p8451_p3)
}
  0x44   :  { %45 = dma.hbm_to_vmem [thread:$0]  %s8734_s2, 64, %s43_s23, [#allocation6]  }
  0x45   :  { %s8515_s1 = smov [#allocation10]   ;;  %s8455_s20 = scalar_lea.hbm %s8736_s4, 16 }
  0x46   :  { %s64_s17 = sshll.u32 %s8515_s1, 4  ;;  %p8456_p4 = scmp.ne.s32.totalorder %s8736_s4, %s8455_s20  ;;  %s65_s17 = int_to_ptr.vmem [resolvable:$true] %s64_s17 }
  0x47   :  { %p8459_p5 = scmp.lt.u32.totalorder %s8455_s20, %s8736_s4 }
  0x49   :  { %p8461_p6 = pnand %p8459_p5, %p8456_p4 }
  0x4b   :  { %8464 = shalt.err (!%p8461_p6)
}
  0x4c   :  { %s8465_s26 = scalar_lea.vmem %s65_s17, 16  ;;  %s8469_s2 = scalar_lea.vmem %s65_s17, 32 }
  0x4d   :  { %p8466_p7 = scmp.ne.s32.totalorder %s65_s17, %s8465_s26  ;;  %p8470_p8 = scmp.lt.s32.totalorder %s65_s17, %s65_s17 }
  0x4e   :  { %p8471_p9 = scmp.lt.s32.totalorder %s8469_s2, %s8465_s26 }
  0x50   :  { %p8472_p10 = por %p8471_p9, %p8470_p8 }
  0x52   :  { %p8473_p11 = pnand %p8472_p10, %p8466_p7 }
  0x54   :  { %8476 = shalt.err (!%p8473_p11)
}
  0x55   :  { %67 = dma.hbm_to_vmem [thread:$0]  %s8736_s4, 16, %s65_s17, [#allocation9]  }
  0x56   :  { %8499 = dma.done.wait [#allocation3], 768  }
  0x57   :  { %8500 = vsyncadd [#allocation3], 4294966528 }
  0x58   :  { %8501 = dma.done.wait [#allocation6], 98368  }
  0x59   :  { %8502 = vsyncadd [#allocation6], 4294868928 }
  0x5a   :  { %8503 = dma.done.wait [#allocation9], 4112  }
  0x5b   :  { %8504 = vsyncadd [#allocation9], 4294963184  ;;  %v7177_v0 = vld [vmem:[#allocation5 + $0x4] ss:$16 sps:$4 sm:$0xff]   ;;  %v7179_v1 = vld [vmem:[#allocation5 + $0xc] ss:$16 sps:$4 sm:$0xff]   ;;  %v100_v38 = vlaneseq }
  0x5c   :  { %4876 = vmatprep.subr.bf16.mxu0 %v7177_v0  ;;  %v7181_v2 = vld [vmem:[#allocation5] ss:$16 sps:$4 sm:$0xff]   ;;  %v7182_v3 = vld [vmem:[#allocation5 + $0x8] ss:$16 sps:$4 sm:$0xff]   ;;  %5368 = vmatprep.subr.bf16.mxu1 %v7179_v1  ;;  %v7183_v4 = vld [vmem:[#allocation5 + $0x24] ss:$16 sps:$4 sm:$0xff]  }
  0x5d   :  { %4877 = vmatpush1.bf16.msra.mxu0 %v7181_v2  ;;  %5369 = vmatpush1.bf16.msra.mxu1 %v7182_v3  ;;  %v7185_v5 = vld [vmem:[#allocation5 + $0x2c] ss:$16 sps:$4 sm:$0xff]   ;;  %v7187_v6 = vld [vmem:[#allocation5 + $0x20] ss:$16 sps:$4 sm:$0xff]   ;;  %v7188_v7 = vld [vmem:[#allocation5 + $0x28] ss:$16 sps:$4 sm:$0xff]  }
  0x5e   :  { %4878 = vmatprep.subr.bf16.mxu0 %v7183_v4  ;;  %5370 = vmatprep.subr.bf16.mxu1 %v7185_v5  ;;  %v7189_v8 = vld [vmem:[#allocation5 + $0x44] ss:$16 sps:$4 sm:$0xff]   ;;  %v7191_v9 = vld [vmem:[#allocation5 + $0x4c] ss:$16 sps:$4 sm:$0xff]   ;;  %v7193_v10 = vld [vmem:[#allocation5 + $0x40] ss:$16 sps:$4 sm:$0xff]  }
  0x5f   :  { %v7194_v11 = vld [vmem:[#allocation5 + $0x48] ss:$16 sps:$4 sm:$0xff]   ;;  %v7195_v12 = vld [vmem:[#allocation5 + $0x64] ss:$16 sps:$4 sm:$0xff]   ;;  %v7197_v13 = vld [vmem:[#allocation5 + $0x6c] ss:$16 sps:$4 sm:$0xff]  }
  0x60   :  { %v7199_v14 = vld [vmem:[#allocation5 + $0x60] ss:$16 sps:$4 sm:$0xff]   ;;  %v7200_v15 = vld [vmem:[#allocation5 + $0x68] ss:$16 sps:$4 sm:$0xff]   ;;  %v7201_v16 = vld [vmem:[#allocation5 + $0x84] ss:$16 sps:$4 sm:$0xff]  }
  0x61   :  { %4879 = vmatpush1.bf16.msra.mxu0 %v7187_v6  ;;  %5371 = vmatpush1.bf16.msra.mxu1 %v7188_v7  ;;  %v7203_v17 = vld [vmem:[#allocation5 + $0x8c] ss:$16 sps:$4 sm:$0xff]   ;;  %v7205_v18 = vld [vmem:[#allocation5 + $0x80] ss:$16 sps:$4 sm:$0xff]   ;;  %v7206_v19 = vld [vmem:[#allocation5 + $0x88] ss:$16 sps:$4 sm:$0xff]  }
  0x62   :  { %4880 = vmatprep.subr.bf16.mxu0 %v7189_v8  ;;  %5372 = vmatprep.subr.bf16.mxu1 %v7191_v9  ;;  %v7207_v20 = vld [vmem:[#allocation5 + $0xa4] ss:$16 sps:$4 sm:$0xff]   ;;  %v7209_v21 = vld [vmem:[#allocation5 + $0xac] ss:$16 sps:$4 sm:$0xff]   ;;  %v7211_v22 = vld [vmem:[#allocation5 + $0xa0] ss:$16 sps:$4 sm:$0xff]  }
  0x63   :  { %v7212_v23 = vld [vmem:[#allocation5 + $0xa8] ss:$16 sps:$4 sm:$0xff]   ;;  %v7213_v24 = vld [vmem:[#allocation5 + $0xc4] ss:$16 sps:$4 sm:$0xff]   ;;  %v7215_v25 = vld [vmem:[#allocation5 + $0xcc] ss:$16 sps:$4 sm:$0xff]  }
  0x64   :  { %v7217_v26 = vld [vmem:[#allocation5 + $0xc0] ss:$16 sps:$4 sm:$0xff]   ;;  %v7218_v27 = vld [vmem:[#allocation5 + $0xc8] ss:$16 sps:$4 sm:$0xff]   ;;  %v7219_v28 = vld [vmem:[#allocation5 + $0xe4] ss:$16 sps:$4 sm:$0xff]  }
  0x65   :  { %4881 = vmatpush1.bf16.msra.mxu0 %v7193_v10  ;;  %5373 = vmatpush1.bf16.msra.mxu1 %v7194_v11  ;;  %v7221_v29 = vld [vmem:[#allocation5 + $0xec] ss:$16 sps:$4 sm:$0xff]   ;;  %v7223_v30 = vld [vmem:[#allocation5 + $0xe0] ss:$16 sps:$4 sm:$0xff]   ;;  %v7224_v31 = vld [vmem:[#allocation5 + $0xe8] ss:$16 sps:$4 sm:$0xff]  }
  0x66   :  { %4882 = vmatprep.subr.bf16.mxu0 %v7195_v12  ;;  %5374 = vmatprep.subr.bf16.mxu1 %v7197_v13  ;;  %v7225_v32 = vld [vmem:[#allocation5 + $0x104] ss:$16 sps:$4 sm:$0xff]   ;;  %v7227_v33 = vld [vmem:[#allocation5 + $0x10c] ss:$16 sps:$4 sm:$0xff]   ;;  %v7229_v34 = vld [vmem:[#allocation5 + $0x100] ss:$16 sps:$4 sm:$0xff]  }
  0x67   :  { %v7230_v35 = vld [vmem:[#allocation5 + $0x108] ss:$16 sps:$4 sm:$0xff]   ;;  %v8516_v36 = vmov 1983009808   ;;  %v7231_v39 = vld [vmem:[#allocation5 + $0x124] ss:$16 sps:$4 sm:$0xff]  }
  0x68   :  { %v98_v37 = vunpack.c.l.s4 %v8516_v36  ;;  %v7233_v40 = vld [vmem:[#allocation5 + $0x12c] ss:$16 sps:$4 sm:$0xff]   ;;  %v7235_v41 = vld [vmem:[#allocation5 + $0x120] ss:$16 sps:$4 sm:$0xff]   ;;  %v8608_v43 = vshrl.u32 %v100_v38, 7  ;;  %s8517_s4 = smov [#allocation11]  }
  0x69   :  { %4883 = vmatpush1.bf16.msra.mxu0 %v7199_v14  ;;  %5375 = vmatpush1.bf16.msra.mxu1 %v7200_v15  ;;  %v7236_v44 = vld [vmem:[#allocation5 + $0x128] ss:$16 sps:$4 sm:$0xff]   ;;  %v7237_v45 = vld [vmem:[#allocation5 + $0x144] ss:$16 sps:$4 sm:$0xff]   ;;  %v7239_v46 = vld [vmem:[#allocation5 + $0x14c] ss:$16 sps:$4 sm:$0xff]  }
  0x6a   :  { %4884 = vmatprep.subr.bf16.mxu0 %v7201_v16  ;;  %5376 = vmatprep.subr.bf16.mxu1 %v7203_v17  ;;  %v99_v42 = vunpack.c.0.s8 %v98_v37  ;;  %v7241_v47 = vld [vmem:[#allocation5 + $0x140] ss:$16 sps:$4 sm:$0xff]   ;;  %v7242_v48 = vld [vmem:[#allocation5 + $0x148] ss:$16 sps:$4 sm:$0xff]   ;;  %v7243_v50 = vld [vmem:[#allocation5 + $0x164] ss:$16 sps:$4 sm:$0xff]  }
  0x6b   :  { %v7245_v51 = vld [vmem:[#allocation5 + $0x16c] ss:$16 sps:$4 sm:$0xff]   ;;  %v84_v52 = vld [vmem:[#allocation2] sm:$0xff]  ;;  %v7248_v55 = vld [vmem:[#allocation5 + $0x168] ss:$16 sps:$4 sm:$0xff]   ;;  %s6218_s28 = sshll.u32 %s8517_s4, 4  ;;  %s6219_s28 = int_to_ptr.vmem [resolvable:$true] %s6218_s28 }
  0x6c   :  { %v8611_v49 = vsub.s32 %v99_v42, %v8608_v43  ;;  %v7247_v53 = vld [vmem:[#allocation5 + $0x160] ss:$16 sps:$4 sm:$0xff]   ;;  %v7249_v56 = vld [vmem:[#allocation5 + $0x184] ss:$16 sps:$4 sm:$0xff]   ;;  %v7251_v57 = vld [vmem:[#allocation5 + $0x18c] ss:$16 sps:$4 sm:$0xff]   ;;  %v96_v4 = vcombine.high %v84_v52, %v84_v52  ;;  %p8482_p13 = scmp.lt.s32.totalorder %s6219_s28, %s6219_s28 }
  0x6d   :  { %4885 = vmatpush1.bf16.msra.mxu0 %v7205_v18  ;;  %5377 = vmatpush1.bf16.msra.mxu1 %v7206_v19  ;;  %v7253_v59 = vld [vmem:[#allocation5 + $0x180] ss:$16 sps:$4 sm:$0xff]   ;;  %v7254_v61 = vld [vmem:[#allocation5 + $0x188] ss:$16 sps:$4 sm:$0xff]   ;;  %v7255_v62 = vld [vmem:[#allocation5 + $0x1a4] ss:$16 sps:$4 sm:$0xff]  }
  0x6e   :  { %4886 = vmatprep.subr.bf16.mxu0 %v7207_v20  ;;  %5378 = vmatprep.subr.bf16.mxu1 %v7209_v21  ;;  %v103_v54 = vrot.slane %v84_v52, %v8611_v49  ;;  %v7257_v63 = vld [vmem:[#allocation5 + $0x1ac] ss:$16 sps:$4 sm:$0xff]   ;;  %v7259_v0 = vld [vmem:[#allocation5 + $0x1a0] ss:$16 sps:$4 sm:$0xff]   ;;  %v7260_v1 = vld [vmem:[#allocation5 + $0x1a8] ss:$16 sps:$4 sm:$0xff]   ;;  %v8615_v9 = vrot.slane %v96_v4, %v8611_v49 }
  0x6f   :  { %v7261_v2 = vld [vmem:[#allocation5 + $0x1c4] ss:$16 sps:$4 sm:$0xff]   ;;  %v7263_v3 = vld [vmem:[#allocation5 + $0x1cc] ss:$16 sps:$4 sm:$0xff]   ;;  %v7265_v5 = vld [vmem:[#allocation5 + $0x1c0] ss:$16 sps:$4 sm:$0xff]  }
  0x70   :  { %v111_v58 = vcombine.high %v103_v54, %v103_v54  ;;  %v7266_v6 = vld [vmem:[#allocation5 + $0x1c8] ss:$16 sps:$4 sm:$0xff]   ;;  %v7267_v7 = vld [vmem:[#allocation5 + $0x1e4] ss:$16 sps:$4 sm:$0xff]   ;;  %v7269_v8 = vld [vmem:[#allocation5 + $0x1ec] ss:$16 sps:$4 sm:$0xff]   ;;  %v112_v14 = vcombine.high %v8615_v9, %v8615_v9  ;;  %v222_v16 = vpack.c.bf16 %v103_v54, %v103_v54 }
  0x71   :  { %4887 = vmatpush1.bf16.msra.mxu0 %v7211_v22  ;;  %5379 = vmatpush1.bf16.msra.mxu1 %v7212_v23  ;;  %v7271_v10 = vld [vmem:[#allocation5 + $0x1e0] ss:$16 sps:$4 sm:$0xff]   ;;  %v7272_v11 = vld [vmem:[#allocation5 + $0x1e8] ss:$16 sps:$4 sm:$0xff]   ;;  %v7276_v12 = vld [vmem:[#allocation5 + $0x204] ss:$16 sps:$4 sm:$0xff]  }
  0x72   :  { %4888 = vmatprep.subr.bf16.mxu0 %v7213_v24  ;;  %5380 = vmatprep.subr.bf16.mxu1 %v7215_v25  ;;  %v223_v60 = vpack.c.bf16 %v111_v58, %v111_v58  ;;  %v7279_v13 = vld [vmem:[#allocation5 + $0x20c] ss:$16 sps:$4 sm:$0xff]   ;;  %v7274_v15 = vld [vmem:[#allocation5 + $0x200] ss:$16 sps:$4 sm:$0xff]   ;;  %v7277_v17 = vld [vmem:[#allocation5 + $0x208] ss:$16 sps:$4 sm:$0xff]   ;;  %v225_v20 = vpack.c.bf16 %v112_v14, %v112_v14 }
  0x73   :  { %v7282_v18 = vld [vmem:[#allocation5 + $0x224] ss:$16 sps:$4 sm:$0xff]   ;;  %v7285_v19 = vld [vmem:[#allocation5 + $0x22c] ss:$16 sps:$4 sm:$0xff]   ;;  %v7280_v21 = vld [vmem:[#allocation5 + $0x220] ss:$16 sps:$4 sm:$0xff]  }
  0x74   :  { %4908 = vmatprep.mubr.bf16.mxu0 %v223_v60  ;;  %5400 = vmatprep.mubr.bf16.mxu1 %v223_v60  ;;  %v7283_v22 = vld [vmem:[#allocation5 + $0x228] ss:$16 sps:$4 sm:$0xff]   ;;  %v7288_v23 = vld [vmem:[#allocation5 + $0x244] ss:$16 sps:$4 sm:$0xff]   ;;  %v7291_v24 = vld [vmem:[#allocation5 + $0x24c] ss:$16 sps:$4 sm:$0xff]  }
  0x75   :  { %4889 = vmatpush1.bf16.msra.mxu0 %v7217_v26  ;;  %5381 = vmatpush1.bf16.msra.mxu1 %v7218_v27  ;;  %v7286_v25 = vld [vmem:[#allocation5 + $0x240] ss:$16 sps:$4 sm:$0xff]   ;;  %v7289_v26 = vld [vmem:[#allocation5 + $0x248] ss:$16 sps:$4 sm:$0xff]   ;;  %v7294_v27 = vld [vmem:[#allocation5 + $0x264] ss:$16 sps:$4 sm:$0xff]  }
  0x76   :  { %4890 = vmatprep.subr.bf16.mxu0 %v7219_v28  ;;  %5382 = vmatprep.subr.bf16.mxu1 %v7221_v29  ;;  %v7297_v28 = vld [vmem:[#allocation5 + $0x26c] ss:$16 sps:$4 sm:$0xff]   ;;  %v7292_v29 = vld [vmem:[#allocation5 + $0x260] ss:$16 sps:$4 sm:$0xff]   ;;  %v7307_v38 = vld [vmem:[#allocation5 + $0x2a8] ss:$16 sps:$4 sm:$0xff]  }
  0x77   :  { %v7309_v36 = vld [vmem:[#allocation5 + $0x2ac] ss:$16 sps:$4 sm:$0xff]   ;;  %v7304_v37 = vld [vmem:[#allocation5 + $0x2a0] ss:$16 sps:$4 sm:$0xff]   ;;  %v7313_v42 = vld [vmem:[#allocation5 + $0x2c8] ss:$16 sps:$4 sm:$0xff]  }
  0x78   :  { %v7325_v52 = vld [vmem:[#allocation5 + $0x308] ss:$16 sps:$4 sm:$0xff]   ;;  %v7333_v54 = vld [vmem:[#allocation5 + $0x32c] ss:$16 sps:$4 sm:$0xff]   ;;  %v7366_v14 = vld [vmem:[#allocation5 + $0x3e4] ss:$16 sps:$4 sm:$0xff]  }
  0x79   :  { %4891 = vmatpush1.bf16.msra.mxu0 %v7223_v30  ;;  %5383 = vmatpush1.bf16.msra.mxu1 %v7224_v31  ;;  %v7295_v30 = vld [vmem:[#allocation5 + $0x268] ss:$16 sps:$4 sm:$0xff]   ;;  %v7300_v31 = vld [vmem:[#allocation5 + $0x284] ss:$16 sps:$4 sm:$0xff]   ;;  %v7339_v58 = vld [vmem:[#allocation5 + $0x34c] ss:$16 sps:$4 sm:$0xff]  }
  0x7a   :  { %4892 = vmatprep.subr.bf16.mxu0 %v7225_v32  ;;  %5384 = vmatprep.subr.bf16.mxu1 %v7227_v33  ;;  %v7303_v32 = vld [vmem:[#allocation5 + $0x28c] ss:$16 sps:$4 sm:$0xff]   ;;  %v7298_v33 = vld [vmem:[#allocation5 + $0x280] ss:$16 sps:$4 sm:$0xff]   ;;  %v7337_v60 = vld [vmem:[#allocation5 + $0x348] ss:$16 sps:$4 sm:$0xff]  }
  0x7b   :  { %v7349_v4 = vld [vmem:[#allocation5 + $0x388] ss:$16 sps:$4 sm:$0xff]   ;;  %s8477_s29 = scalar_lea.vmem %s6219_s28, 32 }
  0x7c   :  { %p8478_p12 = scmp.ne.s32.totalorder %s6219_s28, %s8477_s29  ;;  %p8483_p0 = scmp.lt.s32.totalorder %s8477_s29, %s8477_s29 }
  0x7d   :  { %4893 = vmatpush1.bf16.msra.mxu0 %v7229_v34  ;;  %5385 = vmatpush1.bf16.msra.mxu1 %v7230_v35  ;;  %v7301_v34 = vld [vmem:[#allocation5 + $0x288] ss:$16 sps:$4 sm:$0xff]   ;;  %v7306_v35 = vld [vmem:[#allocation5 + $0x2a4] ss:$16 sps:$4 sm:$0xff]  }
  0x7e   :  { %4894 = vmatprep.subr.bf16.mxu0 %v7231_v39  ;;  %5386 = vmatprep.subr.bf16.mxu1 %v7233_v40  ;;  %v7312_v39 = vld [vmem:[#allocation5 + $0x2c4] ss:$16 sps:$4 sm:$0xff]   ;;  %v7315_v40 = vld [vmem:[#allocation5 + $0x2cc] ss:$16 sps:$4 sm:$0xff]   ;;  %p8484_p1 = por %p8483_p0, %p8482_p13 }
  0x80   :  { %p8485_p2 = pnand %p8484_p1, %p8478_p12 }
  0x81   :  { %4895 = vmatpush1.bf16.msra.mxu0 %v7235_v41  ;;  %5387 = vmatpush1.bf16.msra.mxu1 %v7236_v44  ;;  %v7310_v41 = vld [vmem:[#allocation5 + $0x2c0] ss:$16 sps:$4 sm:$0xff]   ;;  %v7318_v44 = vld [vmem:[#allocation5 + $0x2e4] ss:$16 sps:$4 sm:$0xff]  }
  0x82   :  { %4896 = vmatprep.subr.bf16.mxu0 %v7237_v45  ;;  %5388 = vmatprep.subr.bf16.mxu1 %v7239_v46  ;;  %v7321_v45 = vld [vmem:[#allocation5 + $0x2ec] ss:$16 sps:$4 sm:$0xff]   ;;  %v7316_v46 = vld [vmem:[#allocation5 + $0x2e0] ss:$16 sps:$4 sm:$0xff]  }
  0x85   :  { %4897 = vmatpush1.bf16.msra.mxu0 %v7241_v47  ;;  %5389 = vmatpush1.bf16.msra.mxu1 %v7242_v48  ;;  %v7319_v47 = vld [vmem:[#allocation5 + $0x2e8] ss:$16 sps:$4 sm:$0xff]   ;;  %v7324_v48 = vld [vmem:[#allocation5 + $0x304] ss:$16 sps:$4 sm:$0xff]  }
  0x86   :  { %4898 = vmatprep.subr.bf16.mxu0 %v7243_v50  ;;  %5390 = vmatprep.subr.bf16.mxu1 %v7245_v51  ;;  %v7327_v50 = vld [vmem:[#allocation5 + $0x30c] ss:$16 sps:$4 sm:$0xff]   ;;  %v7322_v51 = vld [vmem:[#allocation5 + $0x300] ss:$16 sps:$4 sm:$0xff]  }
  0x89   :  { %4899 = vmatpush1.bf16.msra.mxu0 %v7247_v53  ;;  %5391 = vmatpush1.bf16.msra.mxu1 %v7248_v55  ;;  %v7330_v53 = vld [vmem:[#allocation5 + $0x324] ss:$16 sps:$4 sm:$0xff]   ;;  %v7328_v55 = vld [vmem:[#allocation5 + $0x320] ss:$16 sps:$4 sm:$0xff]  }
  0x8a   :  { %4900 = vmatprep.subr.bf16.mxu0 %v7249_v56  ;;  %5392 = vmatprep.subr.bf16.mxu1 %v7251_v57  ;;  %v7331_v56 = vld [vmem:[#allocation5 + $0x328] ss:$16 sps:$4 sm:$0xff]   ;;  %v7336_v57 = vld [vmem:[#allocation5 + $0x344] ss:$16 sps:$4 sm:$0xff]  }
  0x8d   :  { %4901 = vmatpush1.bf16.msra.mxu0 %v7253_v59  ;;  %5393 = vmatpush1.bf16.msra.mxu1 %v7254_v61  ;;  %v7334_v59 = vld [vmem:[#allocation5 + $0x340] ss:$16 sps:$4 sm:$0xff]   ;;  %v7342_v61 = vld [vmem:[#allocation5 + $0x364] ss:$16 sps:$4 sm:$0xff]  }
  0x8e   :  { %4902 = vmatprep.subr.bf16.mxu0 %v7255_v62  ;;  %5394 = vmatprep.subr.bf16.mxu1 %v7257_v63  ;;  %v7345_v62 = vld [vmem:[#allocation5 + $0x36c] ss:$16 sps:$4 sm:$0xff]   ;;  %v7340_v63 = vld [vmem:[#allocation5 + $0x360] ss:$16 sps:$4 sm:$0xff]  }
  0x91   :  { %4903 = vmatpush1.bf16.msra.mxu0 %v7259_v0  ;;  %5395 = vmatpush1.bf16.msra.mxu1 %v7260_v1  ;;  %v7343_v0 = vld [vmem:[#allocation5 + $0x368] ss:$16 sps:$4 sm:$0xff]   ;;  %v7348_v1 = vld [vmem:[#allocation5 + $0x384] ss:$16 sps:$4 sm:$0xff]  }
  0x92   :  { %4904 = vmatprep.subr.bf16.mxu0 %v7261_v2  ;;  %5396 = vmatprep.subr.bf16.mxu1 %v7263_v3  ;;  %v7351_v2 = vld [vmem:[#allocation5 + $0x38c] ss:$16 sps:$4 sm:$0xff]   ;;  %v7346_v3 = vld [vmem:[#allocation5 + $0x380] ss:$16 sps:$4 sm:$0xff]  }
  0x95   :  { %4905 = vmatpush1.bf16.msra.mxu0 %v7265_v5  ;;  %5397 = vmatpush1.bf16.msra.mxu1 %v7266_v6  ;;  %v7354_v5 = vld [vmem:[#allocation5 + $0x3a4] ss:$16 sps:$4 sm:$0xff]   ;;  %v7357_v6 = vld [vmem:[#allocation5 + $0x3ac] ss:$16 sps:$4 sm:$0xff]  }
  0x96   :  { %4906 = vmatprep.subr.bf16.mxu0 %v7267_v7  ;;  %5398 = vmatprep.subr.bf16.mxu1 %v7269_v8  ;;  %v7352_v7 = vld [vmem:[#allocation5 + $0x3a0] ss:$16 sps:$4 sm:$0xff]   ;;  %v7355_v8 = vld [vmem:[#allocation5 + $0x3a8] ss:$16 sps:$4 sm:$0xff]  }
  0x99   :  { %4907 = vmatpush1.bf16.msra.mxu0 %v7271_v10  ;;  %5399 = vmatpush1.bf16.msra.mxu1 %v7272_v11  ;;  %v7360_v10 = vld [vmem:[#allocation5 + $0x3c4] ss:$16 sps:$4 sm:$0xff]   ;;  %v7363_v11 = vld [vmem:[#allocation5 + $0x3cc] ss:$16 sps:$4 sm:$0xff]  }
  0x9a   :  { %4917 = vmatprep.subr.bf16.mxu0 %v7276_v12  ;;  %5409 = vmatprep.subr.bf16.mxu1 %v7279_v13  ;;  %v7358_v12 = vld [vmem:[#allocation5 + $0x3c0] ss:$16 sps:$4 sm:$0xff]   ;;  %v7361_v13 = vld [vmem:[#allocation5 + $0x3c8] ss:$16 sps:$4 sm:$0xff]  }
  0x9c   :  { %4909 = vmatmul.mubr.bf16.vlgmr.msra.gmra.mrb[0].mxu0 %v222_v16  ;;  %5401 = vmatmul.mubr.bf16.vlgmr.msra.gmra.mrb[0].mxu1 %v222_v16  ;;  %v7364_v16 = vld [vmem:[#allocation5 + $0x3e0] ss:$16 sps:$4 sm:$0xff]  }
  0x9d   :  { %4918 = vmatpush1.bf16.msra.mxu0 %v7274_v15  ;;  %5410 = vmatpush1.bf16.msra.mxu1 %v7277_v17  ;;  %v7369_v15 = vld [vmem:[#allocation5 + $0x3ec] ss:$16 sps:$4 sm:$0xff]   ;;  %v7367_v17 = vld [vmem:[#allocation5 + $0x3e8] ss:$16 sps:$4 sm:$0xff]  }
  0x9e   :  { %4919 = vmatprep.subr.bf16.mxu0 %v7282_v18  ;;  %5411 = vmatprep.subr.bf16.mxu1 %v7285_v19  ;;  %v7372_v18 = vld [vmem:[#allocation5 + $0x404] ss:$16 sps:$4 sm:$0xff]   ;;  %v7375_v19 = vld [vmem:[#allocation5 + $0x40c] ss:$16 sps:$4 sm:$0xff]  }
  0x9f   :  { %4949 = vmatprep.mubr.bf16.mxu0 %v225_v20  ;;  %5441 = vmatprep.mubr.bf16.mxu1 %v225_v20  ;;  %v7370_v20 = vld [vmem:[#allocation5 + $0x400] ss:$16 sps:$4 sm:$0xff]  }
  0xa1   :  { %4920 = vmatpush1.bf16.msra.mxu0 %v7280_v21  ;;  %5412 = vmatpush1.bf16.msra.mxu1 %v7283_v22  ;;  %v224_v21 = vpack.c.bf16 %v8615_v9, %v8615_v9  ;;  %v7373_v22 = vld [vmem:[#allocation5 + $0x408] ss:$16 sps:$4 sm:$0xff]   ;;  %v7376_v9 = vld [vmem:[#allocation5 + $0x420] ss:$16 sps:$4 sm:$0xff]  }
  0xa2   :  { %4921 = vmatprep.subr.bf16.mxu0 %v7288_v23  ;;  %5413 = vmatprep.subr.bf16.mxu1 %v7291_v24  ;;  %v8621_v23 = vld [vmem:[#allocation2 + $0x8] sm:$0xff]  ;;  %v7378_v24 = vld [vmem:[#allocation5 + $0x424] ss:$16 sps:$4 sm:$0xff]  }
  0xa5   :  { %4922 = vmatpush1.bf16.msra.mxu0 %v7286_v25  ;;  %5414 = vmatpush1.bf16.msra.mxu1 %v7289_v26  ;;  %v7381_v25 = vld [vmem:[#allocation5 + $0x42c] ss:$16 sps:$4 sm:$0xff]   ;;  %v8625_v26 = vrot.slane %v8621_v23, %v8611_v49 }
  0xa6   :  { %4923 = vmatprep.subr.bf16.mxu0 %v7294_v27  ;;  %5415 = vmatprep.subr.bf16.mxu1 %v7297_v28  ;;  %v7379_v28 = vld [vmem:[#allocation5 + $0x428] ss:$16 sps:$4 sm:$0xff]  }
  0xa7   :  { %v128_v27 = vcombine.high %v8625_v26, %v8625_v26 }
  0xa9   :  { %4924 = vmatpush1.bf16.msra.mxu0 %v7292_v29  ;;  %5416 = vmatpush1.bf16.msra.mxu1 %v7295_v30  ;;  %v7384_v29 = vld [vmem:[#allocation5 + $0x444] ss:$16 sps:$4 sm:$0xff]   ;;  %v7387_v30 = vld [vmem:[#allocation5 + $0x44c] ss:$16 sps:$4 sm:$0xff]  }
  0xaa   :  { %4925 = vmatprep.subr.bf16.mxu0 %v7300_v31  ;;  %5417 = vmatprep.subr.bf16.mxu1 %v7303_v32  ;;  %v227_v31 = vpack.c.bf16 %v128_v27, %v128_v27  ;;  %v7382_v32 = vld [vmem:[#allocation5 + $0x440] ss:$16 sps:$4 sm:$0xff]  }
  0xab   :  { %v7460_v27 = vld [vmem:[#allocation5 + $0x5e0] ss:$16 sps:$4 sm:$0xff]  }
  0xad   :  { %4926 = vmatpush1.bf16.msra.mxu0 %v7298_v33  ;;  %5418 = vmatpush1.bf16.msra.mxu1 %v7301_v34  ;;  %v7385_v33 = vld [vmem:[#allocation5 + $0x448] ss:$16 sps:$4 sm:$0xff]   ;;  %v7390_v34 = vld [vmem:[#allocation5 + $0x464] ss:$16 sps:$4 sm:$0xff]  }
  0xae   :  { %4927 = vmatprep.subr.bf16.mxu0 %v7306_v35  ;;  %5419 = vmatprep.subr.bf16.mxu1 %v7309_v36  ;;  %v7393_v35 = vld [vmem:[#allocation5 + $0x46c] ss:$16 sps:$4 sm:$0xff]   ;;  %v7388_v36 = vld [vmem:[#allocation5 + $0x460] ss:$16 sps:$4 sm:$0xff]  }
  0xb1   :  { %4928 = vmatpush1.bf16.msra.mxu0 %v7304_v37  ;;  %5420 = vmatpush1.bf16.msra.mxu1 %v7307_v38  ;;  %v7391_v37 = vld [vmem:[#allocation5 + $0x468] ss:$16 sps:$4 sm:$0xff]   ;;  %v7396_v38 = vld [vmem:[#allocation5 + $0x484] ss:$16 sps:$4 sm:$0xff]  }
  0xb2   :  { %4929 = vmatprep.subr.bf16.mxu0 %v7312_v39  ;;  %5421 = vmatprep.subr.bf16.mxu1 %v7315_v40  ;;  %v7399_v39 = vld [vmem:[#allocation5 + $0x48c] ss:$16 sps:$4 sm:$0xff]   ;;  %v7394_v40 = vld [vmem:[#allocation5 + $0x480] ss:$16 sps:$4 sm:$0xff]  }
  0xb5   :  { %4930 = vmatpush1.bf16.msra.mxu0 %v7310_v41  ;;  %5422 = vmatpush1.bf16.msra.mxu1 %v7313_v42  ;;  %v7397_v41 = vld [vmem:[#allocation5 + $0x488] ss:$16 sps:$4 sm:$0xff]   ;;  %v7402_v42 = vld [vmem:[#allocation5 + $0x4a4] ss:$16 sps:$4 sm:$0xff]  }
  0xb6   :  { %4931 = vmatprep.subr.bf16.mxu0 %v7318_v44  ;;  %5423 = vmatprep.subr.bf16.mxu1 %v7321_v45  ;;  %v7405_v44 = vld [vmem:[#allocation5 + $0x4ac] ss:$16 sps:$4 sm:$0xff]   ;;  %v7400_v45 = vld [vmem:[#allocation5 + $0x4a0] ss:$16 sps:$4 sm:$0xff]  }
  0xb9   :  { %4932 = vmatpush1.bf16.msra.mxu0 %v7316_v46  ;;  %5424 = vmatpush1.bf16.msra.mxu1 %v7319_v47  ;;  %v7403_v46 = vld [vmem:[#allocation5 + $0x4a8] ss:$16 sps:$4 sm:$0xff]   ;;  %v7408_v47 = vld [vmem:[#allocation5 + $0x4c4] ss:$16 sps:$4 sm:$0xff]  }
  0xba   :  { %4933 = vmatprep.subr.bf16.mxu0 %v7324_v48  ;;  %5425 = vmatprep.subr.bf16.mxu1 %v7327_v50  ;;  %v7411_v48 = vld [vmem:[#allocation5 + $0x4cc] ss:$16 sps:$4 sm:$0xff]   ;;  %v7406_v50 = vld [vmem:[#allocation5 + $0x4c0] ss:$16 sps:$4 sm:$0xff]  }
  0xbd   :  { %4934 = vmatpush1.bf16.msra.mxu0 %v7322_v51  ;;  %5426 = vmatpush1.bf16.msra.mxu1 %v7325_v52  ;;  %v7409_v51 = vld [vmem:[#allocation5 + $0x4c8] ss:$16 sps:$4 sm:$0xff]   ;;  %v7414_v52 = vld [vmem:[#allocation5 + $0x4e4] ss:$16 sps:$4 sm:$0xff]  }
  0xbe   :  { %4935 = vmatprep.subr.bf16.mxu0 %v7330_v53  ;;  %5427 = vmatprep.subr.bf16.mxu1 %v7333_v54  ;;  %v7417_v53 = vld [vmem:[#allocation5 + $0x4ec] ss:$16 sps:$4 sm:$0xff]   ;;  %v7412_v54 = vld [vmem:[#allocation5 + $0x4e0] ss:$16 sps:$4 sm:$0xff]  }
  0xc1   :  { %4936 = vmatpush1.bf16.msra.mxu0 %v7328_v55  ;;  %5428 = vmatpush1.bf16.msra.mxu1 %v7331_v56  ;;  %v7415_v55 = vld [vmem:[#allocation5 + $0x4e8] ss:$16 sps:$4 sm:$0xff]   ;;  %v7420_v56 = vld [vmem:[#allocation5 + $0x504] ss:$16 sps:$4 sm:$0xff]  }
  0xc2   :  { %4937 = vmatprep.subr.bf16.mxu0 %v7336_v57  ;;  %5429 = vmatprep.subr.bf16.mxu1 %v7339_v58  ;;  %v7423_v57 = vld [vmem:[#allocation5 + $0x50c] ss:$16 sps:$4 sm:$0xff]   ;;  %v7418_v58 = vld [vmem:[#allocation5 + $0x500] ss:$16 sps:$4 sm:$0xff]  }
  0xc5   :  { %4938 = vmatpush1.bf16.msra.mxu0 %v7334_v59  ;;  %5430 = vmatpush1.bf16.msra.mxu1 %v7337_v60  ;;  %v7421_v59 = vld [vmem:[#allocation5 + $0x508] ss:$16 sps:$4 sm:$0xff]   ;;  %v7426_v60 = vld [vmem:[#allocation5 + $0x524] ss:$16 sps:$4 sm:$0xff]  }
  0xc6   :  { %4939 = vmatprep.subr.bf16.mxu0 %v7342_v61  ;;  %5431 = vmatprep.subr.bf16.mxu1 %v7345_v62  ;;  %v7429_v61 = vld [vmem:[#allocation5 + $0x52c] ss:$16 sps:$4 sm:$0xff]   ;;  %v7424_v62 = vld [vmem:[#allocation5 + $0x520] ss:$16 sps:$4 sm:$0xff]  }
  0xc9   :  { %4940 = vmatpush1.bf16.msra.mxu0 %v7340_v63  ;;  %5432 = vmatpush1.bf16.msra.mxu1 %v7343_v0  ;;  %v7427_v63 = vld [vmem:[#allocation5 + $0x528] ss:$16 sps:$4 sm:$0xff]   ;;  %v7432_v0 = vld [vmem:[#allocation5 + $0x544] ss:$16 sps:$4 sm:$0xff]  }
  0xca   :  { %4941 = vmatprep.subr.bf16.mxu0 %v7348_v1  ;;  %5433 = vmatprep.subr.bf16.mxu1 %v7351_v2  ;;  %v7435_v1 = vld [vmem:[#allocation5 + $0x54c] ss:$16 sps:$4 sm:$0xff]   ;;  %v7430_v2 = vld [vmem:[#allocation5 + $0x540] ss:$16 sps:$4 sm:$0xff]  }
  0xcd   :  { %4942 = vmatpush1.bf16.msra.mxu0 %v7346_v3  ;;  %5434 = vmatpush1.bf16.msra.mxu1 %v7349_v4  ;;  %v7433_v3 = vld [vmem:[#allocation5 + $0x548] ss:$16 sps:$4 sm:$0xff]   ;;  %v7438_v4 = vld [vmem:[#allocation5 + $0x564] ss:$16 sps:$4 sm:$0xff]  }
  0xce   :  { %4943 = vmatprep.subr.bf16.mxu0 %v7354_v5  ;;  %5435 = vmatprep.subr.bf16.mxu1 %v7357_v6  ;;  %v7441_v5 = vld [vmem:[#allocation5 + $0x56c] ss:$16 sps:$4 sm:$0xff]   ;;  %v7436_v6 = vld [vmem:[#allocation5 + $0x560] ss:$16 sps:$4 sm:$0xff]  }
  0xd1   :  { %4944 = vmatpush1.bf16.msra.mxu0 %v7352_v7  ;;  %5436 = vmatpush1.bf16.msra.mxu1 %v7355_v8  ;;  %v7439_v7 = vld [vmem:[#allocation5 + $0x568] ss:$16 sps:$4 sm:$0xff]   ;;  %v7444_v8 = vld [vmem:[#allocation5 + $0x584] ss:$16 sps:$4 sm:$0xff]  }
  0xd2   :  { %4945 = vmatprep.subr.bf16.mxu0 %v7360_v10  ;;  %5437 = vmatprep.subr.bf16.mxu1 %v7363_v11  ;;  %v7447_v10 = vld [vmem:[#allocation5 + $0x58c] ss:$16 sps:$4 sm:$0xff]   ;;  %v7442_v11 = vld [vmem:[#allocation5 + $0x580] ss:$16 sps:$4 sm:$0xff]  }
  0xd5   :  { %4946 = vmatpush1.bf16.msra.mxu0 %v7358_v12  ;;  %5438 = vmatpush1.bf16.msra.mxu1 %v7361_v13  ;;  %v7445_v12 = vld [vmem:[#allocation5 + $0x588] ss:$16 sps:$4 sm:$0xff]   ;;  %v7450_v13 = vld [vmem:[#allocation5 + $0x5a4] ss:$16 sps:$4 sm:$0xff]  }
  0xd6   :  { %4947 = vmatprep.subr.bf16.mxu0 %v7366_v14  ;;  %5439 = vmatprep.subr.bf16.mxu1 %v7369_v15  ;;  %v7453_v14 = vld [vmem:[#allocation5 + $0x5ac] ss:$16 sps:$4 sm:$0xff]   ;;  %v7448_v15 = vld [vmem:[#allocation5 + $0x5a0] ss:$16 sps:$4 sm:$0xff]  }
  0xd9   :  { %4948 = vmatpush1.bf16.msra.mxu0 %v7364_v16  ;;  %5440 = vmatpush1.bf16.msra.mxu1 %v7367_v17  ;;  %v7451_v16 = vld [vmem:[#allocation5 + $0x5a8] ss:$16 sps:$4 sm:$0xff]   ;;  %v7456_v17 = vld [vmem:[#allocation5 + $0x5c4] ss:$16 sps:$4 sm:$0xff]  }
  0xda   :  { %4958 = vmatprep.subr.bf16.mxu0 %v7372_v18  ;;  %5450 = vmatprep.subr.bf16.mxu1 %v7375_v19  ;;  %v7459_v18 = vld [vmem:[#allocation5 + $0x5cc] ss:$16 sps:$4 sm:$0xff]   ;;  %v113_v19 = vcombine.high %v8621_v23, %v8621_v23 }
  0xdc   :  { %4950 = vmatmul.mubr.bf16.vlgmr.msra.gmra.mrb[0].mxu0 %v224_v21  ;;  %5442 = vmatmul.mubr.bf16.vlgmr.msra.gmra.mrb[0].mxu1 %v224_v21  ;;  %v7457_v21 = vld [vmem:[#allocation5 + $0x5c8] ss:$16 sps:$4 sm:$0xff]  }
  0xdd   :  { %4959 = vmatpush1.bf16.msra.mxu0 %v7370_v20  ;;  %5451 = vmatpush1.bf16.msra.mxu1 %v7373_v22  ;;  %v7454_v20 = vld [vmem:[#allocation5 + $0x5c0] ss:$16 sps:$4 sm:$0xff]   ;;  %v7462_v22 = vld [vmem:[#allocation5 + $0x5e4] ss:$16 sps:$4 sm:$0xff]  }
  0xde   :  { %4960 = vmatprep.subr.bf16.mxu0 %v7378_v24  ;;  %5452 = vmatprep.subr.bf16.mxu1 %v7381_v25  ;;  %v7465_v24 = vld [vmem:[#allocation5 + $0x5ec] ss:$16 sps:$4 sm:$0xff]   ;;  %v8632_v25 = vrot.slane %v113_v19, %v8611_v49  ;;  %v7541_v19 = vld [vmem:[#allocation5 + $0x788] ss:$16 sps:$4 sm:$0xff]  }
  0xdf   :  { %4990 = vmatprep.mubr.bf16.mxu0 %v227_v31  ;;  %5482 = vmatprep.mubr.bf16.mxu1 %v227_v31  ;;  %v7466_v31 = vld [vmem:[#allocation5 + $0x600] ss:$16 sps:$4 sm:$0xff]  }
  0xe0   :  { %v129_v23 = vcombine.high %v8632_v25, %v8632_v25 }
  0xe1   :  { %4961 = vmatpush1.bf16.msra.mxu0 %v7376_v9  ;;  %5453 = vmatpush1.bf16.msra.mxu1 %v7379_v28  ;;  %v7463_v9 = vld [vmem:[#allocation5 + $0x5e8] ss:$16 sps:$4 sm:$0xff]   ;;  %v7468_v28 = vld [vmem:[#allocation5 + $0x604] ss:$16 sps:$4 sm:$0xff]  }
  0xe2   :  { %4962 = vmatprep.subr.bf16.mxu0 %v7384_v29  ;;  %5454 = vmatprep.subr.bf16.mxu1 %v7387_v30  ;;  %v7471_v29 = vld [vmem:[#allocation5 + $0x60c] ss:$16 sps:$4 sm:$0xff]   ;;  %v226_v30 = vpack.c.bf16 %v8625_v26, %v8625_v26  ;;  %v7478_v26 = vld [vmem:[#allocation5 + $0x640] ss:$16 sps:$4 sm:$0xff]  }
  0xe5   :  { %4963 = vmatpush1.bf16.msra.mxu0 %v7382_v32  ;;  %5455 = vmatpush1.bf16.msra.mxu1 %v7385_v33  ;;  %v7469_v32 = vld [vmem:[#allocation5 + $0x608] ss:$16 sps:$4 sm:$0xff]   ;;  %v7474_v33 = vld [vmem:[#allocation5 + $0x624] ss:$16 sps:$4 sm:$0xff]  }
  0xe6   :  { %4964 = vmatprep.subr.bf16.mxu0 %v7390_v34  ;;  %5456 = vmatprep.subr.bf16.mxu1 %v7393_v35  ;;  %v7477_v34 = vld [vmem:[#allocation5 + $0x62c] ss:$16 sps:$4 sm:$0xff]   ;;  %v229_v35 = vpack.c.bf16 %v129_v23, %v129_v23  ;;  %v7553_v23 = vld [vmem:[#allocation5 + $0x7c8] ss:$16 sps:$4 sm:$0xff]  }
  0xe9   :  { %4965 = vmatpush1.bf16.msra.mxu0 %v7388_v36  ;;  %5457 = vmatpush1.bf16.msra.mxu1 %v7391_v37  ;;  %v7472_v36 = vld [vmem:[#allocation5 + $0x620] ss:$16 sps:$4 sm:$0xff]   ;;  %v7475_v37 = vld [vmem:[#allocation5 + $0x628] ss:$16 sps:$4 sm:$0xff]  }
  0xea   :  { %4966 = vmatprep.subr.bf16.mxu0 %v7396_v38  ;;  %5458 = vmatprep.subr.bf16.mxu1 %v7399_v39  ;;  %v7480_v38 = vld [vmem:[#allocation5 + $0x644] ss:$16 sps:$4 sm:$0xff]   ;;  %v7483_v39 = vld [vmem:[#allocation5 + $0x64c] ss:$16 sps:$4 sm:$0xff]  }
  0xed   :  { %4967 = vmatpush1.bf16.msra.mxu0 %v7394_v40  ;;  %5459 = vmatpush1.bf16.msra.mxu1 %v7397_v41  ;;  %v7481_v40 = vld [vmem:[#allocation5 + $0x648] ss:$16 sps:$4 sm:$0xff]   ;;  %v7486_v41 = vld [vmem:[#allocation5 + $0x664] ss:$16 sps:$4 sm:$0xff]  }
  0xee   :  { %4968 = vmatprep.subr.bf16.mxu0 %v7402_v42  ;;  %5460 = vmatprep.subr.bf16.mxu1 %v7405_v44  ;;  %v7489_v42 = vld [vmem:[#allocation5 + $0x66c] ss:$16 sps:$4 sm:$0xff]   ;;  %v7484_v44 = vld [vmem:[#allocation5 + $0x660] ss:$16 sps:$4 sm:$0xff]  }
  0xf1   :  { %4969 = vmatpush1.bf16.msra.mxu0 %v7400_v45  ;;  %5461 = vmatpush1.bf16.msra.mxu1 %v7403_v46  ;;  %v7487_v45 = vld [vmem:[#allocation5 + $0x668] ss:$16 sps:$4 sm:$0xff]   ;;  %v7492_v46 = vld [vmem:[#allocation5 + $0x684] ss:$16 sps:$4 sm:$0xff]  }
  0xf2   :  { %4970 = vmatprep.subr.bf16.mxu0 %v7408_v47  ;;  %5462 = vmatprep.subr.bf16.mxu1 %v7411_v48  ;;  %v7495_v47 = vld [vmem:[#allocation5 + $0x68c] ss:$16 sps:$4 sm:$0xff]   ;;  %v7490_v48 = vld [vmem:[#allocation5 + $0x680] ss:$16 sps:$4 sm:$0xff]  }
  0xf5   :  { %4971 = vmatpush1.bf16.msra.mxu0 %v7406_v50  ;;  %5463 = vmatpush1.bf16.msra.mxu1 %v7409_v51  ;;  %v7493_v50 = vld [vmem:[#allocation5 + $0x688] ss:$16 sps:$4 sm:$0xff]   ;;  %v7498_v51 = vld [vmem:[#allocation5 + $0x6a4] ss:$16 sps:$4 sm:$0xff]  }
  0xf6   :  { %4972 = vmatprep.subr.bf16.mxu0 %v7414_v52  ;;  %5464 = vmatprep.subr.bf16.mxu1 %v7417_v53  ;;  %v7501_v52 = vld [vmem:[#allocation5 + $0x6ac] ss:$16 sps:$4 sm:$0xff]   ;;  %v7496_v53 = vld [vmem:[#allocation5 + $0x6a0] ss:$16 sps:$4 sm:$0xff]  }
  0xf9   :  { %4973 = vmatpush1.bf16.msra.mxu0 %v7412_v54  ;;  %5465 = vmatpush1.bf16.msra.mxu1 %v7415_v55  ;;  %v7499_v54 = vld [vmem:[#allocation5 + $0x6a8] ss:$16 sps:$4 sm:$0xff]   ;;  %v7504_v55 = vld [vmem:[#allocation5 + $0x6c4] ss:$16 sps:$4 sm:$0xff]  }
  0xfa   :  { %4974 = vmatprep.subr.bf16.mxu0 %v7420_v56  ;;  %5466 = vmatprep.subr.bf16.mxu1 %v7423_v57  ;;  %v7507_v56 = vld [vmem:[#allocation5 + $0x6cc] ss:$16 sps:$4 sm:$0xff]   ;;  %v7502_v57 = vld [vmem:[#allocation5 + $0x6c0] ss:$16 sps:$4 sm:$0xff]  }
  0xfd   :  { %4975 = vmatpush1.bf16.msra.mxu0 %v7418_v58  ;;  %5467 = vmatpush1.bf16.msra.mxu1 %v7421_v59  ;;  %v7505_v58 = vld [vmem:[#allocation5 + $0x6c8] ss:$16 sps:$4 sm:$0xff]   ;;  %v7510_v59 = vld [vmem:[#allocation5 + $0x6e4] ss:$16 sps:$4 sm:$0xff]  }
  0xfe   :  { %4976 = vmatprep.subr.bf16.mxu0 %v7426_v60  ;;  %5468 = vmatprep.subr.bf16.mxu1 %v7429_v61  ;;  %v7513_v60 = vld [vmem:[#allocation5 + $0x6ec] ss:$16 sps:$4 sm:$0xff]   ;;  %v7508_v61 = vld [vmem:[#allocation5 + $0x6e0] ss:$16 sps:$4 sm:$0xff]  }
 0x101   :  { %4977 = vmatpush1.bf16.msra.mxu0 %v7424_v62  ;;  %5469 = vmatpush1.bf16.msra.mxu1 %v7427_v63  ;;  %v7511_v62 = vld [vmem:[#allocation5 + $0x6e8] ss:$16 sps:$4 sm:$0xff]   ;;  %v7516_v63 = vld [vmem:[#allocation5 + $0x704] ss:$16 sps:$4 sm:$0xff]  }
 0x102   :  { %4978 = vmatprep.subr.bf16.mxu0 %v7432_v0  ;;  %5470 = vmatprep.subr.bf16.mxu1 %v7435_v1  ;;  %v7519_v0 = vld [vmem:[#allocation5 + $0x70c] ss:$16 sps:$4 sm:$0xff]   ;;  %v7514_v1 = vld [vmem:[#allocation5 + $0x700] ss:$16 sps:$4 sm:$0xff]  }
 0x105   :  { %4979 = vmatpush1.bf16.msra.mxu0 %v7430_v2  ;;  %5471 = vmatpush1.bf16.msra.mxu1 %v7433_v3  ;;  %v7517_v2 = vld [vmem:[#allocation5 + $0x708] ss:$16 sps:$4 sm:$0xff]   ;;  %v7522_v3 = vld [vmem:[#allocation5 + $0x724] ss:$16 sps:$4 sm:$0xff]  }
 0x106   :  { %4980 = vmatprep.subr.bf16.mxu0 %v7438_v4  ;;  %5472 = vmatprep.subr.bf16.mxu1 %v7441_v5  ;;  %v7525_v4 = vld [vmem:[#allocation5 + $0x72c] ss:$16 sps:$4 sm:$0xff]   ;;  %v7520_v5 = vld [vmem:[#allocation5 + $0x720] ss:$16 sps:$4 sm:$0xff]  }
 0x109   :  { %4981 = vmatpush1.bf16.msra.mxu0 %v7436_v6  ;;  %5473 = vmatpush1.bf16.msra.mxu1 %v7439_v7  ;;  %v7523_v6 = vld [vmem:[#allocation5 + $0x728] ss:$16 sps:$4 sm:$0xff]   ;;  %v7528_v7 = vld [vmem:[#allocation5 + $0x744] ss:$16 sps:$4 sm:$0xff]  }
 0x10a   :  { %4982 = vmatprep.subr.bf16.mxu0 %v7444_v8  ;;  %5474 = vmatprep.subr.bf16.mxu1 %v7447_v10  ;;  %v7531_v8 = vld [vmem:[#allocation5 + $0x74c] ss:$16 sps:$4 sm:$0xff]   ;;  %v7526_v10 = vld [vmem:[#allocation5 + $0x740] ss:$16 sps:$4 sm:$0xff]  }
 0x10d   :  { %4983 = vmatpush1.bf16.msra.mxu0 %v7442_v11  ;;  %5475 = vmatpush1.bf16.msra.mxu1 %v7445_v12  ;;  %v7529_v11 = vld [vmem:[#allocation5 + $0x748] ss:$16 sps:$4 sm:$0xff]   ;;  %v7534_v12 = vld [vmem:[#allocation5 + $0x764] ss:$16 sps:$4 sm:$0xff]  }
 0x10e   :  { %4984 = vmatprep.subr.bf16.mxu0 %v7450_v13  ;;  %5476 = vmatprep.subr.bf16.mxu1 %v7453_v14  ;;  %v7537_v13 = vld [vmem:[#allocation5 + $0x76c] ss:$16 sps:$4 sm:$0xff]   ;;  %v7532_v14 = vld [vmem:[#allocation5 + $0x760] ss:$16 sps:$4 sm:$0xff]  }
 0x111   :  { %4985 = vmatpush1.bf16.msra.mxu0 %v7448_v15  ;;  %5477 = vmatpush1.bf16.msra.mxu1 %v7451_v16  ;;  %v7535_v15 = vld [vmem:[#allocation5 + $0x768] ss:$16 sps:$4 sm:$0xff]   ;;  %v7540_v16 = vld [vmem:[#allocation5 + $0x784] ss:$16 sps:$4 sm:$0xff]  }
 0x112   :  { %4986 = vmatprep.subr.bf16.mxu0 %v7456_v17  ;;  %5478 = vmatprep.subr.bf16.mxu1 %v7459_v18  ;;  %v7543_v17 = vld [vmem:[#allocation5 + $0x78c] ss:$16 sps:$4 sm:$0xff]   ;;  %v7538_v18 = vld [vmem:[#allocation5 + $0x780] ss:$16 sps:$4 sm:$0xff]  }
 0x115   :  { %4987 = vmatpush1.bf16.msra.mxu0 %v7454_v20  ;;  %5479 = vmatpush1.bf16.msra.mxu1 %v7457_v21  ;;  %v7546_v20 = vld [vmem:[#allocation5 + $0x7a4] ss:$16 sps:$4 sm:$0xff]   ;;  %v7549_v21 = vld [vmem:[#allocation5 + $0x7ac] ss:$16 sps:$4 sm:$0xff]  }
 0x116   :  { %4988 = vmatprep.subr.bf16.mxu0 %v7462_v22  ;;  %5480 = vmatprep.subr.bf16.mxu1 %v7465_v24  ;;  %v7544_v22 = vld [vmem:[#allocation5 + $0x7a0] ss:$16 sps:$4 sm:$0xff]   ;;  %v7547_v24 = vld [vmem:[#allocation5 + $0x7a8] ss:$16 sps:$4 sm:$0xff]  }
 0x119   :  { %4989 = vmatpush1.bf16.msra.mxu0 %v7460_v27  ;;  %5481 = vmatpush1.bf16.msra.mxu1 %v7463_v9  ;;  %v7552_v27 = vld [vmem:[#allocation5 + $0x7c4] ss:$16 sps:$4 sm:$0xff]   ;;  %v7555_v9 = vld [vmem:[#allocation5 + $0x7cc] ss:$16 sps:$4 sm:$0xff]  }
 0x11a   :  { %4999 = vmatprep.subr.bf16.mxu0 %v7468_v28  ;;  %5491 = vmatprep.subr.bf16.mxu1 %v7471_v29  ;;  %v7550_v28 = vld [vmem:[#allocation5 + $0x7c0] ss:$16 sps:$4 sm:$0xff]  }
 0x11b   :  { %v8638_v29 = vld [vmem:[#allocation2 + $0x10] sm:$0xff] }
 0x11c   :  { %4991 = vmatmul.mubr.bf16.vlgmr.msra.gmra.mrb[0].mxu0 %v226_v30  ;;  %5483 = vmatmul.mubr.bf16.vlgmr.msra.gmra.mrb[0].mxu1 %v226_v30  ;;  %v7558_v30 = vld [vmem:[#allocation5 + $0x7e4] ss:$16 sps:$4 sm:$0xff]  }
 0x11d   :  { %5000 = vmatpush1.bf16.msra.mxu0 %v7466_v31  ;;  %5492 = vmatpush1.bf16.msra.mxu1 %v7469_v32  ;;  %v7561_v31 = vld [vmem:[#allocation5 + $0x7ec] ss:$16 sps:$4 sm:$0xff]   ;;  %v8642_v32 = vrot.slane %v8638_v29, %v8611_v49 }
 0x11e   :  { %5001 = vmatprep.subr.bf16.mxu0 %v7474_v33  ;;  %5493 = vmatprep.subr.bf16.mxu1 %v7477_v34  ;;  %v7556_v33 = vld [vmem:[#allocation5 + $0x7e0] ss:$16 sps:$4 sm:$0xff]   ;;  %v7559_v34 = vld [vmem:[#allocation5 + $0x7e8] ss:$16 sps:$4 sm:$0xff]  }
 0x11f   :  { %5031 = vmatprep.mubr.bf16.mxu0 %v229_v35  ;;  %5523 = vmatprep.mubr.bf16.mxu1 %v229_v35  ;;  %v7565_v35 = vld [vmem:[#allocation5 + $0x804] ss:$16 sps:$4 sm:$0xff]  }
 0x121   :  { %5002 = vmatpush1.bf16.msra.mxu0 %v7472_v36  ;;  %5494 = vmatpush1.bf16.msra.mxu1 %v7475_v37  ;;  %v7568_v36 = vld [vmem:[#allocation5 + $0x80c] ss:$16 sps:$4 sm:$0xff]   ;;  %v145_v37 = vcombine.high %v8642_v32, %v8642_v32 }
 0x122   :  { %5003 = vmatprep.subr.bf16.mxu0 %v7480_v38  ;;  %5495 = vmatprep.subr.bf16.mxu1 %v7483_v39  ;;  %v7563_v38 = vld [vmem:[#allocation5 + $0x800] ss:$16 sps:$4 sm:$0xff]   ;;  %v228_v39 = vpack.c.bf16 %v8632_v25, %v8632_v25 }
 0x123   :  { %v7575_v25 = vld [vmem:[#allocation5 + $0x840] ss:$16 sps:$4 sm:$0xff]  }
 0x125   :  { %5004 = vmatpush1.bf16.msra.mxu0 %v7478_v26  ;;  %5496 = vmatpush1.bf16.msra.mxu1 %v7481_v40  ;;  %v7566_v26 = vld [vmem:[#allocation5 + $0x808] ss:$16 sps:$4 sm:$0xff]   ;;  %v7571_v40 = vld [vmem:[#allocation5 + $0x824] ss:$16 sps:$4 sm:$0xff]  }
 0x126   :  { %5005 = vmatprep.subr.bf16.mxu0 %v7486_v41  ;;  %5497 = vmatprep.subr.bf16.mxu1 %v7489_v42  ;;  %v7574_v41 = vld [vmem:[#allocation5 + $0x82c] ss:$16 sps:$4 sm:$0xff]   ;;  %v231_v42 = vpack.c.bf16 %v145_v37, %v145_v37  ;;  %v7647_v37 = vld [vmem:[#allocation5 + $0x9c0] ss:$16 sps:$4 sm:$0xff]  }
 0x129   :  { %5006 = vmatpush1.bf16.msra.mxu0 %v7484_v44  ;;  %5498 = vmatpush1.bf16.msra.mxu1 %v7487_v45  ;;  %v7569_v44 = vld [vmem:[#allocation5 + $0x820] ss:$16 sps:$4 sm:$0xff]   ;;  %v7572_v45 = vld [vmem:[#allocation5 + $0x828] ss:$16 sps:$4 sm:$0xff]  }
 0x12a   :  { %5007 = vmatprep.subr.bf16.mxu0 %v7492_v46  ;;  %5499 = vmatprep.subr.bf16.mxu1 %v7495_v47  ;;  %v7577_v46 = vld [vmem:[#allocation5 + $0x844] ss:$16 sps:$4 sm:$0xff]   ;;  %v7580_v47 = vld [vmem:[#allocation5 + $0x84c] ss:$16 sps:$4 sm:$0xff]  }
 0x12d   :  { %5008 = vmatpush1.bf16.msra.mxu0 %v7490_v48  ;;  %5500 = vmatpush1.bf16.msra.mxu1 %v7493_v50  ;;  %v7578_v48 = vld [vmem:[#allocation5 + $0x848] ss:$16 sps:$4 sm:$0xff]   ;;  %v7583_v50 = vld [vmem:[#allocation5 + $0x864] ss:$16 sps:$4 sm:$0xff]  }
 0x12e   :  { %5009 = vmatprep.subr.bf16.mxu0 %v7498_v51  ;;  %5501 = vmatprep.subr.bf16.mxu1 %v7501_v52  ;;  %v7586_v51 = vld [vmem:[#allocation5 + $0x86c] ss:$16 sps:$4 sm:$0xff]   ;;  %v7581_v52 = vld [vmem:[#allocation5 + $0x860] ss:$16 sps:$4 sm:$0xff]  }
 0x131   :  { %5010 = vmatpush1.bf16.msra.mxu0 %v7496_v53  ;;  %5502 = vmatpush1.bf16.msra.mxu1 %v7499_v54  ;;  %v7584_v53 = vld [vmem:[#allocation5 + $0x868] ss:$16 sps:$4 sm:$0xff]   ;;  %v7589_v54 = vld [vmem:[#allocation5 + $0x884] ss:$16 sps:$4 sm:$0xff]  }
 0x132   :  { %5011 = vmatprep.subr.bf16.mxu0 %v7504_v55  ;;  %5503 = vmatprep.subr.bf16.mxu1 %v7507_v56  ;;  %v7592_v55 = vld [vmem:[#allocation5 + $0x88c] ss:$16 sps:$4 sm:$0xff]   ;;  %v7587_v56 = vld [vmem:[#allocation5 + $0x880] ss:$16 sps:$4 sm:$0xff]  }
 0x135   :  { %5012 = vmatpush1.bf16.msra.mxu0 %v7502_v57  ;;  %5504 = vmatpush1.bf16.msra.mxu1 %v7505_v58  ;;  %v7590_v57 = vld [vmem:[#allocation5 + $0x888] ss:$16 sps:$4 sm:$0xff]   ;;  %v7595_v58 = vld [vmem:[#allocation5 + $0x8a4] ss:$16 sps:$4 sm:$0xff]  }
 0x136   :  { %5013 = vmatprep.subr.bf16.mxu0 %v7510_v59  ;;  %5505 = vmatprep.subr.bf16.mxu1 %v7513_v60  ;;  %v7598_v59 = vld [vmem:[#allocation5 + $0x8ac] ss:$16 sps:$4 sm:$0xff]   ;;  %v7593_v60 = vld [vmem:[#allocation5 + $0x8a0] ss:$16 sps:$4 sm:$0xff]  }
 0x139   :  { %5014 = vmatpush1.bf16.msra.mxu0 %v7508_v61  ;;  %5506 = vmatpush1.bf16.msra.mxu1 %v7511_v62  ;;  %v7596_v61 = vld [vmem:[#allocation5 + $0x8a8] ss:$16 sps:$4 sm:$0xff]   ;;  %v7601_v62 = vld [vmem:[#allocation5 + $0x8c4] ss:$16 sps:$4 sm:$0xff]  }
 0x13a   :  { %5015 = vmatprep.subr.bf16.mxu0 %v7516_v63  ;;  %5507 = vmatprep.subr.bf16.mxu1 %v7519_v0  ;;  %v7604_v63 = vld [vmem:[#allocation5 + $0x8cc] ss:$16 sps:$4 sm:$0xff]   ;;  %v7599_v0 = vld [vmem:[#allocation5 + $0x8c0] ss:$16 sps:$4 sm:$0xff]  }
 0x13d   :  { %5016 = vmatpush1.bf16.msra.mxu0 %v7514_v1  ;;  %5508 = vmatpush1.bf16.msra.mxu1 %v7517_v2  ;;  %v7602_v1 = vld [vmem:[#allocation5 + $0x8c8] ss:$16 sps:$4 sm:$0xff]   ;;  %v7607_v2 = vld [vmem:[#allocation5 + $0x8e4] ss:$16 sps:$4 sm:$0xff]  }
 0x13e   :  { %5017 = vmatprep.subr.bf16.mxu0 %v7522_v3  ;;  %5509 = vmatprep.subr.bf16.mxu1 %v7525_v4  ;;  %v7610_v3 = vld [vmem:[#allocation5 + $0x8ec] ss:$16 sps:$4 sm:$0xff]   ;;  %v7605_v4 = vld [vmem:[#allocation5 + $0x8e0] ss:$16 sps:$4 sm:$0xff]  }
 0x141   :  { %5018 = vmatpush1.bf16.msra.mxu0 %v7520_v5  ;;  %5510 = vmatpush1.bf16.msra.mxu1 %v7523_v6  ;;  %v7608_v5 = vld [vmem:[#allocation5 + $0x8e8] ss:$16 sps:$4 sm:$0xff]   ;;  %v7613_v6 = vld [vmem:[#allocation5 + $0x904] ss:$16 sps:$4 sm:$0xff]  }
 0x142   :  { %5019 = vmatprep.subr.bf16.mxu0 %v7528_v7  ;;  %5511 = vmatprep.subr.bf16.mxu1 %v7531_v8  ;;  %v7616_v7 = vld [vmem:[#allocation5 + $0x90c] ss:$16 sps:$4 sm:$0xff]   ;;  %v7611_v8 = vld [vmem:[#allocation5 + $0x900] ss:$16 sps:$4 sm:$0xff]  }
 0x145   :  { %5020 = vmatpush1.bf16.msra.mxu0 %v7526_v10  ;;  %5512 = vmatpush1.bf16.msra.mxu1 %v7529_v11  ;;  %v7614_v10 = vld [vmem:[#allocation5 + $0x908] ss:$16 sps:$4 sm:$0xff]   ;;  %v7619_v11 = vld [vmem:[#allocation5 + $0x924] ss:$16 sps:$4 sm:$0xff]  }
 0x146   :  { %5021 = vmatprep.subr.bf16.mxu0 %v7534_v12  ;;  %5513 = vmatprep.subr.bf16.mxu1 %v7537_v13  ;;  %v7622_v12 = vld [vmem:[#allocation5 + $0x92c] ss:$16 sps:$4 sm:$0xff]   ;;  %v7617_v13 = vld [vmem:[#allocation5 + $0x920] ss:$16 sps:$4 sm:$0xff]  }
 0x149   :  { %5022 = vmatpush1.bf16.msra.mxu0 %v7532_v14  ;;  %5514 = vmatpush1.bf16.msra.mxu1 %v7535_v15  ;;  %v7620_v14 = vld [vmem:[#allocation5 + $0x928] ss:$16 sps:$4 sm:$0xff]   ;;  %v7625_v15 = vld [vmem:[#allocation5 + $0x944] ss:$16 sps:$4 sm:$0xff]  }
 0x14a   :  { %5023 = vmatprep.subr.bf16.mxu0 %v7540_v16  ;;  %5515 = vmatprep.subr.bf16.mxu1 %v7543_v17  ;;  %v7628_v16 = vld [vmem:[#allocation5 + $0x94c] ss:$16 sps:$4 sm:$0xff]   ;;  %v7623_v17 = vld [vmem:[#allocation5 + $0x940] ss:$16 sps:$4 sm:$0xff]  }
 0x14d   :  { %5024 = vmatpush1.bf16.msra.mxu0 %v7538_v18  ;;  %5516 = vmatpush1.bf16.msra.mxu1 %v7541_v19  ;;  %v7626_v18 = vld [vmem:[#allocation5 + $0x948] ss:$16 sps:$4 sm:$0xff]   ;;  %v7631_v19 = vld [vmem:[#allocation5 + $0x964] ss:$16 sps:$4 sm:$0xff]  }
 0x14e   :  { %5025 = vmatprep.subr.bf16.mxu0 %v7546_v20  ;;  %5517 = vmatprep.subr.bf16.mxu1 %v7549_v21  ;;  %v7634_v20 = vld [vmem:[#allocation5 + $0x96c] ss:$16 sps:$4 sm:$0xff]   ;;  %v7629_v21 = vld [vmem:[#allocation5 + $0x960] ss:$16 sps:$4 sm:$0xff]  }
 0x151   :  { %5026 = vmatpush1.bf16.msra.mxu0 %v7544_v22  ;;  %5518 = vmatpush1.bf16.msra.mxu1 %v7547_v24  ;;  %v7632_v22 = vld [vmem:[#allocation5 + $0x968] ss:$16 sps:$4 sm:$0xff]   ;;  %v7637_v24 = vld [vmem:[#allocation5 + $0x984] ss:$16 sps:$4 sm:$0xff]  }
 0x152   :  { %5027 = vmatprep.subr.bf16.mxu0 %v7552_v27  ;;  %5519 = vmatprep.subr.bf16.mxu1 %v7555_v9  ;;  %v7640_v27 = vld [vmem:[#allocation5 + $0x98c] ss:$16 sps:$4 sm:$0xff]   ;;  %v7635_v9 = vld [vmem:[#allocation5 + $0x980] ss:$16 sps:$4 sm:$0xff]  }
 0x155   :  { %5028 = vmatpush1.bf16.msra.mxu0 %v7550_v28  ;;  %5520 = vmatpush1.bf16.msra.mxu1 %v7553_v23  ;;  %v7638_v28 = vld [vmem:[#allocation5 + $0x988] ss:$16 sps:$4 sm:$0xff]   ;;  %v7643_v23 = vld [vmem:[#allocation5 + $0x9a4] ss:$16 sps:$4 sm:$0xff]  }
 0x156   :  { %5029 = vmatprep.subr.bf16.mxu0 %v7558_v30  ;;  %5521 = vmatprep.subr.bf16.mxu1 %v7561_v31  ;;  %v7646_v30 = vld [vmem:[#allocation5 + $0x9ac] ss:$16 sps:$4 sm:$0xff]   ;;  %v7641_v31 = vld [vmem:[#allocation5 + $0x9a0] ss:$16 sps:$4 sm:$0xff]  }
 0x159   :  { %5030 = vmatpush1.bf16.msra.mxu0 %v7556_v33  ;;  %5522 = vmatpush1.bf16.msra.mxu1 %v7559_v34  ;;  %v7644_v33 = vld [vmem:[#allocation5 + $0x9a8] ss:$16 sps:$4 sm:$0xff]   ;;  %v7649_v34 = vld [vmem:[#allocation5 + $0x9c4] ss:$16 sps:$4 sm:$0xff]  }
 0x15a   :  { %5040 = vmatprep.subr.bf16.mxu0 %v7565_v35  ;;  %5532 = vmatprep.subr.bf16.mxu1 %v7568_v36  ;;  %v7652_v35 = vld [vmem:[#allocation5 + $0x9cc] ss:$16 sps:$4 sm:$0xff]   ;;  %v130_v36 = vcombine.high %v8638_v29, %v8638_v29 }
 0x15c   :  { %5032 = vmatmul.mubr.bf16.vlgmr.msra.gmra.mrb[0].mxu0 %v228_v39  ;;  %5524 = vmatmul.mubr.bf16.vlgmr.msra.gmra.mrb[0].mxu1 %v228_v39  ;;  %v7655_v39 = vld [vmem:[#allocation5 + $0x9e4] ss:$16 sps:$4 sm:$0xff]  }
 0x15d   :  { %5041 = vmatpush1.bf16.msra.mxu0 %v7563_v38  ;;  %5533 = vmatpush1.bf16.msra.mxu1 %v7566_v26  ;;  %v7650_v38 = vld [vmem:[#allocation5 + $0x9c8] ss:$16 sps:$4 sm:$0xff]   ;;  %v7658_v26 = vld [vmem:[#allocation5 + $0x9ec] ss:$16 sps:$4 sm:$0xff]  }
 0x15e   :  { %5042 = vmatprep.subr.bf16.mxu0 %v7571_v40  ;;  %5534 = vmatprep.subr.bf16.mxu1 %v7574_v41  ;;  %v8651_v40 = vrot.slane %v130_v36, %v8611_v49  ;;  %v7653_v41 = vld [vmem:[#allocation5 + $0x9e0] ss:$16 sps:$4 sm:$0xff]   ;;  %v7734_v36 = vld [vmem:[#allocation5 + $0xb88] ss:$16 sps:$4 sm:$0xff]  }
 0x15f   :  { %5072 = vmatprep.mubr.bf16.mxu0 %v231_v42  ;;  %5564 = vmatprep.mubr.bf16.mxu1 %v231_v42  ;;  %v7656_v42 = vld [vmem:[#allocation5 + $0x9e8] ss:$16 sps:$4 sm:$0xff]  }
 0x160   :  { %v146_v29 = vcombine.high %v8651_v40, %v8651_v40 }
 0x161   :  { %5043 = vmatpush1.bf16.msra.mxu0 %v7569_v44  ;;  %5535 = vmatpush1.bf16.msra.mxu1 %v7572_v45  ;;  %v7661_v44 = vld [vmem:[#allocation5 + $0xa04] ss:$16 sps:$4 sm:$0xff]   ;;  %v7664_v45 = vld [vmem:[#allocation5 + $0xa0c] ss:$16 sps:$4 sm:$0xff]  }
 0x162   :  { %5044 = vmatprep.subr.bf16.mxu0 %v7577_v46  ;;  %5536 = vmatprep.subr.bf16.mxu1 %v7580_v47  ;;  %v230_v46 = vpack.c.bf16 %v8642_v32, %v8642_v32  ;;  %v7659_v47 = vld [vmem:[#allocation5 + $0xa00] ss:$16 sps:$4 sm:$0xff]  }
 0x163   :  { %v7671_v32 = vld [vmem:[#allocation5 + $0xa40] ss:$16 sps:$4 sm:$0xff]  }
 0x165   :  { %5045 = vmatpush1.bf16.msra.mxu0 %v7575_v25  ;;  %5537 = vmatpush1.bf16.msra.mxu1 %v7578_v48  ;;  %v7662_v25 = vld [vmem:[#allocation5 + $0xa08] ss:$16 sps:$4 sm:$0xff]   ;;  %v7667_v48 = vld [vmem:[#allocation5 + $0xa24] ss:$16 sps:$4 sm:$0xff]  }
 0x166   :  { %5046 = vmatprep.subr.bf16.mxu0 %v7583_v50  ;;  %5538 = vmatprep.subr.bf16.mxu1 %v7586_v51  ;;  %v7670_v50 = vld [vmem:[#allocation5 + $0xa2c] ss:$16 sps:$4 sm:$0xff]   ;;  %v233_v51 = vpack.c.bf16 %v146_v29, %v146_v29  ;;  %v7746_v29 = vld [vmem:[#allocation5 + $0xbc8] ss:$16 sps:$4 sm:$0xff]  }
 0x169   :  { %5047 = vmatpush1.bf16.msra.mxu0 %v7581_v52  ;;  %5539 = vmatpush1.bf16.msra.mxu1 %v7584_v53  ;;  %v7665_v52 = vld [vmem:[#allocation5 + $0xa20] ss:$16 sps:$4 sm:$0xff]   ;;  %v7668_v53 = vld [vmem:[#allocation5 + $0xa28] ss:$16 sps:$4 sm:$0xff]  }
 0x16a   :  { %5048 = vmatprep.subr.bf16.mxu0 %v7589_v54  ;;  %5540 = vmatprep.subr.bf16.mxu1 %v7592_v55  ;;  %v7673_v54 = vld [vmem:[#allocation5 + $0xa44] ss:$16 sps:$4 sm:$0xff]   ;;  %v7676_v55 = vld [vmem:[#allocation5 + $0xa4c] ss:$16 sps:$4 sm:$0xff]  }
 0x16d   :  { %5049 = vmatpush1.bf16.msra.mxu0 %v7587_v56  ;;  %5541 = vmatpush1.bf16.msra.mxu1 %v7590_v57  ;;  %v7674_v56 = vld [vmem:[#allocation5 + $0xa48] ss:$16 sps:$4 sm:$0xff]   ;;  %v7679_v57 = vld [vmem:[#allocation5 + $0xa64] ss:$16 sps:$4 sm:$0xff]  }
 0x16e   :  { %5050 = vmatprep.subr.bf16.mxu0 %v7595_v58  ;;  %5542 = vmatprep.subr.bf16.mxu1 %v7598_v59  ;;  %v7682_v58 = vld [vmem:[#allocation5 + $0xa6c] ss:$16 sps:$4 sm:$0xff]   ;;  %v7677_v59 = vld [vmem:[#allocation5 + $0xa60] ss:$16 sps:$4 sm:$0xff]  }
 0x171   :  { %5051 = vmatpush1.bf16.msra.mxu0 %v7593_v60  ;;  %5543 = vmatpush1.bf16.msra.mxu1 %v7596_v61  ;;  %v7680_v60 = vld [vmem:[#allocation5 + $0xa68] ss:$16 sps:$4 sm:$0xff]   ;;  %v7685_v61 = vld [vmem:[#allocation5 + $0xa84] ss:$16 sps:$4 sm:$0xff]  }
 0x172   :  { %5052 = vmatprep.subr.bf16.mxu0 %v7601_v62  ;;  %5544 = vmatprep.subr.bf16.mxu1 %v7604_v63  ;;  %v7688_v62 = vld [vmem:[#allocation5 + $0xa8c] ss:$16 sps:$4 sm:$0xff]   ;;  %v7683_v63 = vld [vmem:[#allocation5 + $0xa80] ss:$16 sps:$4 sm:$0xff]  }
 0x175   :  { %5053 = vmatpush1.bf16.msra.mxu0 %v7599_v0  ;;  %5545 = vmatpush1.bf16.msra.mxu1 %v7602_v1  ;;  %v7686_v0 = vld [vmem:[#allocation5 + $0xa88] ss:$16 sps:$4 sm:$0xff]   ;;  %v7691_v1 = vld [vmem:[#allocation5 + $0xaa4] ss:$16 sps:$4 sm:$0xff]  }
 0x176   :  { %5054 = vmatprep.subr.bf16.mxu0 %v7607_v2  ;;  %5546 = vmatprep.subr.bf16.mxu1 %v7610_v3  ;;  %v7694_v2 = vld [vmem:[#allocation5 + $0xaac] ss:$16 sps:$4 sm:$0xff]   ;;  %v7689_v3 = vld [vmem:[#allocation5 + $0xaa0] ss:$16 sps:$4 sm:$0xff]  }
 0x179   :  { %5055 = vmatpush1.bf16.msra.mxu0 %v7605_v4  ;;  %5547 = vmatpush1.bf16.msra.mxu1 %v7608_v5  ;;  %v7692_v4 = vld [vmem:[#allocation5 + $0xaa8] ss:$16 sps:$4 sm:$0xff]   ;;  %v7697_v5 = vld [vmem:[#allocation5 + $0xac4] ss:$16 sps:$4 sm:$0xff]  }
 0x17a   :  { %5056 = vmatprep.subr.bf16.mxu0 %v7613_v6  ;;  %5548 = vmatprep.subr.bf16.mxu1 %v7616_v7  ;;  %v7700_v6 = vld [vmem:[#allocation5 + $0xacc] ss:$16 sps:$4 sm:$0xff]   ;;  %v7695_v7 = vld [vmem:[#allocation5 + $0xac0] ss:$16 sps:$4 sm:$0xff]  }
 0x17d   :  { %5057 = vmatpush1.bf16.msra.mxu0 %v7611_v8  ;;  %5549 = vmatpush1.bf16.msra.mxu1 %v7614_v10  ;;  %v7698_v8 = vld [vmem:[#allocation5 + $0xac8] ss:$16 sps:$4 sm:$0xff]   ;;  %v7703_v10 = vld [vmem:[#allocation5 + $0xae4] ss:$16 sps:$4 sm:$0xff]  }
 0x17e   :  { %5058 = vmatprep.subr.bf16.mxu0 %v7619_v11  ;;  %5550 = vmatprep.subr.bf16.mxu1 %v7622_v12  ;;  %v7706_v11 = vld [vmem:[#allocation5 + $0xaec] ss:$16 sps:$4 sm:$0xff]   ;;  %v7701_v12 = vld [vmem:[#allocation5 + $0xae0] ss:$16 sps:$4 sm:$0xff]  }
 0x181   :  { %5059 = vmatpush1.bf16.msra.mxu0 %v7617_v13  ;;  %5551 = vmatpush1.bf16.msra.mxu1 %v7620_v14  ;;  %v7704_v13 = vld [vmem:[#allocation5 + $0xae8] ss:$16 sps:$4 sm:$0xff]   ;;  %v7709_v14 = vld [vmem:[#allocation5 + $0xb04] ss:$16 sps:$4 sm:$0xff]  }
 0x182   :  { %5060 = vmatprep.subr.bf16.mxu0 %v7625_v15  ;;  %5552 = vmatprep.subr.bf16.mxu1 %v7628_v16  ;;  %v7712_v15 = vld [vmem:[#allocation5 + $0xb0c] ss:$16 sps:$4 sm:$0xff]   ;;  %v7707_v16 = vld [vmem:[#allocation5 + $0xb00] ss:$16 sps:$4 sm:$0xff]  }
 0x185   :  { %5061 = vmatpush1.bf16.msra.mxu0 %v7623_v17  ;;  %5553 = vmatpush1.bf16.msra.mxu1 %v7626_v18  ;;  %v7710_v17 = vld [vmem:[#allocation5 + $0xb08] ss:$16 sps:$4 sm:$0xff]   ;;  %v7715_v18 = vld [vmem:[#allocation5 + $0xb24] ss:$16 sps:$4 sm:$0xff]  }
 0x186   :  { %5062 = vmatprep.subr.bf16.mxu0 %v7631_v19  ;;  %5554 = vmatprep.subr.bf16.mxu1 %v7634_v20  ;;  %v7718_v19 = vld [vmem:[#allocation5 + $0xb2c] ss:$16 sps:$4 sm:$0xff]   ;;  %v7713_v20 = vld [vmem:[#allocation5 + $0xb20] ss:$16 sps:$4 sm:$0xff]  }
 0x189   :  { %5063 = vmatpush1.bf16.msra.mxu0 %v7629_v21  ;;  %5555 = vmatpush1.bf16.msra.mxu1 %v7632_v22  ;;  %v7716_v21 = vld [vmem:[#allocation5 + $0xb28] ss:$16 sps:$4 sm:$0xff]   ;;  %v7721_v22 = vld [vmem:[#allocation5 + $0xb44] ss:$16 sps:$4 sm:$0xff]  }
 0x18a   :  { %5064 = vmatprep.subr.bf16.mxu0 %v7637_v24  ;;  %5556 = vmatprep.subr.bf16.mxu1 %v7640_v27  ;;  %v7724_v24 = vld [vmem:[#allocation5 + $0xb4c] ss:$16 sps:$4 sm:$0xff]   ;;  %v7719_v27 = vld [vmem:[#allocation5 + $0xb40] ss:$16 sps:$4 sm:$0xff]  }
 0x18d   :  { %5065 = vmatpush1.bf16.msra.mxu0 %v7635_v9  ;;  %5557 = vmatpush1.bf16.msra.mxu1 %v7638_v28  ;;  %v7722_v9 = vld [vmem:[#allocation5 + $0xb48] ss:$16 sps:$4 sm:$0xff]   ;;  %v7727_v28 = vld [vmem:[#allocation5 + $0xb64] ss:$16 sps:$4 sm:$0xff]  }
 0x18e   :  { %5066 = vmatprep.subr.bf16.mxu0 %v7643_v23  ;;  %5558 = vmatprep.subr.bf16.mxu1 %v7646_v30  ;;  %v7730_v23 = vld [vmem:[#allocation5 + $0xb6c] ss:$16 sps:$4 sm:$0xff]   ;;  %v7725_v30 = vld [vmem:[#allocation5 + $0xb60] ss:$16 sps:$4 sm:$0xff]  }
 0x191   :  { %5067 = vmatpush1.bf16.msra.mxu0 %v7641_v31  ;;  %5559 = vmatpush1.bf16.msra.mxu1 %v7644_v33  ;;  %v7728_v31 = vld [vmem:[#allocation5 + $0xb68] ss:$16 sps:$4 sm:$0xff]   ;;  %v7733_v33 = vld [vmem:[#allocation5 + $0xb84] ss:$16 sps:$4 sm:$0xff]  }
 0x192   :  { %5068 = vmatprep.subr.bf16.mxu0 %v7649_v34  ;;  %5560 = vmatprep.subr.bf16.mxu1 %v7652_v35  ;;  %v7736_v34 = vld [vmem:[#allocation5 + $0xb8c] ss:$16 sps:$4 sm:$0xff]   ;;  %v7731_v35 = vld [vmem:[#allocation5 + $0xb80] ss:$16 sps:$4 sm:$0xff]  }
 0x195   :  { %5069 = vmatpush1.bf16.msra.mxu0 %v7647_v37  ;;  %5561 = vmatpush1.bf16.msra.mxu1 %v7650_v38  ;;  %v7739_v37 = vld [vmem:[#allocation5 + $0xba4] ss:$16 sps:$4 sm:$0xff]   ;;  %v7742_v38 = vld [vmem:[#allocation5 + $0xbac] ss:$16 sps:$4 sm:$0xff]  }
 0x196   :  { %5070 = vmatprep.subr.bf16.mxu0 %v7655_v39  ;;  %5562 = vmatprep.subr.bf16.mxu1 %v7658_v26  ;;  %v7737_v39 = vld [vmem:[#allocation5 + $0xba0] ss:$16 sps:$4 sm:$0xff]   ;;  %v7740_v26 = vld [vmem:[#allocation5 + $0xba8] ss:$16 sps:$4 sm:$0xff]  }
 0x199   :  { %5071 = vmatpush1.bf16.msra.mxu0 %v7653_v41  ;;  %5563 = vmatpush1.bf16.msra.mxu1 %v7656_v42  ;;  %v7745_v41 = vld [vmem:[#allocation5 + $0xbc4] ss:$16 sps:$4 sm:$0xff]   ;;  %v7748_v42 = vld [vmem:[#allocation5 + $0xbcc] ss:$16 sps:$4 sm:$0xff]  }
 0x19a   :  { %5081 = vmatprep.subr.bf16.mxu0 %v7661_v44  ;;  %5573 = vmatprep.subr.bf16.mxu1 %v7664_v45  ;;  %v8657_v44 = vld [vmem:[#allocation2 + $0x18] sm:$0xff]  ;;  %v7743_v45 = vld [vmem:[#allocation5 + $0xbc0] ss:$16 sps:$4 sm:$0xff]  }
 0x19c   :  { %5073 = vmatmul.mubr.bf16.vlgmr.msra.gmra.mrb[0].mxu0 %v230_v46  ;;  %5565 = vmatmul.mubr.bf16.vlgmr.msra.gmra.mrb[0].mxu1 %v230_v46  ;;  %v7751_v46 = vld [vmem:[#allocation5 + $0xbe4] ss:$16 sps:$4 sm:$0xff]  }
 0x19d   :  { %5082 = vmatpush1.bf16.msra.mxu0 %v7659_v47  ;;  %5574 = vmatpush1.bf16.msra.mxu1 %v7662_v25  ;;  %v7754_v47 = vld [vmem:[#allocation5 + $0xbec] ss:$16 sps:$4 sm:$0xff]   ;;  %v8661_v25 = vrot.slane %v8657_v44, %v8611_v49 }
 0x19e   :  { %5083 = vmatprep.subr.bf16.mxu0 %v7667_v48  ;;  %5575 = vmatprep.subr.bf16.mxu1 %v7670_v50  ;;  %v7749_v48 = vld [vmem:[#allocation5 + $0xbe0] ss:$16 sps:$4 sm:$0xff]   ;;  %v7752_v50 = vld [vmem:[#allocation5 + $0xbe8] ss:$16 sps:$4 sm:$0xff]  }
 0x19f   :  { %5113 = vmatprep.mubr.bf16.mxu0 %v233_v51  ;;  %5605 = vmatprep.mubr.bf16.mxu1 %v233_v51  ;;  %v7758_v51 = vld [vmem:[#allocation5 + $0xc04] ss:$16 sps:$4 sm:$0xff]  }
 0x1a1   :  { %5084 = vmatpush1.bf16.msra.mxu0 %v7665_v52  ;;  %5576 = vmatpush1.bf16.msra.mxu1 %v7668_v53  ;;  %v7761_v52 = vld [vmem:[#allocation5 + $0xc0c] ss:$16 sps:$4 sm:$0xff]   ;;  %v162_v53 = vcombine.high %v8661_v25, %v8661_v25 }
 0x1a2   :  { %5085 = vmatprep.subr.bf16.mxu0 %v7673_v54  ;;  %5577 = vmatprep.subr.bf16.mxu1 %v7676_v55  ;;  %v232_v54 = vpack.c.bf16 %v8651_v40, %v8651_v40  ;;  %v7756_v55 = vld [vmem:[#allocation5 + $0xc00] ss:$16 sps:$4 sm:$0xff]  }
 0x1a3   :  { %v7768_v40 = vld [vmem:[#allocation5 + $0xc40] ss:$16 sps:$4 sm:$0xff]  }
 0x1a5   :  { %5086 = vmatpush1.bf16.msra.mxu0 %v7671_v32  ;;  %5578 = vmatpush1.bf16.msra.mxu1 %v7674_v56  ;;  %v7759_v32 = vld [vmem:[#allocation5 + $0xc08] ss:$16 sps:$4 sm:$0xff]   ;;  %v7764_v56 = vld [vmem:[#allocation5 + $0xc24] ss:$16 sps:$4 sm:$0xff]  }
 0x1a6   :  { %5087 = vmatprep.subr.bf16.mxu0 %v7679_v57  ;;  %5579 = vmatprep.subr.bf16.mxu1 %v7682_v58  ;;  %v7767_v57 = vld [vmem:[#allocation5 + $0xc2c] ss:$16 sps:$4 sm:$0xff]   ;;  %v235_v58 = vpack.c.bf16 %v162_v53, %v162_v53  ;;  %v7840_v53 = vld [vmem:[#allocation5 + $0xdc0] ss:$16 sps:$4 sm:$0xff]  }
 0x1a9   :  { %5088 = vmatpush1.bf16.msra.mxu0 %v7677_v59  ;;  %5580 = vmatpush1.bf16.msra.mxu1 %v7680_v60  ;;  %v7762_v59 = vld [vmem:[#allocation5 + $0xc20] ss:$16 sps:$4 sm:$0xff]   ;;  %v7765_v60 = vld [vmem:[#allocation5 + $0xc28] ss:$16 sps:$4 sm:$0xff]  }
 0x1aa   :  { %5089 = vmatprep.subr.bf16.mxu0 %v7685_v61  ;;  %5581 = vmatprep.subr.bf16.mxu1 %v7688_v62  ;;  %v7770_v61 = vld [vmem:[#allocation5 + $0xc44] ss:$16 sps:$4 sm:$0xff]   ;;  %v7773_v62 = vld [vmem:[#allocation5 + $0xc4c] ss:$16 sps:$4 sm:$0xff]  }
 0x1ad   :  { %5090 = vmatpush1.bf16.msra.mxu0 %v7683_v63  ;;  %5582 = vmatpush1.bf16.msra.mxu1 %v7686_v0  ;;  %v7771_v63 = vld [vmem:[#allocation5 + $0xc48] ss:$16 sps:$4 sm:$0xff]   ;;  %v7776_v0 = vld [vmem:[#allocation5 + $0xc64] ss:$16 sps:$4 sm:$0xff]  }
 0x1ae   :  { %5091 = vmatprep.subr.bf16.mxu0 %v7691_v1  ;;  %5583 = vmatprep.subr.bf16.mxu1 %v7694_v2  ;;  %v7779_v1 = vld [vmem:[#allocation5 + $0xc6c] ss:$16 sps:$4 sm:$0xff]   ;;  %v7774_v2 = vld [vmem:[#allocation5 + $0xc60] ss:$16 sps:$4 sm:$0xff]  }
 0x1b1   :  { %5092 = vmatpush1.bf16.msra.mxu0 %v7689_v3  ;;  %5584 = vmatpush1.bf16.msra.mxu1 %v7692_v4  ;;  %v7777_v3 = vld [vmem:[#allocation5 + $0xc68] ss:$16 sps:$4 sm:$0xff]   ;;  %v7782_v4 = vld [vmem:[#allocation5 + $0xc84] ss:$16 sps:$4 sm:$0xff]  }
 0x1b2   :  { %5093 = vmatprep.subr.bf16.mxu0 %v7697_v5  ;;  %5585 = vmatprep.subr.bf16.mxu1 %v7700_v6  ;;  %v7785_v5 = vld [vmem:[#allocation5 + $0xc8c] ss:$16 sps:$4 sm:$0xff]   ;;  %v7780_v6 = vld [vmem:[#allocation5 + $0xc80] ss:$16 sps:$4 sm:$0xff]  }
 0x1b5   :  { %5094 = vmatpush1.bf16.msra.mxu0 %v7695_v7  ;;  %5586 = vmatpush1.bf16.msra.mxu1 %v7698_v8  ;;  %v7783_v7 = vld [vmem:[#allocation5 + $0xc88] ss:$16 sps:$4 sm:$0xff]   ;;  %v7788_v8 = vld [vmem:[#allocation5 + $0xca4] ss:$16 sps:$4 sm:$0xff]  }
 0x1b6   :  { %5095 = vmatprep.subr.bf16.mxu0 %v7703_v10  ;;  %5587 = vmatprep.subr.bf16.mxu1 %v7706_v11  ;;  %v7791_v10 = vld [vmem:[#allocation5 + $0xcac] ss:$16 sps:$4 sm:$0xff]   ;;  %v7786_v11 = vld [vmem:[#allocation5 + $0xca0] ss:$16 sps:$4 sm:$0xff]  }
 0x1b9   :  { %5096 = vmatpush1.bf16.msra.mxu0 %v7701_v12  ;;  %5588 = vmatpush1.bf16.msra.mxu1 %v7704_v13  ;;  %v7789_v12 = vld [vmem:[#allocation5 + $0xca8] ss:$16 sps:$4 sm:$0xff]   ;;  %v7794_v13 = vld [vmem:[#allocation5 + $0xcc4] ss:$16 sps:$4 sm:$0xff]  }
 0x1ba   :  { %5097 = vmatprep.subr.bf16.mxu0 %v7709_v14  ;;  %5589 = vmatprep.subr.bf16.mxu1 %v7712_v15  ;;  %v7797_v14 = vld [vmem:[#allocation5 + $0xccc] ss:$16 sps:$4 sm:$0xff]   ;;  %v7792_v15 = vld [vmem:[#allocation5 + $0xcc0] ss:$16 sps:$4 sm:$0xff]  }
 0x1bd   :  { %5098 = vmatpush1.bf16.msra.mxu0 %v7707_v16  ;;  %5590 = vmatpush1.bf16.msra.mxu1 %v7710_v17  ;;  %v7795_v16 = vld [vmem:[#allocation5 + $0xcc8] ss:$16 sps:$4 sm:$0xff]   ;;  %v7800_v17 = vld [vmem:[#allocation5 + $0xce4] ss:$16 sps:$4 sm:$0xff]  }
 0x1be   :  { %5099 = vmatprep.subr.bf16.mxu0 %v7715_v18  ;;  %5591 = vmatprep.subr.bf16.mxu1 %v7718_v19  ;;  %v7803_v18 = vld [vmem:[#allocation5 + $0xcec] ss:$16 sps:$4 sm:$0xff]   ;;  %v7798_v19 = vld [vmem:[#allocation5 + $0xce0] ss:$16 sps:$4 sm:$0xff]  }
 0x1c1   :  { %5100 = vmatpush1.bf16.msra.mxu0 %v7713_v20  ;;  %5592 = vmatpush1.bf16.msra.mxu1 %v7716_v21  ;;  %v7801_v20 = vld [vmem:[#allocation5 + $0xce8] ss:$16 sps:$4 sm:$0xff]   ;;  %v7806_v21 = vld [vmem:[#allocation5 + $0xd04] ss:$16 sps:$4 sm:$0xff]  }
 0x1c2   :  { %5101 = vmatprep.subr.bf16.mxu0 %v7721_v22  ;;  %5593 = vmatprep.subr.bf16.mxu1 %v7724_v24  ;;  %v7809_v22 = vld [vmem:[#allocation5 + $0xd0c] ss:$16 sps:$4 sm:$0xff]   ;;  %v7804_v24 = vld [vmem:[#allocation5 + $0xd00] ss:$16 sps:$4 sm:$0xff]  }
 0x1c5   :  { %5102 = vmatpush1.bf16.msra.mxu0 %v7719_v27  ;;  %5594 = vmatpush1.bf16.msra.mxu1 %v7722_v9  ;;  %v7807_v27 = vld [vmem:[#allocation5 + $0xd08] ss:$16 sps:$4 sm:$0xff]   ;;  %v7812_v9 = vld [vmem:[#allocation5 + $0xd24] ss:$16 sps:$4 sm:$0xff]  }
 0x1c6   :  { %5103 = vmatprep.subr.bf16.mxu0 %v7727_v28  ;;  %5595 = vmatprep.subr.bf16.mxu1 %v7730_v23  ;;  %v7815_v28 = vld [vmem:[#allocation5 + $0xd2c] ss:$16 sps:$4 sm:$0xff]   ;;  %v7810_v23 = vld [vmem:[#allocation5 + $0xd20] ss:$16 sps:$4 sm:$0xff]  }
 0x1c9   :  { %5104 = vmatpush1.bf16.msra.mxu0 %v7725_v30  ;;  %5596 = vmatpush1.bf16.msra.mxu1 %v7728_v31  ;;  %v7813_v30 = vld [vmem:[#allocation5 + $0xd28] ss:$16 sps:$4 sm:$0xff]   ;;  %v7818_v31 = vld [vmem:[#allocation5 + $0xd44] ss:$16 sps:$4 sm:$0xff]  }
 0x1ca   :  { %5105 = vmatprep.subr.bf16.mxu0 %v7733_v33  ;;  %5597 = vmatprep.subr.bf16.mxu1 %v7736_v34  ;;  %v7821_v33 = vld [vmem:[#allocation5 + $0xd4c] ss:$16 sps:$4 sm:$0xff]   ;;  %v7816_v34 = vld [vmem:[#allocation5 + $0xd40] ss:$16 sps:$4 sm:$0xff]  }
 0x1cd   :  { %5106 = vmatpush1.bf16.msra.mxu0 %v7731_v35  ;;  %5598 = vmatpush1.bf16.msra.mxu1 %v7734_v36  ;;  %v7819_v35 = vld [vmem:[#allocation5 + $0xd48] ss:$16 sps:$4 sm:$0xff]   ;;  %v7824_v36 = vld [vmem:[#allocation5 + $0xd64] ss:$16 sps:$4 sm:$0xff]  }
 0x1ce   :  { %5107 = vmatprep.subr.bf16.mxu0 %v7739_v37  ;;  %5599 = vmatprep.subr.bf16.mxu1 %v7742_v38  ;;  %v7827_v37 = vld [vmem:[#allocation5 + $0xd6c] ss:$16 sps:$4 sm:$0xff]   ;;  %v7822_v38 = vld [vmem:[#allocation5 + $0xd60] ss:$16 sps:$4 sm:$0xff]  }
 0x1d1   :  { %5108 = vmatpush1.bf16.msra.mxu0 %v7737_v39  ;;  %5600 = vmatpush1.bf16.msra.mxu1 %v7740_v26  ;;  %v7825_v39 = vld [vmem:[#allocation5 + $0xd68] ss:$16 sps:$4 sm:$0xff]   ;;  %v7830_v26 = vld [vmem:[#allocation5 + $0xd84] ss:$16 sps:$4 sm:$0xff]  }
 0x1d2   :  { %5109 = vmatprep.subr.bf16.mxu0 %v7745_v41  ;;  %5601 = vmatprep.subr.bf16.mxu1 %v7748_v42  ;;  %v7833_v41 = vld [vmem:[#allocation5 + $0xd8c] ss:$16 sps:$4 sm:$0xff]   ;;  %v7828_v42 = vld [vmem:[#allocation5 + $0xd80] ss:$16 sps:$4 sm:$0xff]  }
 0x1d5   :  { %5110 = vmatpush1.bf16.msra.mxu0 %v7743_v45  ;;  %5602 = vmatpush1.bf16.msra.mxu1 %v7746_v29  ;;  %v7831_v45 = vld [vmem:[#allocation5 + $0xd88] ss:$16 sps:$4 sm:$0xff]   ;;  %v7836_v29 = vld [vmem:[#allocation5 + $0xda4] ss:$16 sps:$4 sm:$0xff]  }
 0x1d6   :  { %5111 = vmatprep.subr.bf16.mxu0 %v7751_v46  ;;  %5603 = vmatprep.subr.bf16.mxu1 %v7754_v47  ;;  %v7839_v46 = vld [vmem:[#allocation5 + $0xdac] ss:$16 sps:$4 sm:$0xff]   ;;  %v7834_v47 = vld [vmem:[#allocation5 + $0xda0] ss:$16 sps:$4 sm:$0xff]  }
 0x1d9   :  { %5112 = vmatpush1.bf16.msra.mxu0 %v7749_v48  ;;  %5604 = vmatpush1.bf16.msra.mxu1 %v7752_v50  ;;  %v7837_v48 = vld [vmem:[#allocation5 + $0xda8] ss:$16 sps:$4 sm:$0xff]   ;;  %v7842_v50 = vld [vmem:[#allocation5 + $0xdc4] ss:$16 sps:$4 sm:$0xff]  }
 0x1da   :  { %5122 = vmatprep.subr.bf16.mxu0 %v7758_v51  ;;  %5614 = vmatprep.subr.bf16.mxu1 %v7761_v52  ;;  %v7845_v51 = vld [vmem:[#allocation5 + $0xdcc] ss:$16 sps:$4 sm:$0xff]   ;;  %v147_v52 = vcombine.high %v8657_v44, %v8657_v44 }
 0x1dc   :  { %5114 = vmatmul.mubr.bf16.vlgmr.msra.gmra.mrb[0].mxu0 %v232_v54  ;;  %5606 = vmatmul.mubr.bf16.vlgmr.msra.gmra.mrb[0].mxu1 %v232_v54  ;;  %v7843_v54 = vld [vmem:[#allocation5 + $0xdc8] ss:$16 sps:$4 sm:$0xff]  }
 0x1dd   :  { %5123 = vmatpush1.bf16.msra.mxu0 %v7756_v55  ;;  %5615 = vmatpush1.bf16.msra.mxu1 %v7759_v32  ;;  %v7848_v55 = vld [vmem:[#allocation5 + $0xde4] ss:$16 sps:$4 sm:$0xff]   ;;  %v7851_v32 = vld [vmem:[#allocation5 + $0xdec] ss:$16 sps:$4 sm:$0xff]  }
 0x1de   :  { %5124 = vmatprep.subr.bf16.mxu0 %v7764_v56  ;;  %5616 = vmatprep.subr.bf16.mxu1 %v7767_v57  ;;  %v8670_v56 = vrot.slane %v147_v52, %v8611_v49  ;;  %v7846_v57 = vld [vmem:[#allocation5 + $0xde0] ss:$16 sps:$4 sm:$0xff]   ;;  %v7927_v52 = vld [vmem:[#allocation5 + $0xf88] ss:$16 sps:$4 sm:$0xff]  }
 0x1df   :  { %5154 = vmatprep.mubr.bf16.mxu0 %v235_v58  ;;  %5646 = vmatprep.mubr.bf16.mxu1 %v235_v58  ;;  %v7849_v58 = vld [vmem:[#allocation5 + $0xde8] ss:$16 sps:$4 sm:$0xff]  }
 0x1e0   :  { %v163_v44 = vcombine.high %v8670_v56, %v8670_v56 }
 0x1e1   :  { %5125 = vmatpush1.bf16.msra.mxu0 %v7762_v59  ;;  %5617 = vmatpush1.bf16.msra.mxu1 %v7765_v60  ;;  %v7854_v59 = vld [vmem:[#allocation5 + $0xe04] ss:$16 sps:$4 sm:$0xff]   ;;  %v7857_v60 = vld [vmem:[#allocation5 + $0xe0c] ss:$16 sps:$4 sm:$0xff]  }
 0x1e2   :  { %5126 = vmatprep.subr.bf16.mxu0 %v7770_v61  ;;  %5618 = vmatprep.subr.bf16.mxu1 %v7773_v62  ;;  %v234_v61 = vpack.c.bf16 %v8661_v25, %v8661_v25  ;;  %v7852_v62 = vld [vmem:[#allocation5 + $0xe00] ss:$16 sps:$4 sm:$0xff]  }
 0x1e3   :  { %v7864_v25 = vld [vmem:[#allocation5 + $0xe40] ss:$16 sps:$4 sm:$0xff]  }
 0x1e5   :  { %5127 = vmatpush1.bf16.msra.mxu0 %v7768_v40  ;;  %5619 = vmatpush1.bf16.msra.mxu1 %v7771_v63  ;;  %v7855_v40 = vld [vmem:[#allocation5 + $0xe08] ss:$16 sps:$4 sm:$0xff]   ;;  %v7860_v63 = vld [vmem:[#allocation5 + $0xe24] ss:$16 sps:$4 sm:$0xff]  }
 0x1e6   :  { %5128 = vmatprep.subr.bf16.mxu0 %v7776_v0  ;;  %5620 = vmatprep.subr.bf16.mxu1 %v7779_v1  ;;  %v7863_v0 = vld [vmem:[#allocation5 + $0xe2c] ss:$16 sps:$4 sm:$0xff]   ;;  %v237_v1 = vpack.c.bf16 %v163_v44, %v163_v44  ;;  %v7939_v44 = vld [vmem:[#allocation5 + $0xfc8] ss:$16 sps:$4 sm:$0xff]  }
 0x1e9   :  { %5129 = vmatpush1.bf16.msra.mxu0 %v7774_v2  ;;  %5621 = vmatpush1.bf16.msra.mxu1 %v7777_v3  ;;  %v7858_v2 = vld [vmem:[#allocation5 + $0xe20] ss:$16 sps:$4 sm:$0xff]   ;;  %v7861_v3 = vld [vmem:[#allocation5 + $0xe28] ss:$16 sps:$4 sm:$0xff]  }
 0x1ea   :  { %5130 = vmatprep.subr.bf16.mxu0 %v7782_v4  ;;  %5622 = vmatprep.subr.bf16.mxu1 %v7785_v5  ;;  %v7866_v4 = vld [vmem:[#allocation5 + $0xe44] ss:$16 sps:$4 sm:$0xff]   ;;  %v7869_v5 = vld [vmem:[#allocation5 + $0xe4c] ss:$16 sps:$4 sm:$0xff]  }
 0x1ed   :  { %5131 = vmatpush1.bf16.msra.mxu0 %v7780_v6  ;;  %5623 = vmatpush1.bf16.msra.mxu1 %v7783_v7  ;;  %v7867_v6 = vld [vmem:[#allocation5 + $0xe48] ss:$16 sps:$4 sm:$0xff]   ;;  %v7872_v7 = vld [vmem:[#allocation5 + $0xe64] ss:$16 sps:$4 sm:$0xff]  }
 0x1ee   :  { %5132 = vmatprep.subr.bf16.mxu0 %v7788_v8  ;;  %5624 = vmatprep.subr.bf16.mxu1 %v7791_v10  ;;  %v7875_v8 = vld [vmem:[#allocation5 + $0xe6c] ss:$16 sps:$4 sm:$0xff]   ;;  %v7870_v10 = vld [vmem:[#allocation5 + $0xe60] ss:$16 sps:$4 sm:$0xff]  }
 0x1f1   :  { %5133 = vmatpush1.bf16.msra.mxu0 %v7786_v11  ;;  %5625 = vmatpush1.bf16.msra.mxu1 %v7789_v12  ;;  %v7873_v11 = vld [vmem:[#allocation5 + $0xe68] ss:$16 sps:$4 sm:$0xff]   ;;  %v7878_v12 = vld [vmem:[#allocation5 + $0xe84] ss:$16 sps:$4 sm:$0xff]  }
 0x1f2   :  { %5134 = vmatprep.subr.bf16.mxu0 %v7794_v13  ;;  %5626 = vmatprep.subr.bf16.mxu1 %v7797_v14  ;;  %v7881_v13 = vld [vmem:[#allocation5 + $0xe8c] ss:$16 sps:$4 sm:$0xff]   ;;  %v7876_v14 = vld [vmem:[#allocation5 + $0xe80] ss:$16 sps:$4 sm:$0xff]  }
 0x1f5   :  { %5135 = vmatpush1.bf16.msra.mxu0 %v7792_v15  ;;  %5627 = vmatpush1.bf16.msra.mxu1 %v7795_v16  ;;  %v7879_v15 = vld [vmem:[#allocation5 + $0xe88] ss:$16 sps:$4 sm:$0xff]   ;;  %v7884_v16 = vld [vmem:[#allocation5 + $0xea4] ss:$16 sps:$4 sm:$0xff]  }
 0x1f6   :  { %5136 = vmatprep.subr.bf16.mxu0 %v7800_v17  ;;  %5628 = vmatprep.subr.bf16.mxu1 %v7803_v18  ;;  %v7887_v17 = vld [vmem:[#allocation5 + $0xeac] ss:$16 sps:$4 sm:$0xff]   ;;  %v7882_v18 = vld [vmem:[#allocation5 + $0xea0] ss:$16 sps:$4 sm:$0xff]  }
 0x1f9   :  { %5137 = vmatpush1.bf16.msra.mxu0 %v7798_v19  ;;  %5629 = vmatpush1.bf16.msra.mxu1 %v7801_v20  ;;  %v7885_v19 = vld [vmem:[#allocation5 + $0xea8] ss:$16 sps:$4 sm:$0xff]   ;;  %v7890_v20 = vld [vmem:[#allocation5 + $0xec4] ss:$16 sps:$4 sm:$0xff]  }
 0x1fa   :  { %5138 = vmatprep.subr.bf16.mxu0 %v7806_v21  ;;  %5630 = vmatprep.subr.bf16.mxu1 %v7809_v22  ;;  %v7893_v21 = vld [vmem:[#allocation5 + $0xecc] ss:$16 sps:$4 sm:$0xff]   ;;  %v7888_v22 = vld [vmem:[#allocation5 + $0xec0] ss:$16 sps:$4 sm:$0xff]  }
 0x1fd   :  { %5139 = vmatpush1.bf16.msra.mxu0 %v7804_v24  ;;  %5631 = vmatpush1.bf16.msra.mxu1 %v7807_v27  ;;  %v7891_v24 = vld [vmem:[#allocation5 + $0xec8] ss:$16 sps:$4 sm:$0xff]   ;;  %v7896_v27 = vld [vmem:[#allocation5 + $0xee4] ss:$16 sps:$4 sm:$0xff]  }
 0x1fe   :  { %5140 = vmatprep.subr.bf16.mxu0 %v7812_v9  ;;  %5632 = vmatprep.subr.bf16.mxu1 %v7815_v28  ;;  %v7899_v9 = vld [vmem:[#allocation5 + $0xeec] ss:$16 sps:$4 sm:$0xff]   ;;  %v7894_v28 = vld [vmem:[#allocation5 + $0xee0] ss:$16 sps:$4 sm:$0xff]  }
 0x201   :  { %5141 = vmatpush1.bf16.msra.mxu0 %v7810_v23  ;;  %5633 = vmatpush1.bf16.msra.mxu1 %v7813_v30  ;;  %v7897_v23 = vld [vmem:[#allocation5 + $0xee8] ss:$16 sps:$4 sm:$0xff]   ;;  %v7902_v30 = vld [vmem:[#allocation5 + $0xf04] ss:$16 sps:$4 sm:$0xff]  }
 0x202   :  { %5142 = vmatprep.subr.bf16.mxu0 %v7818_v31  ;;  %5634 = vmatprep.subr.bf16.mxu1 %v7821_v33  ;;  %v7905_v31 = vld [vmem:[#allocation5 + $0xf0c] ss:$16 sps:$4 sm:$0xff]   ;;  %v7900_v33 = vld [vmem:[#allocation5 + $0xf00] ss:$16 sps:$4 sm:$0xff]  }
 0x205   :  { %5143 = vmatpush1.bf16.msra.mxu0 %v7816_v34  ;;  %5635 = vmatpush1.bf16.msra.mxu1 %v7819_v35  ;;  %v7903_v34 = vld [vmem:[#allocation5 + $0xf08] ss:$16 sps:$4 sm:$0xff]   ;;  %v7908_v35 = vld [vmem:[#allocation5 + $0xf24] ss:$16 sps:$4 sm:$0xff]  }
 0x206   :  { %5144 = vmatprep.subr.bf16.mxu0 %v7824_v36  ;;  %5636 = vmatprep.subr.bf16.mxu1 %v7827_v37  ;;  %v7911_v36 = vld [vmem:[#allocation5 + $0xf2c] ss:$16 sps:$4 sm:$0xff]   ;;  %v7906_v37 = vld [vmem:[#allocation5 + $0xf20] ss:$16 sps:$4 sm:$0xff]  }
 0x209   :  { %5145 = vmatpush1.bf16.msra.mxu0 %v7822_v38  ;;  %5637 = vmatpush1.bf16.msra.mxu1 %v7825_v39  ;;  %v7909_v38 = vld [vmem:[#allocation5 + $0xf28] ss:$16 sps:$4 sm:$0xff]   ;;  %v7914_v39 = vld [vmem:[#allocation5 + $0xf44] ss:$16 sps:$4 sm:$0xff]  }
 0x20a   :  { %5146 = vmatprep.subr.bf16.mxu0 %v7830_v26  ;;  %5638 = vmatprep.subr.bf16.mxu1 %v7833_v41  ;;  %v7917_v26 = vld [vmem:[#allocation5 + $0xf4c] ss:$16 sps:$4 sm:$0xff]   ;;  %v7912_v41 = vld [vmem:[#allocation5 + $0xf40] ss:$16 sps:$4 sm:$0xff]  }
 0x20d   :  { %5147 = vmatpush1.bf16.msra.mxu0 %v7828_v42  ;;  %5639 = vmatpush1.bf16.msra.mxu1 %v7831_v45  ;;  %v7915_v42 = vld [vmem:[#allocation5 + $0xf48] ss:$16 sps:$4 sm:$0xff]   ;;  %v7920_v45 = vld [vmem:[#allocation5 + $0xf64] ss:$16 sps:$4 sm:$0xff]  }
 0x20e   :  { %5148 = vmatprep.subr.bf16.mxu0 %v7836_v29  ;;  %5640 = vmatprep.subr.bf16.mxu1 %v7839_v46  ;;  %v7923_v29 = vld [vmem:[#allocation5 + $0xf6c] ss:$16 sps:$4 sm:$0xff]   ;;  %v7918_v46 = vld [vmem:[#allocation5 + $0xf60] ss:$16 sps:$4 sm:$0xff]  }
 0x211   :  { %5149 = vmatpush1.bf16.msra.mxu0 %v7834_v47  ;;  %5641 = vmatpush1.bf16.msra.mxu1 %v7837_v48  ;;  %v7921_v47 = vld [vmem:[#allocation5 + $0xf68] ss:$16 sps:$4 sm:$0xff]   ;;  %v7926_v48 = vld [vmem:[#allocation5 + $0xf84] ss:$16 sps:$4 sm:$0xff]  }
 0x212   :  { %5150 = vmatprep.subr.bf16.mxu0 %v7842_v50  ;;  %5642 = vmatprep.subr.bf16.mxu1 %v7845_v51  ;;  %v7929_v50 = vld [vmem:[#allocation5 + $0xf8c] ss:$16 sps:$4 sm:$0xff]   ;;  %v7924_v51 = vld [vmem:[#allocation5 + $0xf80] ss:$16 sps:$4 sm:$0xff]  }
 0x215   :  { %5151 = vmatpush1.bf16.msra.mxu0 %v7840_v53  ;;  %5643 = vmatpush1.bf16.msra.mxu1 %v7843_v54  ;;  %v7932_v53 = vld [vmem:[#allocation5 + $0xfa4] ss:$16 sps:$4 sm:$0xff]   ;;  %v7935_v54 = vld [vmem:[#allocation5 + $0xfac] ss:$16 sps:$4 sm:$0xff]  }
 0x216   :  { %5152 = vmatprep.subr.bf16.mxu0 %v7848_v55  ;;  %5644 = vmatprep.subr.bf16.mxu1 %v7851_v32  ;;  %v7930_v55 = vld [vmem:[#allocation5 + $0xfa0] ss:$16 sps:$4 sm:$0xff]   ;;  %v7933_v32 = vld [vmem:[#allocation5 + $0xfa8] ss:$16 sps:$4 sm:$0xff]  }
 0x219   :  { %5153 = vmatpush1.bf16.msra.mxu0 %v7846_v57  ;;  %5645 = vmatpush1.bf16.msra.mxu1 %v7849_v58  ;;  %v7938_v57 = vld [vmem:[#allocation5 + $0xfc4] ss:$16 sps:$4 sm:$0xff]   ;;  %v7941_v58 = vld [vmem:[#allocation5 + $0xfcc] ss:$16 sps:$4 sm:$0xff]  }
 0x21a   :  { %5163 = vmatprep.subr.bf16.mxu0 %v7854_v59  ;;  %5655 = vmatprep.subr.bf16.mxu1 %v7857_v60  ;;  %v8676_v59 = vld [vmem:[#allocation2 + $0x20] sm:$0xff] }
 0x21b   :  { %v7936_v60 = vld [vmem:[#allocation5 + $0xfc0] ss:$16 sps:$4 sm:$0xff]  }
 0x21c   :  { %5155 = vmatmul.mubr.bf16.vlgmr.msra.gmra.mrb[0].mxu0 %v234_v61  ;;  %5647 = vmatmul.mubr.bf16.vlgmr.msra.gmra.mrb[0].mxu1 %v234_v61  ;;  %v7944_v61 = vld [vmem:[#allocation5 + $0xfe4] ss:$16 sps:$4 sm:$0xff]  }
 0x21d   :  { %5164 = vmatpush1.bf16.msra.mxu0 %v7852_v62  ;;  %5656 = vmatpush1.bf16.msra.mxu1 %v7855_v40  ;;  %v7947_v62 = vld [vmem:[#allocation5 + $0xfec] ss:$16 sps:$4 sm:$0xff]   ;;  %v8680_v40 = vrot.slane %v8676_v59, %v8611_v49 }
 0x21e   :  { %5165 = vmatprep.subr.bf16.mxu0 %v7860_v63  ;;  %5657 = vmatprep.subr.bf16.mxu1 %v7863_v0  ;;  %v7942_v63 = vld [vmem:[#allocation5 + $0xfe0] ss:$16 sps:$4 sm:$0xff]   ;;  %v7945_v0 = vld [vmem:[#allocation5 + $0xfe8] ss:$16 sps:$4 sm:$0xff]  }
 0x21f   :  { %5195 = vmatprep.mubr.bf16.mxu0 %v237_v1  ;;  %5687 = vmatprep.mubr.bf16.mxu1 %v237_v1  ;;  %v7951_v1 = vld [vmem:[#allocation5 + $0x1004] ss:$16 sps:$4 sm:$0xff]  }
 0x221   :  { %5166 = vmatpush1.bf16.msra.mxu0 %v7858_v2  ;;  %5658 = vmatpush1.bf16.msra.mxu1 %v7861_v3  ;;  %v7954_v2 = vld [vmem:[#allocation5 + $0x100c] ss:$16 sps:$4 sm:$0xff]   ;;  %v179_v3 = vcombine.high %v8680_v40, %v8680_v40 }
 0x222   :  { %5167 = vmatprep.subr.bf16.mxu0 %v7866_v4  ;;  %5659 = vmatprep.subr.bf16.mxu1 %v7869_v5  ;;  %v236_v4 = vpack.c.bf16 %v8670_v56, %v8670_v56  ;;  %v7949_v5 = vld [vmem:[#allocation5 + $0x1000] ss:$16 sps:$4 sm:$0xff]  }
 0x223   :  { %v7961_v56 = vld [vmem:[#allocation5 + $0x1040] ss:$16 sps:$4 sm:$0xff]  }
 0x225   :  { %5168 = vmatpush1.bf16.msra.mxu0 %v7864_v25  ;;  %5660 = vmatpush1.bf16.msra.mxu1 %v7867_v6  ;;  %v7952_v25 = vld [vmem:[#allocation5 + $0x1008] ss:$16 sps:$4 sm:$0xff]   ;;  %v7957_v6 = vld [vmem:[#allocation5 + $0x1024] ss:$16 sps:$4 sm:$0xff]  }
 0x226   :  { %5169 = vmatprep.subr.bf16.mxu0 %v7872_v7  ;;  %5661 = vmatprep.subr.bf16.mxu1 %v7875_v8  ;;  %v7960_v7 = vld [vmem:[#allocation5 + $0x102c] ss:$16 sps:$4 sm:$0xff]   ;;  %v239_v8 = vpack.c.bf16 %v179_v3, %v179_v3  ;;  %v8033_v3 = vld [vmem:[#allocation5 + $0x11c0] ss:$16 sps:$4 sm:$0xff]  }
 0x229   :  { %5170 = vmatpush1.bf16.msra.mxu0 %v7870_v10  ;;  %5662 = vmatpush1.bf16.msra.mxu1 %v7873_v11  ;;  %v7955_v10 = vld [vmem:[#allocation5 + $0x1020] ss:$16 sps:$4 sm:$0xff]   ;;  %v7958_v11 = vld [vmem:[#allocation5 + $0x1028] ss:$16 sps:$4 sm:$0xff]  }
 0x22a   :  { %5171 = vmatprep.subr.bf16.mxu0 %v7878_v12  ;;  %5663 = vmatprep.subr.bf16.mxu1 %v7881_v13  ;;  %v7963_v12 = vld [vmem:[#allocation5 + $0x1044] ss:$16 sps:$4 sm:$0xff]   ;;  %v7966_v13 = vld [vmem:[#allocation5 + $0x104c] ss:$16 sps:$4 sm:$0xff]  }
 0x22d   :  { %5172 = vmatpush1.bf16.msra.mxu0 %v7876_v14  ;;  %5664 = vmatpush1.bf16.msra.mxu1 %v7879_v15  ;;  %v7964_v14 = vld [vmem:[#allocation5 + $0x1048] ss:$16 sps:$4 sm:$0xff]   ;;  %v7969_v15 = vld [vmem:[#allocation5 + $0x1064] ss:$16 sps:$4 sm:$0xff]  }
 0x22e   :  { %5173 = vmatprep.subr.bf16.mxu0 %v7884_v16  ;;  %5665 = vmatprep.subr.bf16.mxu1 %v7887_v17  ;;  %v7972_v16 = vld [vmem:[#allocation5 + $0x106c] ss:$16 sps:$4 sm:$0xff]   ;;  %v7967_v17 = vld [vmem:[#allocation5 + $0x1060] ss:$16 sps:$4 sm:$0xff]  }
 0x231   :  { %5174 = vmatpush1.bf16.msra.mxu0 %v7882_v18  ;;  %5666 = vmatpush1.bf16.msra.mxu1 %v7885_v19  ;;  %v7970_v18 = vld [vmem:[#allocation5 + $0x1068] ss:$16 sps:$4 sm:$0xff]   ;;  %v7975_v19 = vld [vmem:[#allocation5 + $0x1084] ss:$16 sps:$4 sm:$0xff]  }
 0x232   :  { %5175 = vmatprep.subr.bf16.mxu0 %v7890_v20  ;;  %5667 = vmatprep.subr.bf16.mxu1 %v7893_v21  ;;  %v7978_v20 = vld [vmem:[#allocation5 + $0x108c] ss:$16 sps:$4 sm:$0xff]   ;;  %v7973_v21 = vld [vmem:[#allocation5 + $0x1080] ss:$16 sps:$4 sm:$0xff]  }
 0x235   :  { %5176 = vmatpush1.bf16.msra.mxu0 %v7888_v22  ;;  %5668 = vmatpush1.bf16.msra.mxu1 %v7891_v24  ;;  %v7976_v22 = vld [vmem:[#allocation5 + $0x1088] ss:$16 sps:$4 sm:$0xff]   ;;  %v7981_v24 = vld [vmem:[#allocation5 + $0x10a4] ss:$16 sps:$4 sm:$0xff]  }
 0x236   :  { %5177 = vmatprep.subr.bf16.mxu0 %v7896_v27  ;;  %5669 = vmatprep.subr.bf16.mxu1 %v7899_v9  ;;  %v7984_v27 = vld [vmem:[#allocation5 + $0x10ac] ss:$16 sps:$4 sm:$0xff]   ;;  %v7979_v9 = vld [vmem:[#allocation5 + $0x10a0] ss:$16 sps:$4 sm:$0xff]  }
 0x239   :  { %5178 = vmatpush1.bf16.msra.mxu0 %v7894_v28  ;;  %5670 = vmatpush1.bf16.msra.mxu1 %v7897_v23  ;;  %v7982_v28 = vld [vmem:[#allocation5 + $0x10a8] ss:$16 sps:$4 sm:$0xff]   ;;  %v7987_v23 = vld [vmem:[#allocation5 + $0x10c4] ss:$16 sps:$4 sm:$0xff]  }
 0x23a   :  { %5179 = vmatprep.subr.bf16.mxu0 %v7902_v30  ;;  %5671 = vmatprep.subr.bf16.mxu1 %v7905_v31  ;;  %v7990_v30 = vld [vmem:[#allocation5 + $0x10cc] ss:$16 sps:$4 sm:$0xff]   ;;  %v7985_v31 = vld [vmem:[#allocation5 + $0x10c0] ss:$16 sps:$4 sm:$0xff]  }
 0x23d   :  { %5180 = vmatpush1.bf16.msra.mxu0 %v7900_v33  ;;  %5672 = vmatpush1.bf16.msra.mxu1 %v7903_v34  ;;  %v7988_v33 = vld [vmem:[#allocation5 + $0x10c8] ss:$16 sps:$4 sm:$0xff]   ;;  %v7993_v34 = vld [vmem:[#allocation5 + $0x10e4] ss:$16 sps:$4 sm:$0xff]  }
 0x23e   :  { %5181 = vmatprep.subr.bf16.mxu0 %v7908_v35  ;;  %5673 = vmatprep.subr.bf16.mxu1 %v7911_v36  ;;  %v7996_v35 = vld [vmem:[#allocation5 + $0x10ec] ss:$16 sps:$4 sm:$0xff]   ;;  %v7991_v36 = vld [vmem:[#allocation5 + $0x10e0] ss:$16 sps:$4 sm:$0xff]  }
 0x241   :  { %5182 = vmatpush1.bf16.msra.mxu0 %v7906_v37  ;;  %5674 = vmatpush1.bf16.msra.mxu1 %v7909_v38  ;;  %v7994_v37 = vld [vmem:[#allocation5 + $0x10e8] ss:$16 sps:$4 sm:$0xff]   ;;  %v7999_v38 = vld [vmem:[#allocation5 + $0x1104] ss:$16 sps:$4 sm:$0xff]  }
 0x242   :  { %5183 = vmatprep.subr.bf16.mxu0 %v7914_v39  ;;  %5675 = vmatprep.subr.bf16.mxu1 %v7917_v26  ;;  %v8002_v39 = vld [vmem:[#allocation5 + $0x110c] ss:$16 sps:$4 sm:$0xff]   ;;  %v7997_v26 = vld [vmem:[#allocation5 + $0x1100] ss:$16 sps:$4 sm:$0xff]  }
 0x245   :  { %5184 = vmatpush1.bf16.msra.mxu0 %v7912_v41  ;;  %5676 = vmatpush1.bf16.msra.mxu1 %v7915_v42  ;;  %v8000_v41 = vld [vmem:[#allocation5 + $0x1108] ss:$16 sps:$4 sm:$0xff]   ;;  %v8005_v42 = vld [vmem:[#allocation5 + $0x1124] ss:$16 sps:$4 sm:$0xff]  }
 0x246   :  { %5185 = vmatprep.subr.bf16.mxu0 %v7920_v45  ;;  %5677 = vmatprep.subr.bf16.mxu1 %v7923_v29  ;;  %v8008_v45 = vld [vmem:[#allocation5 + $0x112c] ss:$16 sps:$4 sm:$0xff]   ;;  %v8003_v29 = vld [vmem:[#allocation5 + $0x1120] ss:$16 sps:$4 sm:$0xff]  }
 0x249   :  { %5186 = vmatpush1.bf16.msra.mxu0 %v7918_v46  ;;  %5678 = vmatpush1.bf16.msra.mxu1 %v7921_v47  ;;  %v8006_v46 = vld [vmem:[#allocation5 + $0x1128] ss:$16 sps:$4 sm:$0xff]   ;;  %v8011_v47 = vld [vmem:[#allocation5 + $0x1144] ss:$16 sps:$4 sm:$0xff]  }
 0x24a   :  { %5187 = vmatprep.subr.bf16.mxu0 %v7926_v48  ;;  %5679 = vmatprep.subr.bf16.mxu1 %v7929_v50  ;;  %v8014_v48 = vld [vmem:[#allocation5 + $0x114c] ss:$16 sps:$4 sm:$0xff]   ;;  %v8009_v50 = vld [vmem:[#allocation5 + $0x1140] ss:$16 sps:$4 sm:$0xff]  }
 0x24d   :  { %5188 = vmatpush1.bf16.msra.mxu0 %v7924_v51  ;;  %5680 = vmatpush1.bf16.msra.mxu1 %v7927_v52  ;;  %v8012_v51 = vld [vmem:[#allocation5 + $0x1148] ss:$16 sps:$4 sm:$0xff]   ;;  %v8017_v52 = vld [vmem:[#allocation5 + $0x1164] ss:$16 sps:$4 sm:$0xff]  }
 0x24e   :  { %5189 = vmatprep.subr.bf16.mxu0 %v7932_v53  ;;  %5681 = vmatprep.subr.bf16.mxu1 %v7935_v54  ;;  %v8020_v53 = vld [vmem:[#allocation5 + $0x116c] ss:$16 sps:$4 sm:$0xff]   ;;  %v8015_v54 = vld [vmem:[#allocation5 + $0x1160] ss:$16 sps:$4 sm:$0xff]  }
 0x251   :  { %5190 = vmatpush1.bf16.msra.mxu0 %v7930_v55  ;;  %5682 = vmatpush1.bf16.msra.mxu1 %v7933_v32  ;;  %v8018_v55 = vld [vmem:[#allocation5 + $0x1168] ss:$16 sps:$4 sm:$0xff]   ;;  %v8023_v32 = vld [vmem:[#allocation5 + $0x1184] ss:$16 sps:$4 sm:$0xff]  }
 0x252   :  { %5191 = vmatprep.subr.bf16.mxu0 %v7938_v57  ;;  %5683 = vmatprep.subr.bf16.mxu1 %v7941_v58  ;;  %v8026_v57 = vld [vmem:[#allocation5 + $0x118c] ss:$16 sps:$4 sm:$0xff]   ;;  %v8021_v58 = vld [vmem:[#allocation5 + $0x1180] ss:$16 sps:$4 sm:$0xff]  }
 0x255   :  { %5192 = vmatpush1.bf16.msra.mxu0 %v7936_v60  ;;  %5684 = vmatpush1.bf16.msra.mxu1 %v7939_v44  ;;  %v8024_v60 = vld [vmem:[#allocation5 + $0x1188] ss:$16 sps:$4 sm:$0xff]   ;;  %v8029_v44 = vld [vmem:[#allocation5 + $0x11a4] ss:$16 sps:$4 sm:$0xff]  }
 0x256   :  { %5193 = vmatprep.subr.bf16.mxu0 %v7944_v61  ;;  %5685 = vmatprep.subr.bf16.mxu1 %v7947_v62  ;;  %v8032_v61 = vld [vmem:[#allocation5 + $0x11ac] ss:$16 sps:$4 sm:$0xff]   ;;  %v8027_v62 = vld [vmem:[#allocation5 + $0x11a0] ss:$16 sps:$4 sm:$0xff]  }
 0x259   :  { %5194 = vmatpush1.bf16.msra.mxu0 %v7942_v63  ;;  %5686 = vmatpush1.bf16.msra.mxu1 %v7945_v0  ;;  %v8030_v63 = vld [vmem:[#allocation5 + $0x11a8] ss:$16 sps:$4 sm:$0xff]   ;;  %v8035_v0 = vld [vmem:[#allocation5 + $0x11c4] ss:$16 sps:$4 sm:$0xff]  }
 0x25a   :  { %5204 = vmatprep.subr.bf16.mxu0 %v7951_v1  ;;  %5696 = vmatprep.subr.bf16.mxu1 %v7954_v2  ;;  %v8038_v1 = vld [vmem:[#allocation5 + $0x11cc] ss:$16 sps:$4 sm:$0xff]   ;;  %v164_v2 = vcombine.high %v8676_v59, %v8676_v59 }
 0x25c   :  { %5196 = vmatmul.mubr.bf16.vlgmr.msra.gmra.mrb[0].mxu0 %v236_v4  ;;  %5688 = vmatmul.mubr.bf16.vlgmr.msra.gmra.mrb[0].mxu1 %v236_v4  ;;  %v8036_v4 = vld [vmem:[#allocation5 + $0x11c8] ss:$16 sps:$4 sm:$0xff]  }
 0x25d   :  { %5205 = vmatpush1.bf16.msra.mxu0 %v7949_v5  ;;  %5697 = vmatpush1.bf16.msra.mxu1 %v7952_v25  ;;  %v8041_v5 = vld [vmem:[#allocation5 + $0x11e4] ss:$16 sps:$4 sm:$0xff]   ;;  %v8044_v25 = vld [vmem:[#allocation5 + $0x11ec] ss:$16 sps:$4 sm:$0xff]  }
 0x25e   :  { %5206 = vmatprep.subr.bf16.mxu0 %v7957_v6  ;;  %5698 = vmatprep.subr.bf16.mxu1 %v7960_v7  ;;  %v8689_v6 = vrot.slane %v164_v2, %v8611_v49  ;;  %v8039_v7 = vld [vmem:[#allocation5 + $0x11e0] ss:$16 sps:$4 sm:$0xff]   ;;  %v8120_v2 = vld [vmem:[#allocation5 + $0x1388] ss:$16 sps:$4 sm:$0xff]  }
 0x25f   :  { %5236 = vmatprep.mubr.bf16.mxu0 %v239_v8  ;;  %5728 = vmatprep.mubr.bf16.mxu1 %v239_v8  ;;  %v8042_v8 = vld [vmem:[#allocation5 + $0x11e8] ss:$16 sps:$4 sm:$0xff]  }
 0x260   :  { %v180_v59 = vcombine.high %v8689_v6, %v8689_v6 }
 0x261   :  { %5207 = vmatpush1.bf16.msra.mxu0 %v7955_v10  ;;  %5699 = vmatpush1.bf16.msra.mxu1 %v7958_v11  ;;  %v8047_v10 = vld [vmem:[#allocation5 + $0x1204] ss:$16 sps:$4 sm:$0xff]   ;;  %v8050_v11 = vld [vmem:[#allocation5 + $0x120c] ss:$16 sps:$4 sm:$0xff]  }
 0x262   :  { %5208 = vmatprep.subr.bf16.mxu0 %v7963_v12  ;;  %5700 = vmatprep.subr.bf16.mxu1 %v7966_v13  ;;  %v238_v12 = vpack.c.bf16 %v8680_v40, %v8680_v40  ;;  %v8045_v13 = vld [vmem:[#allocation5 + $0x1200] ss:$16 sps:$4 sm:$0xff]  }
 0x263   :  { %v8057_v40 = vld [vmem:[#allocation5 + $0x1240] ss:$16 sps:$4 sm:$0xff]  }
 0x265   :  { %5209 = vmatpush1.bf16.msra.mxu0 %v7961_v56  ;;  %5701 = vmatpush1.bf16.msra.mxu1 %v7964_v14  ;;  %v8048_v56 = vld [vmem:[#allocation5 + $0x1208] ss:$16 sps:$4 sm:$0xff]   ;;  %v8053_v14 = vld [vmem:[#allocation5 + $0x1224] ss:$16 sps:$4 sm:$0xff]  }
 0x266   :  { %5210 = vmatprep.subr.bf16.mxu0 %v7969_v15  ;;  %5702 = vmatprep.subr.bf16.mxu1 %v7972_v16  ;;  %v8056_v15 = vld [vmem:[#allocation5 + $0x122c] ss:$16 sps:$4 sm:$0xff]   ;;  %v241_v16 = vpack.c.bf16 %v180_v59, %v180_v59  ;;  %v8132_v59 = vld [vmem:[#allocation5 + $0x13c8] ss:$16 sps:$4 sm:$0xff]  }
 0x269   :  { %5211 = vmatpush1.bf16.msra.mxu0 %v7967_v17  ;;  %5703 = vmatpush1.bf16.msra.mxu1 %v7970_v18  ;;  %v8051_v17 = vld [vmem:[#allocation5 + $0x1220] ss:$16 sps:$4 sm:$0xff]   ;;  %v8054_v18 = vld [vmem:[#allocation5 + $0x1228] ss:$16 sps:$4 sm:$0xff]  }
 0x26a   :  { %5212 = vmatprep.subr.bf16.mxu0 %v7975_v19  ;;  %5704 = vmatprep.subr.bf16.mxu1 %v7978_v20  ;;  %v8059_v19 = vld [vmem:[#allocation5 + $0x1244] ss:$16 sps:$4 sm:$0xff]   ;;  %v8062_v20 = vld [vmem:[#allocation5 + $0x124c] ss:$16 sps:$4 sm:$0xff]  }
 0x26d   :  { %5213 = vmatpush1.bf16.msra.mxu0 %v7973_v21  ;;  %5705 = vmatpush1.bf16.msra.mxu1 %v7976_v22  ;;  %v8060_v21 = vld [vmem:[#allocation5 + $0x1248] ss:$16 sps:$4 sm:$0xff]   ;;  %v8065_v22 = vld [vmem:[#allocation5 + $0x1264] ss:$16 sps:$4 sm:$0xff]  }
 0x26e   :  { %5214 = vmatprep.subr.bf16.mxu0 %v7981_v24  ;;  %5706 = vmatprep.subr.bf16.mxu1 %v7984_v27  ;;  %v8068_v24 = vld [vmem:[#allocation5 + $0x126c] ss:$16 sps:$4 sm:$0xff]   ;;  %v8063_v27 = vld [vmem:[#allocation5 + $0x1260] ss:$16 sps:$4 sm:$0xff]  }
 0x271   :  { %5215 = vmatpush1.bf16.msra.mxu0 %v7979_v9  ;;  %5707 = vmatpush1.bf16.msra.mxu1 %v7982_v28  ;;  %v8066_v9 = vld [vmem:[#allocation5 + $0x1268] ss:$16 sps:$4 sm:$0xff]   ;;  %v8071_v28 = vld [vmem:[#allocation5 + $0x1284] ss:$16 sps:$4 sm:$0xff]  }
 0x272   :  { %5216 = vmatprep.subr.bf16.mxu0 %v7987_v23  ;;  %5708 = vmatprep.subr.bf16.mxu1 %v7990_v30  ;;  %v8074_v23 = vld [vmem:[#allocation5 + $0x128c] ss:$16 sps:$4 sm:$0xff]   ;;  %v8069_v30 = vld [vmem:[#allocation5 + $0x1280] ss:$16 sps:$4 sm:$0xff]  }
 0x275   :  { %5217 = vmatpush1.bf16.msra.mxu0 %v7985_v31  ;;  %5709 = vmatpush1.bf16.msra.mxu1 %v7988_v33  ;;  %v8072_v31 = vld [vmem:[#allocation5 + $0x1288] ss:$16 sps:$4 sm:$0xff]   ;;  %v8077_v33 = vld [vmem:[#allocation5 + $0x12a4] ss:$16 sps:$4 sm:$0xff]  }
 0x276   :  { %5218 = vmatprep.subr.bf16.mxu0 %v7993_v34  ;;  %5710 = vmatprep.subr.bf16.mxu1 %v7996_v35  ;;  %v8080_v34 = vld [vmem:[#allocation5 + $0x12ac] ss:$16 sps:$4 sm:$0xff]   ;;  %v8075_v35 = vld [vmem:[#allocation5 + $0x12a0] ss:$16 sps:$4 sm:$0xff]  }
 0x279   :  { %5219 = vmatpush1.bf16.msra.mxu0 %v7991_v36  ;;  %5711 = vmatpush1.bf16.msra.mxu1 %v7994_v37  ;;  %v8078_v36 = vld [vmem:[#allocation5 + $0x12a8] ss:$16 sps:$4 sm:$0xff]   ;;  %v8083_v37 = vld [vmem:[#allocation5 + $0x12c4] ss:$16 sps:$4 sm:$0xff]  }
 0x27a   :  { %5220 = vmatprep.subr.bf16.mxu0 %v7999_v38  ;;  %5712 = vmatprep.subr.bf16.mxu1 %v8002_v39  ;;  %v8086_v38 = vld [vmem:[#allocation5 + $0x12cc] ss:$16 sps:$4 sm:$0xff]   ;;  %v8081_v39 = vld [vmem:[#allocation5 + $0x12c0] ss:$16 sps:$4 sm:$0xff]  }
 0x27d   :  { %5221 = vmatpush1.bf16.msra.mxu0 %v7997_v26  ;;  %5713 = vmatpush1.bf16.msra.mxu1 %v8000_v41  ;;  %v8084_v26 = vld [vmem:[#allocation5 + $0x12c8] ss:$16 sps:$4 sm:$0xff]   ;;  %v8089_v41 = vld [vmem:[#allocation5 + $0x12e4] ss:$16 sps:$4 sm:$0xff]  }
 0x27e   :  { %5222 = vmatprep.subr.bf16.mxu0 %v8005_v42  ;;  %5714 = vmatprep.subr.bf16.mxu1 %v8008_v45  ;;  %v8092_v42 = vld [vmem:[#allocation5 + $0x12ec] ss:$16 sps:$4 sm:$0xff]   ;;  %v8087_v45 = vld [vmem:[#allocation5 + $0x12e0] ss:$16 sps:$4 sm:$0xff]  }
 0x281   :  { %5223 = vmatpush1.bf16.msra.mxu0 %v8003_v29  ;;  %5715 = vmatpush1.bf16.msra.mxu1 %v8006_v46  ;;  %v8090_v29 = vld [vmem:[#allocation5 + $0x12e8] ss:$16 sps:$4 sm:$0xff]   ;;  %v8095_v46 = vld [vmem:[#allocation5 + $0x1304] ss:$16 sps:$4 sm:$0xff]  }
 0x282   :  { %5224 = vmatprep.subr.bf16.mxu0 %v8011_v47  ;;  %5716 = vmatprep.subr.bf16.mxu1 %v8014_v48  ;;  %v8098_v47 = vld [vmem:[#allocation5 + $0x130c] ss:$16 sps:$4 sm:$0xff]   ;;  %v8093_v48 = vld [vmem:[#allocation5 + $0x1300] ss:$16 sps:$4 sm:$0xff]  }
 0x285   :  { %5225 = vmatpush1.bf16.msra.mxu0 %v8009_v50  ;;  %5717 = vmatpush1.bf16.msra.mxu1 %v8012_v51  ;;  %v8096_v50 = vld [vmem:[#allocation5 + $0x1308] ss:$16 sps:$4 sm:$0xff]   ;;  %v8101_v51 = vld [vmem:[#allocation5 + $0x1324] ss:$16 sps:$4 sm:$0xff]  }
 0x286   :  { %5226 = vmatprep.subr.bf16.mxu0 %v8017_v52  ;;  %5718 = vmatprep.subr.bf16.mxu1 %v8020_v53  ;;  %v8104_v52 = vld [vmem:[#allocation5 + $0x132c] ss:$16 sps:$4 sm:$0xff]   ;;  %v8099_v53 = vld [vmem:[#allocation5 + $0x1320] ss:$16 sps:$4 sm:$0xff]  }
 0x289   :  { %5227 = vmatpush1.bf16.msra.mxu0 %v8015_v54  ;;  %5719 = vmatpush1.bf16.msra.mxu1 %v8018_v55  ;;  %v8102_v54 = vld [vmem:[#allocation5 + $0x1328] ss:$16 sps:$4 sm:$0xff]   ;;  %v8107_v55 = vld [vmem:[#allocation5 + $0x1344] ss:$16 sps:$4 sm:$0xff]  }
 0x28a   :  { %5228 = vmatprep.subr.bf16.mxu0 %v8023_v32  ;;  %5720 = vmatprep.subr.bf16.mxu1 %v8026_v57  ;;  %v8110_v32 = vld [vmem:[#allocation5 + $0x134c] ss:$16 sps:$4 sm:$0xff]   ;;  %v8105_v57 = vld [vmem:[#allocation5 + $0x1340] ss:$16 sps:$4 sm:$0xff]  }
 0x28d   :  { %5229 = vmatpush1.bf16.msra.mxu0 %v8021_v58  ;;  %5721 = vmatpush1.bf16.msra.mxu1 %v8024_v60  ;;  %v8108_v58 = vld [vmem:[#allocation5 + $0x1348] ss:$16 sps:$4 sm:$0xff]   ;;  %v8113_v60 = vld [vmem:[#allocation5 + $0x1364] ss:$16 sps:$4 sm:$0xff]  }
 0x28e   :  { %5230 = vmatprep.subr.bf16.mxu0 %v8029_v44  ;;  %5722 = vmatprep.subr.bf16.mxu1 %v8032_v61  ;;  %v8116_v44 = vld [vmem:[#allocation5 + $0x136c] ss:$16 sps:$4 sm:$0xff]   ;;  %v8111_v61 = vld [vmem:[#allocation5 + $0x1360] ss:$16 sps:$4 sm:$0xff]  }
 0x291   :  { %5231 = vmatpush1.bf16.msra.mxu0 %v8027_v62  ;;  %5723 = vmatpush1.bf16.msra.mxu1 %v8030_v63  ;;  %v8114_v62 = vld [vmem:[#allocation5 + $0x1368] ss:$16 sps:$4 sm:$0xff]   ;;  %v8119_v63 = vld [vmem:[#allocation5 + $0x1384] ss:$16 sps:$4 sm:$0xff]  }
 0x292   :  { %5232 = vmatprep.subr.bf16.mxu0 %v8035_v0  ;;  %5724 = vmatprep.subr.bf16.mxu1 %v8038_v1  ;;  %v8122_v0 = vld [vmem:[#allocation5 + $0x138c] ss:$16 sps:$4 sm:$0xff]   ;;  %v8117_v1 = vld [vmem:[#allocation5 + $0x1380] ss:$16 sps:$4 sm:$0xff]  }
 0x295   :  { %5233 = vmatpush1.bf16.msra.mxu0 %v8033_v3  ;;  %5725 = vmatpush1.bf16.msra.mxu1 %v8036_v4  ;;  %v8125_v3 = vld [vmem:[#allocation5 + $0x13a4] ss:$16 sps:$4 sm:$0xff]   ;;  %v8128_v4 = vld [vmem:[#allocation5 + $0x13ac] ss:$16 sps:$4 sm:$0xff]  }
 0x296   :  { %5234 = vmatprep.subr.bf16.mxu0 %v8041_v5  ;;  %5726 = vmatprep.subr.bf16.mxu1 %v8044_v25  ;;  %v8123_v5 = vld [vmem:[#allocation5 + $0x13a0] ss:$16 sps:$4 sm:$0xff]   ;;  %v8126_v25 = vld [vmem:[#allocation5 + $0x13a8] ss:$16 sps:$4 sm:$0xff]  }
 0x299   :  { %5235 = vmatpush1.bf16.msra.mxu0 %v8039_v7  ;;  %5727 = vmatpush1.bf16.msra.mxu1 %v8042_v8  ;;  %v8131_v7 = vld [vmem:[#allocation5 + $0x13c4] ss:$16 sps:$4 sm:$0xff]   ;;  %v8134_v8 = vld [vmem:[#allocation5 + $0x13cc] ss:$16 sps:$4 sm:$0xff]  }
 0x29a   :  { %5245 = vmatprep.subr.bf16.mxu0 %v8047_v10  ;;  %5737 = vmatprep.subr.bf16.mxu1 %v8050_v11  ;;  %v8695_v10 = vld [vmem:[#allocation2 + $0x28] sm:$0xff]  ;;  %v8129_v11 = vld [vmem:[#allocation5 + $0x13c0] ss:$16 sps:$4 sm:$0xff]  }
 0x29c   :  { %5237 = vmatmul.mubr.bf16.vlgmr.msra.gmra.mrb[0].mxu0 %v238_v12  ;;  %5729 = vmatmul.mubr.bf16.vlgmr.msra.gmra.mrb[0].mxu1 %v238_v12  ;;  %v8137_v12 = vld [vmem:[#allocation5 + $0x13e4] ss:$16 sps:$4 sm:$0xff]  }
 0x29d   :  { %5246 = vmatpush1.bf16.msra.mxu0 %v8045_v13  ;;  %5738 = vmatpush1.bf16.msra.mxu1 %v8048_v56  ;;  %v8140_v13 = vld [vmem:[#allocation5 + $0x13ec] ss:$16 sps:$4 sm:$0xff]   ;;  %v8699_v56 = vrot.slane %v8695_v10, %v8611_v49 }
 0x29e   :  { %5247 = vmatprep.subr.bf16.mxu0 %v8053_v14  ;;  %5739 = vmatprep.subr.bf16.mxu1 %v8056_v15  ;;  %v8135_v14 = vld [vmem:[#allocation5 + $0x13e0] ss:$16 sps:$4 sm:$0xff]   ;;  %v8138_v15 = vld [vmem:[#allocation5 + $0x13e8] ss:$16 sps:$4 sm:$0xff]  }
 0x29f   :  { %5277 = vmatprep.mubr.bf16.mxu0 %v241_v16  ;;  %5769 = vmatprep.mubr.bf16.mxu1 %v241_v16  ;;  %v8144_v16 = vld [vmem:[#allocation5 + $0x1404] ss:$16 sps:$4 sm:$0xff]  }
 0x2a1   :  { %5248 = vmatpush1.bf16.msra.mxu0 %v8051_v17  ;;  %5740 = vmatpush1.bf16.msra.mxu1 %v8054_v18  ;;  %v8147_v17 = vld [vmem:[#allocation5 + $0x140c] ss:$16 sps:$4 sm:$0xff]   ;;  %v196_v18 = vcombine.high %v8699_v56, %v8699_v56 }
 0x2a2   :  { %5249 = vmatprep.subr.bf16.mxu0 %v8059_v19  ;;  %5741 = vmatprep.subr.bf16.mxu1 %v8062_v20  ;;  %v240_v19 = vpack.c.bf16 %v8689_v6, %v8689_v6  ;;  %v8142_v20 = vld [vmem:[#allocation5 + $0x1400] ss:$16 sps:$4 sm:$0xff]  }
 0x2a3   :  { %v8154_v6 = vld [vmem:[#allocation5 + $0x1440] ss:$16 sps:$4 sm:$0xff]  }
 0x2a5   :  { %5250 = vmatpush1.bf16.msra.mxu0 %v8057_v40  ;;  %5742 = vmatpush1.bf16.msra.mxu1 %v8060_v21  ;;  %v8145_v40 = vld [vmem:[#allocation5 + $0x1408] ss:$16 sps:$4 sm:$0xff]   ;;  %v8150_v21 = vld [vmem:[#allocation5 + $0x1424] ss:$16 sps:$4 sm:$0xff]  }
 0x2a6   :  { %5251 = vmatprep.subr.bf16.mxu0 %v8065_v22  ;;  %5743 = vmatprep.subr.bf16.mxu1 %v8068_v24  ;;  %v8153_v22 = vld [vmem:[#allocation5 + $0x142c] ss:$16 sps:$4 sm:$0xff]   ;;  %v243_v24 = vpack.c.bf16 %v196_v18, %v196_v18  ;;  %v8226_v18 = vld [vmem:[#allocation5 + $0x15c0] ss:$16 sps:$4 sm:$0xff]  }
 0x2a9   :  { %5252 = vmatpush1.bf16.msra.mxu0 %v8063_v27  ;;  %5744 = vmatpush1.bf16.msra.mxu1 %v8066_v9  ;;  %v8148_v27 = vld [vmem:[#allocation5 + $0x1420] ss:$16 sps:$4 sm:$0xff]   ;;  %v8151_v9 = vld [vmem:[#allocation5 + $0x1428] ss:$16 sps:$4 sm:$0xff]  }
 0x2aa   :  { %5253 = vmatprep.subr.bf16.mxu0 %v8071_v28  ;;  %5745 = vmatprep.subr.bf16.mxu1 %v8074_v23  ;;  %v8156_v28 = vld [vmem:[#allocation5 + $0x1444] ss:$16 sps:$4 sm:$0xff]   ;;  %v8159_v23 = vld [vmem:[#allocation5 + $0x144c] ss:$16 sps:$4 sm:$0xff]  }
 0x2ad   :  { %5254 = vmatpush1.bf16.msra.mxu0 %v8069_v30  ;;  %5746 = vmatpush1.bf16.msra.mxu1 %v8072_v31  ;;  %v8157_v30 = vld [vmem:[#allocation5 + $0x1448] ss:$16 sps:$4 sm:$0xff]   ;;  %v8162_v31 = vld [vmem:[#allocation5 + $0x1464] ss:$16 sps:$4 sm:$0xff]  }
 0x2ae   :  { %5255 = vmatprep.subr.bf16.mxu0 %v8077_v33  ;;  %5747 = vmatprep.subr.bf16.mxu1 %v8080_v34  ;;  %v8165_v33 = vld [vmem:[#allocation5 + $0x146c] ss:$16 sps:$4 sm:$0xff]   ;;  %v8160_v34 = vld [vmem:[#allocation5 + $0x1460] ss:$16 sps:$4 sm:$0xff]  }
 0x2b1   :  { %5256 = vmatpush1.bf16.msra.mxu0 %v8075_v35  ;;  %5748 = vmatpush1.bf16.msra.mxu1 %v8078_v36  ;;  %v8163_v35 = vld [vmem:[#allocation5 + $0x1468] ss:$16 sps:$4 sm:$0xff]   ;;  %v8168_v36 = vld [vmem:[#allocation5 + $0x1484] ss:$16 sps:$4 sm:$0xff]  }
 0x2b2   :  { %5257 = vmatprep.subr.bf16.mxu0 %v8083_v37  ;;  %5749 = vmatprep.subr.bf16.mxu1 %v8086_v38  ;;  %v8171_v37 = vld [vmem:[#allocation5 + $0x148c] ss:$16 sps:$4 sm:$0xff]   ;;  %v8166_v38 = vld [vmem:[#allocation5 + $0x1480] ss:$16 sps:$4 sm:$0xff]  }
 0x2b5   :  { %5258 = vmatpush1.bf16.msra.mxu0 %v8081_v39  ;;  %5750 = vmatpush1.bf16.msra.mxu1 %v8084_v26  ;;  %v8169_v39 = vld [vmem:[#allocation5 + $0x1488] ss:$16 sps:$4 sm:$0xff]   ;;  %v8174_v26 = vld [vmem:[#allocation5 + $0x14a4] ss:$16 sps:$4 sm:$0xff]  }
 0x2b6   :  { %5259 = vmatprep.subr.bf16.mxu0 %v8089_v41  ;;  %5751 = vmatprep.subr.bf16.mxu1 %v8092_v42  ;;  %v8177_v41 = vld [vmem:[#allocation5 + $0x14ac] ss:$16 sps:$4 sm:$0xff]   ;;  %v8172_v42 = vld [vmem:[#allocation5 + $0x14a0] ss:$16 sps:$4 sm:$0xff]  }
 0x2b9   :  { %5260 = vmatpush1.bf16.msra.mxu0 %v8087_v45  ;;  %5752 = vmatpush1.bf16.msra.mxu1 %v8090_v29  ;;  %v8175_v45 = vld [vmem:[#allocation5 + $0x14a8] ss:$16 sps:$4 sm:$0xff]   ;;  %v8180_v29 = vld [vmem:[#allocation5 + $0x14c4] ss:$16 sps:$4 sm:$0xff]  }
 0x2ba   :  { %5261 = vmatprep.subr.bf16.mxu0 %v8095_v46  ;;  %5753 = vmatprep.subr.bf16.mxu1 %v8098_v47  ;;  %v8183_v46 = vld [vmem:[#allocation5 + $0x14cc] ss:$16 sps:$4 sm:$0xff]   ;;  %v8178_v47 = vld [vmem:[#allocation5 + $0x14c0] ss:$16 sps:$4 sm:$0xff]  }
 0x2bd   :  { %5262 = vmatpush1.bf16.msra.mxu0 %v8093_v48  ;;  %5754 = vmatpush1.bf16.msra.mxu1 %v8096_v50  ;;  %v8181_v48 = vld [vmem:[#allocation5 + $0x14c8] ss:$16 sps:$4 sm:$0xff]   ;;  %v8186_v50 = vld [vmem:[#allocation5 + $0x14e4] ss:$16 sps:$4 sm:$0xff]  }
 0x2be   :  { %5263 = vmatprep.subr.bf16.mxu0 %v8101_v51  ;;  %5755 = vmatprep.subr.bf16.mxu1 %v8104_v52  ;;  %v8189_v51 = vld [vmem:[#allocation5 + $0x14ec] ss:$16 sps:$4 sm:$0xff]   ;;  %v8184_v52 = vld [vmem:[#allocation5 + $0x14e0] ss:$16 sps:$4 sm:$0xff]  }
 0x2c1   :  { %5264 = vmatpush1.bf16.msra.mxu0 %v8099_v53  ;;  %5756 = vmatpush1.bf16.msra.mxu1 %v8102_v54  ;;  %v8187_v53 = vld [vmem:[#allocation5 + $0x14e8] ss:$16 sps:$4 sm:$0xff]   ;;  %v8192_v54 = vld [vmem:[#allocation5 + $0x1504] ss:$16 sps:$4 sm:$0xff]  }
 0x2c2   :  { %5265 = vmatprep.subr.bf16.mxu0 %v8107_v55  ;;  %5757 = vmatprep.subr.bf16.mxu1 %v8110_v32  ;;  %v8195_v55 = vld [vmem:[#allocation5 + $0x150c] ss:$16 sps:$4 sm:$0xff]   ;;  %v8190_v32 = vld [vmem:[#allocation5 + $0x1500] ss:$16 sps:$4 sm:$0xff]  }
 0x2c5   :  { %5266 = vmatpush1.bf16.msra.mxu0 %v8105_v57  ;;  %5758 = vmatpush1.bf16.msra.mxu1 %v8108_v58  ;;  %v8193_v57 = vld [vmem:[#allocation5 + $0x1508] ss:$16 sps:$4 sm:$0xff]   ;;  %v8198_v58 = vld [vmem:[#allocation5 + $0x1524] ss:$16 sps:$4 sm:$0xff]  }
 0x2c6   :  { %5267 = vmatprep.subr.bf16.mxu0 %v8113_v60  ;;  %5759 = vmatprep.subr.bf16.mxu1 %v8116_v44  ;;  %v8201_v60 = vld [vmem:[#allocation5 + $0x152c] ss:$16 sps:$4 sm:$0xff]   ;;  %v8196_v44 = vld [vmem:[#allocation5 + $0x1520] ss:$16 sps:$4 sm:$0xff]  }
 0x2c9   :  { %5268 = vmatpush1.bf16.msra.mxu0 %v8111_v61  ;;  %5760 = vmatpush1.bf16.msra.mxu1 %v8114_v62  ;;  %v8199_v61 = vld [vmem:[#allocation5 + $0x1528] ss:$16 sps:$4 sm:$0xff]   ;;  %v8204_v62 = vld [vmem:[#allocation5 + $0x1544] ss:$16 sps:$4 sm:$0xff]  }
 0x2ca   :  { %5269 = vmatprep.subr.bf16.mxu0 %v8119_v63  ;;  %5761 = vmatprep.subr.bf16.mxu1 %v8122_v0  ;;  %v8207_v63 = vld [vmem:[#allocation5 + $0x154c] ss:$16 sps:$4 sm:$0xff]   ;;  %v8202_v0 = vld [vmem:[#allocation5 + $0x1540] ss:$16 sps:$4 sm:$0xff]  }
 0x2cd   :  { %5270 = vmatpush1.bf16.msra.mxu0 %v8117_v1  ;;  %5762 = vmatpush1.bf16.msra.mxu1 %v8120_v2  ;;  %v8205_v1 = vld [vmem:[#allocation5 + $0x1548] ss:$16 sps:$4 sm:$0xff]   ;;  %v8210_v2 = vld [vmem:[#allocation5 + $0x1564] ss:$16 sps:$4 sm:$0xff]  }
 0x2ce   :  { %5271 = vmatprep.subr.bf16.mxu0 %v8125_v3  ;;  %5763 = vmatprep.subr.bf16.mxu1 %v8128_v4  ;;  %v8213_v3 = vld [vmem:[#allocation5 + $0x156c] ss:$16 sps:$4 sm:$0xff]   ;;  %v8208_v4 = vld [vmem:[#allocation5 + $0x1560] ss:$16 sps:$4 sm:$0xff]  }
 0x2d1   :  { %5272 = vmatpush1.bf16.msra.mxu0 %v8123_v5  ;;  %5764 = vmatpush1.bf16.msra.mxu1 %v8126_v25  ;;  %v8211_v5 = vld [vmem:[#allocation5 + $0x1568] ss:$16 sps:$4 sm:$0xff]   ;;  %v8216_v25 = vld [vmem:[#allocation5 + $0x1584] ss:$16 sps:$4 sm:$0xff]  }
 0x2d2   :  { %5273 = vmatprep.subr.bf16.mxu0 %v8131_v7  ;;  %5765 = vmatprep.subr.bf16.mxu1 %v8134_v8  ;;  %v8219_v7 = vld [vmem:[#allocation5 + $0x158c] ss:$16 sps:$4 sm:$0xff]   ;;  %v8214_v8 = vld [vmem:[#allocation5 + $0x1580] ss:$16 sps:$4 sm:$0xff]  }
 0x2d5   :  { %5274 = vmatpush1.bf16.msra.mxu0 %v8129_v11  ;;  %5766 = vmatpush1.bf16.msra.mxu1 %v8132_v59  ;;  %v8217_v11 = vld [vmem:[#allocation5 + $0x1588] ss:$16 sps:$4 sm:$0xff]   ;;  %v8222_v59 = vld [vmem:[#allocation5 + $0x15a4] ss:$16 sps:$4 sm:$0xff]  }
 0x2d6   :  { %5275 = vmatprep.subr.bf16.mxu0 %v8137_v12  ;;  %5767 = vmatprep.subr.bf16.mxu1 %v8140_v13  ;;  %v8225_v12 = vld [vmem:[#allocation5 + $0x15ac] ss:$16 sps:$4 sm:$0xff]   ;;  %v8220_v13 = vld [vmem:[#allocation5 + $0x15a0] ss:$16 sps:$4 sm:$0xff]  }
 0x2d9   :  { %5276 = vmatpush1.bf16.msra.mxu0 %v8135_v14  ;;  %5768 = vmatpush1.bf16.msra.mxu1 %v8138_v15  ;;  %v8223_v14 = vld [vmem:[#allocation5 + $0x15a8] ss:$16 sps:$4 sm:$0xff]   ;;  %v8228_v15 = vld [vmem:[#allocation5 + $0x15c4] ss:$16 sps:$4 sm:$0xff]  }
 0x2da   :  { %5286 = vmatprep.subr.bf16.mxu0 %v8144_v16  ;;  %5778 = vmatprep.subr.bf16.mxu1 %v8147_v17  ;;  %v8231_v16 = vld [vmem:[#allocation5 + $0x15cc] ss:$16 sps:$4 sm:$0xff]   ;;  %v181_v17 = vcombine.high %v8695_v10, %v8695_v10 }
 0x2dc   :  { %5278 = vmatmul.mubr.bf16.vlgmr.msra.gmra.mrb[0].mxu0 %v240_v19  ;;  %5770 = vmatmul.mubr.bf16.vlgmr.msra.gmra.mrb[0].mxu1 %v240_v19  ;;  %v8229_v19 = vld [vmem:[#allocation5 + $0x15c8] ss:$16 sps:$4 sm:$0xff]  }
 0x2dd   :  { %5287 = vmatpush1.bf16.msra.mxu0 %v8142_v20  ;;  %5779 = vmatpush1.bf16.msra.mxu1 %v8145_v40  ;;  %v8234_v20 = vld [vmem:[#allocation5 + $0x15e4] ss:$16 sps:$4 sm:$0xff]   ;;  %v8237_v40 = vld [vmem:[#allocation5 + $0x15ec] ss:$16 sps:$4 sm:$0xff]  }
 0x2de   :  { %5288 = vmatprep.subr.bf16.mxu0 %v8150_v21  ;;  %5780 = vmatprep.subr.bf16.mxu1 %v8153_v22  ;;  %v8708_v21 = vrot.slane %v181_v17, %v8611_v49  ;;  %v8232_v22 = vld [vmem:[#allocation5 + $0x15e0] ss:$16 sps:$4 sm:$0xff]   ;;  %v8246_v49 = vld [vmem:[#allocation5 + $0x1624] ss:$16 sps:$4 sm:$0xff]  }
 0x2df   :  { %5318 = vmatprep.mubr.bf16.mxu0 %v243_v24  ;;  %5810 = vmatprep.mubr.bf16.mxu1 %v243_v24  ;;  %v8235_v24 = vld [vmem:[#allocation5 + $0x15e8] ss:$16 sps:$4 sm:$0xff]   ;;  %v8318_v17 = vld [vmem:[#allocation5 + $0x17a4] ss:$16 sps:$4 sm:$0xff]  }
 0x2e0   :  { %v197_v10 = vcombine.high %v8708_v21, %v8708_v21 }
 0x2e1   :  { %5289 = vmatpush1.bf16.msra.mxu0 %v8148_v27  ;;  %5781 = vmatpush1.bf16.msra.mxu1 %v8151_v9  ;;  %v8240_v27 = vld [vmem:[#allocation5 + $0x1604] ss:$16 sps:$4 sm:$0xff]   ;;  %v8243_v9 = vld [vmem:[#allocation5 + $0x160c] ss:$16 sps:$4 sm:$0xff]  }
 0x2e2   :  { %5290 = vmatprep.subr.bf16.mxu0 %v8156_v28  ;;  %5782 = vmatprep.subr.bf16.mxu1 %v8159_v23  ;;  %v242_v28 = vpack.c.bf16 %v8699_v56, %v8699_v56  ;;  %v8238_v23 = vld [vmem:[#allocation5 + $0x1600] ss:$16 sps:$4 sm:$0xff]  }
 0x2e3   :  { %v8250_v56 = vld [vmem:[#allocation5 + $0x1640] ss:$16 sps:$4 sm:$0xff]  }
 0x2e5   :  { %5291 = vmatpush1.bf16.msra.mxu0 %v8154_v6  ;;  %5783 = vmatpush1.bf16.msra.mxu1 %v8157_v30  ;;  %v8241_v6 = vld [vmem:[#allocation5 + $0x1608] ss:$16 sps:$4 sm:$0xff]   ;;  %v8249_v30 = vld [vmem:[#allocation5 + $0x162c] ss:$16 sps:$4 sm:$0xff]  }
 0x2e6   :  { %5292 = vmatprep.subr.bf16.mxu0 %v8162_v31  ;;  %5784 = vmatprep.subr.bf16.mxu1 %v8165_v33  ;;  %v245_v31 = vpack.c.bf16 %v197_v10, %v197_v10  ;;  %v8244_v33 = vld [vmem:[#allocation5 + $0x1620] ss:$16 sps:$4 sm:$0xff]   ;;  %v8333_v10 = vld [vmem:[#allocation5 + $0x17ec] ss:$16 sps:$4 sm:$0xff]  }
 0x2e9   :  { %5293 = vmatpush1.bf16.msra.mxu0 %v8160_v34  ;;  %5785 = vmatpush1.bf16.msra.mxu1 %v8163_v35  ;;  %v8247_v34 = vld [vmem:[#allocation5 + $0x1628] ss:$16 sps:$4 sm:$0xff]   ;;  %v8252_v35 = vld [vmem:[#allocation5 + $0x1644] ss:$16 sps:$4 sm:$0xff]  }
 0x2ea   :  { %5294 = vmatprep.subr.bf16.mxu0 %v8168_v36  ;;  %5786 = vmatprep.subr.bf16.mxu1 %v8171_v37  ;;  %v8255_v36 = vld [vmem:[#allocation5 + $0x164c] ss:$16 sps:$4 sm:$0xff]   ;;  %v8253_v37 = vld [vmem:[#allocation5 + $0x1648] ss:$16 sps:$4 sm:$0xff]  }
 0x2ed   :  { %5295 = vmatpush1.bf16.msra.mxu0 %v8166_v38  ;;  %5787 = vmatpush1.bf16.msra.mxu1 %v8169_v39  ;;  %v8258_v38 = vld [vmem:[#allocation5 + $0x1664] ss:$16 sps:$4 sm:$0xff]   ;;  %v8261_v39 = vld [vmem:[#allocation5 + $0x166c] ss:$16 sps:$4 sm:$0xff]  }
 0x2ee   :  { %5296 = vmatprep.subr.bf16.mxu0 %v8174_v26  ;;  %5788 = vmatprep.subr.bf16.mxu1 %v8177_v41  ;;  %v8256_v26 = vld [vmem:[#allocation5 + $0x1660] ss:$16 sps:$4 sm:$0xff]   ;;  %v8259_v41 = vld [vmem:[#allocation5 + $0x1668] ss:$16 sps:$4 sm:$0xff]  }
 0x2f1   :  { %5297 = vmatpush1.bf16.msra.mxu0 %v8172_v42  ;;  %5789 = vmatpush1.bf16.msra.mxu1 %v8175_v45  ;;  %v8264_v42 = vld [vmem:[#allocation5 + $0x1684] ss:$16 sps:$4 sm:$0xff]   ;;  %v8267_v45 = vld [vmem:[#allocation5 + $0x168c] ss:$16 sps:$4 sm:$0xff]  }
 0x2f2   :  { %5298 = vmatprep.subr.bf16.mxu0 %v8180_v29  ;;  %5790 = vmatprep.subr.bf16.mxu1 %v8183_v46  ;;  %v8262_v29 = vld [vmem:[#allocation5 + $0x1680] ss:$16 sps:$4 sm:$0xff]   ;;  %v8265_v46 = vld [vmem:[#allocation5 + $0x1688] ss:$16 sps:$4 sm:$0xff]  }
 0x2f5   :  { %5299 = vmatpush1.bf16.msra.mxu0 %v8178_v47  ;;  %5791 = vmatpush1.bf16.msra.mxu1 %v8181_v48  ;;  %v8270_v47 = vld [vmem:[#allocation5 + $0x16a4] ss:$16 sps:$4 sm:$0xff]   ;;  %v8273_v48 = vld [vmem:[#allocation5 + $0x16ac] ss:$16 sps:$4 sm:$0xff]  }
 0x2f6   :  { %5300 = vmatprep.subr.bf16.mxu0 %v8186_v50  ;;  %5792 = vmatprep.subr.bf16.mxu1 %v8189_v51  ;;  %v8268_v50 = vld [vmem:[#allocation5 + $0x16a0] ss:$16 sps:$4 sm:$0xff]   ;;  %v8271_v51 = vld [vmem:[#allocation5 + $0x16a8] ss:$16 sps:$4 sm:$0xff]  }
 0x2f9   :  { %5301 = vmatpush1.bf16.msra.mxu0 %v8184_v52  ;;  %5793 = vmatpush1.bf16.msra.mxu1 %v8187_v53  ;;  %v8276_v52 = vld [vmem:[#allocation5 + $0x16c4] ss:$16 sps:$4 sm:$0xff]   ;;  %v8279_v53 = vld [vmem:[#allocation5 + $0x16cc] ss:$16 sps:$4 sm:$0xff]  }
 0x2fa   :  { %5302 = vmatprep.subr.bf16.mxu0 %v8192_v54  ;;  %5794 = vmatprep.subr.bf16.mxu1 %v8195_v55  ;;  %v8274_v54 = vld [vmem:[#allocation5 + $0x16c0] ss:$16 sps:$4 sm:$0xff]   ;;  %v8277_v55 = vld [vmem:[#allocation5 + $0x16c8] ss:$16 sps:$4 sm:$0xff]  }
 0x2fd   :  { %5303 = vmatpush1.bf16.msra.mxu0 %v8190_v32  ;;  %5795 = vmatpush1.bf16.msra.mxu1 %v8193_v57  ;;  %v8282_v32 = vld [vmem:[#allocation5 + $0x16e4] ss:$16 sps:$4 sm:$0xff]   ;;  %v8285_v57 = vld [vmem:[#allocation5 + $0x16ec] ss:$16 sps:$4 sm:$0xff]  }
 0x2fe   :  { %5304 = vmatprep.subr.bf16.mxu0 %v8198_v58  ;;  %5796 = vmatprep.subr.bf16.mxu1 %v8201_v60  ;;  %v8280_v58 = vld [vmem:[#allocation5 + $0x16e0] ss:$16 sps:$4 sm:$0xff]   ;;  %v8283_v60 = vld [vmem:[#allocation5 + $0x16e8] ss:$16 sps:$4 sm:$0xff]  }
 0x301   :  { %5305 = vmatpush1.bf16.msra.mxu0 %v8196_v44  ;;  %5797 = vmatpush1.bf16.msra.mxu1 %v8199_v61  ;;  %v8288_v44 = vld [vmem:[#allocation5 + $0x1704] ss:$16 sps:$4 sm:$0xff]   ;;  %v8291_v61 = vld [vmem:[#allocation5 + $0x170c] ss:$16 sps:$4 sm:$0xff]  }
 0x302   :  { %5306 = vmatprep.subr.bf16.mxu0 %v8204_v62  ;;  %5798 = vmatprep.subr.bf16.mxu1 %v8207_v63  ;;  %v8286_v62 = vld [vmem:[#allocation5 + $0x1700] ss:$16 sps:$4 sm:$0xff]   ;;  %v8289_v63 = vld [vmem:[#allocation5 + $0x1708] ss:$16 sps:$4 sm:$0xff]  }
 0x305   :  { %5307 = vmatpush1.bf16.msra.mxu0 %v8202_v0  ;;  %5799 = vmatpush1.bf16.msra.mxu1 %v8205_v1  ;;  %v8294_v0 = vld [vmem:[#allocation5 + $0x1724] ss:$16 sps:$4 sm:$0xff]   ;;  %v8297_v1 = vld [vmem:[#allocation5 + $0x172c] ss:$16 sps:$4 sm:$0xff]  }
 0x306   :  { %5308 = vmatprep.subr.bf16.mxu0 %v8210_v2  ;;  %5800 = vmatprep.subr.bf16.mxu1 %v8213_v3  ;;  %v8292_v2 = vld [vmem:[#allocation5 + $0x1720] ss:$16 sps:$4 sm:$0xff]   ;;  %v8295_v3 = vld [vmem:[#allocation5 + $0x1728] ss:$16 sps:$4 sm:$0xff]  }
 0x309   :  { %5309 = vmatpush1.bf16.msra.mxu0 %v8208_v4  ;;  %5801 = vmatpush1.bf16.msra.mxu1 %v8211_v5  ;;  %v8300_v4 = vld [vmem:[#allocation5 + $0x1744] ss:$16 sps:$4 sm:$0xff]   ;;  %v8303_v5 = vld [vmem:[#allocation5 + $0x174c] ss:$16 sps:$4 sm:$0xff]  }
 0x30a   :  { %5310 = vmatprep.subr.bf16.mxu0 %v8216_v25  ;;  %5802 = vmatprep.subr.bf16.mxu1 %v8219_v7  ;;  %v8298_v25 = vld [vmem:[#allocation5 + $0x1740] ss:$16 sps:$4 sm:$0xff]   ;;  %v8301_v7 = vld [vmem:[#allocation5 + $0x1748] ss:$16 sps:$4 sm:$0xff]  }
 0x30d   :  { %5311 = vmatpush1.bf16.msra.mxu0 %v8214_v8  ;;  %5803 = vmatpush1.bf16.msra.mxu1 %v8217_v11  ;;  %v8306_v8 = vld [vmem:[#allocation5 + $0x1764] ss:$16 sps:$4 sm:$0xff]   ;;  %v8309_v11 = vld [vmem:[#allocation5 + $0x176c] ss:$16 sps:$4 sm:$0xff]  }
 0x30e   :  { %5312 = vmatprep.subr.bf16.mxu0 %v8222_v59  ;;  %5804 = vmatprep.subr.bf16.mxu1 %v8225_v12  ;;  %v8304_v59 = vld [vmem:[#allocation5 + $0x1760] ss:$16 sps:$4 sm:$0xff]   ;;  %v8307_v12 = vld [vmem:[#allocation5 + $0x1768] ss:$16 sps:$4 sm:$0xff]  }
 0x311   :  { %5313 = vmatpush1.bf16.msra.mxu0 %v8220_v13  ;;  %5805 = vmatpush1.bf16.msra.mxu1 %v8223_v14  ;;  %v8312_v13 = vld [vmem:[#allocation5 + $0x1784] ss:$16 sps:$4 sm:$0xff]   ;;  %v8315_v14 = vld [vmem:[#allocation5 + $0x178c] ss:$16 sps:$4 sm:$0xff]  }
 0x312   :  { %5314 = vmatprep.subr.bf16.mxu0 %v8228_v15  ;;  %5806 = vmatprep.subr.bf16.mxu1 %v8231_v16  ;;  %v8310_v15 = vld [vmem:[#allocation5 + $0x1780] ss:$16 sps:$4 sm:$0xff]   ;;  %v8313_v16 = vld [vmem:[#allocation5 + $0x1788] ss:$16 sps:$4 sm:$0xff]  }
 0x315   :  { %5315 = vmatpush1.bf16.msra.mxu0 %v8226_v18  ;;  %5807 = vmatpush1.bf16.msra.mxu1 %v8229_v19  ;;  %v8321_v18 = vld [vmem:[#allocation5 + $0x17ac] ss:$16 sps:$4 sm:$0xff]   ;;  %v8316_v19 = vld [vmem:[#allocation5 + $0x17a0] ss:$16 sps:$4 sm:$0xff]  }
 0x316   :  { %5316 = vmatprep.subr.bf16.mxu0 %v8234_v20  ;;  %5808 = vmatprep.subr.bf16.mxu1 %v8237_v40  ;;  %v8319_v20 = vld [vmem:[#allocation5 + $0x17a8] ss:$16 sps:$4 sm:$0xff]   ;;  %v8324_v40 = vld [vmem:[#allocation5 + $0x17c4] ss:$16 sps:$4 sm:$0xff]  }
 0x319   :  { %5317 = vmatpush1.bf16.msra.mxu0 %v8232_v22  ;;  %5809 = vmatpush1.bf16.msra.mxu1 %v8235_v24  ;;  %v8327_v22 = vld [vmem:[#allocation5 + $0x17cc] ss:$16 sps:$4 sm:$0xff]   ;;  %v8322_v24 = vld [vmem:[#allocation5 + $0x17c0] ss:$16 sps:$4 sm:$0xff]  }
 0x31a   :  { %5327 = vmatprep.subr.bf16.mxu0 %v8240_v27  ;;  %5819 = vmatprep.subr.bf16.mxu1 %v8243_v9  ;;  %v8325_v27 = vld [vmem:[#allocation5 + $0x17c8] ss:$16 sps:$4 sm:$0xff]   ;;  %v8330_v9 = vld [vmem:[#allocation5 + $0x17e4] ss:$16 sps:$4 sm:$0xff]  }
 0x31c   :  { %5319 = vmatmul.mubr.bf16.vlgmr.msra.gmra.mrb[0].mxu0 %v242_v28  ;;  %5811 = vmatmul.mubr.bf16.vlgmr.msra.gmra.mrb[0].mxu1 %v242_v28  ;;  %v8328_v28 = vld [vmem:[#allocation5 + $0x17e0] ss:$16 sps:$4 sm:$0xff]  }
 0x31d   :  { %5328 = vmatpush1.bf16.msra.mxu0 %v8238_v23  ;;  %5820 = vmatpush1.bf16.msra.mxu1 %v8241_v6  ;;  %v8331_v23 = vld [vmem:[#allocation5 + $0x17e8] ss:$16 sps:$4 sm:$0xff]  }
 0x31e   :  { %5329 = vmatprep.subr.bf16.mxu0 %v8246_v49  ;;  %5821 = vmatprep.subr.bf16.mxu1 %v8249_v30  ;;  %v8335_v6 = vld [vmem:[#allocation8 + $0x40] sm:$0xff]   ;;  %v244_v30 = vpack.c.bf16 %v8708_v21, %v8708_v21  ;;  %v8345_v21 = vld [vmem:[#allocation8 + $0x10] sm:$0xff]  }
 0x31f   :  { %5359 = vmatprep.mubr.bf16.mxu0 %v245_v31  ;;  %5851 = vmatprep.mubr.bf16.mxu1 %v245_v31  ;;  %v8336_v49 = vld [vmem:[#allocation8 + $0xc0] sm:$0xff]  }
 0x320   :  { %v8337_v31 = vld [vmem:[#allocation8] sm:$0xff]  }
 0x321   :  { %5330 = vmatpush1.bf16.msra.mxu0 %v8244_v33  ;;  %5822 = vmatpush1.bf16.msra.mxu1 %v8247_v34  ;;  %v8338_v33 = vld [vmem:[#allocation8 + $0x80] sm:$0xff]   ;;  %v8339_v34 = vld [vmem:[#allocation8 + $0x48] sm:$0xff]  }
 0x322   :  { %5331 = vmatprep.subr.bf16.mxu0 %v8252_v35  ;;  %5823 = vmatprep.subr.bf16.mxu1 %v8255_v36  ;;  %v8340_v35 = vld [vmem:[#allocation8 + $0xc8] sm:$0xff]  }
 0x323   :  { %v8341_v36 = vld [vmem:[#allocation8 + $0x8] sm:$0xff]  }
 0x325   :  { %5332 = vmatpush1.bf16.msra.mxu0 %v8250_v56  ;;  %5824 = vmatpush1.bf16.msra.mxu1 %v8253_v37  ;;  %v8342_v56 = vld [vmem:[#allocation8 + $0x88] sm:$0xff]   ;;  %v8343_v37 = vld [vmem:[#allocation8 + $0x50] sm:$0xff]  }
 0x326   :  { %5333 = vmatprep.subr.bf16.mxu0 %v8258_v38  ;;  %5825 = vmatprep.subr.bf16.mxu1 %v8261_v39  ;;  %v8344_v38 = vld [vmem:[#allocation8 + $0xd0] sm:$0xff]  }
 0x327   :  { %v8346_v39 = vld [vmem:[#allocation8 + $0x90] sm:$0xff]  }
 0x329   :  { %5334 = vmatpush1.bf16.msra.mxu0 %v8256_v26  ;;  %5826 = vmatpush1.bf16.msra.mxu1 %v8259_v41  ;;  %v8347_v26 = vld [vmem:[#allocation8 + $0x58] sm:$0xff]  }
 0x32a   :  { %5335 = vmatprep.subr.bf16.mxu0 %v8264_v42  ;;  %5827 = vmatprep.subr.bf16.mxu1 %v8267_v45  ;;  %v8348_v41 = vld [vmem:[#allocation8 + $0xd8] sm:$0xff]  }
 0x32b   :  { %v8349_v42 = vld [vmem:[#allocation8 + $0x18] sm:$0xff]  }
 0x32c   :  { %v8350_v45 = vld [vmem:[#allocation8 + $0x98] sm:$0xff]  }
 0x32d   :  { %5336 = vmatpush1.bf16.msra.mxu0 %v8262_v29  ;;  %5828 = vmatpush1.bf16.msra.mxu1 %v8265_v46  ;;  %v8351_v29 = vld [vmem:[#allocation8 + $0x60] sm:$0xff]  }
 0x32e   :  { %5337 = vmatprep.subr.bf16.mxu0 %v8270_v47  ;;  %5829 = vmatprep.subr.bf16.mxu1 %v8273_v48  ;;  %v8352_v46 = vld [vmem:[#allocation8 + $0xe0] sm:$0xff]  }
 0x32f   :  { %v8353_v47 = vld [vmem:[#allocation8 + $0x20] sm:$0xff]  }
 0x330   :  { %v8354_v48 = vld [vmem:[#allocation8 + $0xa0] sm:$0xff]  }
 0x331   :  { %5338 = vmatpush1.bf16.msra.mxu0 %v8268_v50  ;;  %5830 = vmatpush1.bf16.msra.mxu1 %v8271_v51  ;;  %v8355_v50 = vld [vmem:[#allocation8 + $0x68] sm:$0xff]  }
 0x332   :  { %5339 = vmatprep.subr.bf16.mxu0 %v8276_v52  ;;  %5831 = vmatprep.subr.bf16.mxu1 %v8279_v53  ;;  %v8356_v51 = vld [vmem:[#allocation8 + $0xe8] sm:$0xff]  }
 0x333   :  { %v8357_v52 = vld [vmem:[#allocation8 + $0x28] sm:$0xff]  }
 0x334   :  { %v8358_v53 = vld [vmem:[#allocation8 + $0xa8] sm:$0xff]  }
 0x335   :  { %5340 = vmatpush1.bf16.msra.mxu0 %v8274_v54  ;;  %5832 = vmatpush1.bf16.msra.mxu1 %v8277_v55  ;;  %v8359_v54 = vld [vmem:[#allocation8 + $0x70] sm:$0xff]  }
 0x336   :  { %5341 = vmatprep.subr.bf16.mxu0 %v8282_v32  ;;  %5833 = vmatprep.subr.bf16.mxu1 %v8285_v57  ;;  %v8360_v55 = vld [vmem:[#allocation8 + $0xf0] sm:$0xff]  }
 0x337   :  { %v8361_v32 = vld [vmem:[#allocation8 + $0x30] sm:$0xff]  }
 0x338   :  { %v8362_v57 = vld [vmem:[#allocation8 + $0xb0] sm:$0xff]  }
 0x339   :  { %5342 = vmatpush1.bf16.msra.mxu0 %v8280_v58  ;;  %5834 = vmatpush1.bf16.msra.mxu1 %v8283_v60  ;;  %v8363_v58 = vld [vmem:[#allocation8 + $0x78] sm:$0xff]  }
 0x33a   :  { %5343 = vmatprep.subr.bf16.mxu0 %v8288_v44  ;;  %5835 = vmatprep.subr.bf16.mxu1 %v8291_v61  ;;  %v8364_v60 = vld [vmem:[#allocation8 + $0xf8] sm:$0xff]  }
 0x33b   :  { %v8365_v44 = vld [vmem:[#allocation8 + $0x38] sm:$0xff]  }
 0x33c   :  { %v8366_v61 = vld [vmem:[#allocation8 + $0xb8] sm:$0xff]  }
 0x33d   :  { %5344 = vmatpush1.bf16.msra.mxu0 %v8286_v62  ;;  %5836 = vmatpush1.bf16.msra.mxu1 %v8289_v63  ;;  %v1018_v62 = vsub.s32 0, %v8608_v43  ;;  %v1026_v63 = vsub.s32 2, %v8608_v43 }
 0x33e   :  { %5345 = vmatprep.subr.bf16.mxu0 %v8294_v0  ;;  %5837 = vmatprep.subr.bf16.mxu1 %v8297_v1  ;;  %v1014_v0 = vld [vmem:[#allocation7] sm:$0xf]  ;;  %v1022_v1 = vsub.s32 1, %v8608_v43 }
 0x341   :  { %5346 = vmatpush1.bf16.msra.mxu0 %v8292_v2  ;;  %5838 = vmatpush1.bf16.msra.mxu1 %v8295_v3  ;;  %v1030_v2 = vsub.s32 3, %v8608_v43  ;;  %v1019_v3 = vrot.slane %v1014_v0, %v1018_v62 }
 0x342   :  { %5347 = vmatprep.subr.bf16.mxu0 %v8300_v4  ;;  %5839 = vmatprep.subr.bf16.mxu1 %v8303_v5  ;;  %v1027_v4 = vrot.slane %v1014_v0, %v1026_v63  ;;  %v1023_v5 = vrot.slane %v1014_v0, %v1022_v1 }
 0x345   :  { %5348 = vmatpush1.bf16.msra.mxu0 %v8298_v25  ;;  %5840 = vmatpush1.bf16.msra.mxu1 %v8301_v7  ;;  %v1031_v25 = vrot.slane %v1014_v0, %v1030_v2 }
 0x346   :  { %5349 = vmatprep.subr.bf16.mxu0 %v8306_v8  ;;  %5841 = vmatprep.subr.bf16.mxu1 %v8309_v11 }
 0x349   :  { %5350 = vmatpush1.bf16.msra.mxu0 %v8304_v59  ;;  %5842 = vmatpush1.bf16.msra.mxu1 %v8307_v12 }
 0x34a   :  { %5351 = vmatprep.subr.bf16.mxu0 %v8312_v13  ;;  %5843 = vmatprep.subr.bf16.mxu1 %v8315_v14 }
 0x34d   :  { %5352 = vmatpush1.bf16.msra.mxu0 %v8310_v15  ;;  %5844 = vmatpush1.bf16.msra.mxu1 %v8313_v16 }
 0x34e   :  { %5353 = vmatprep.subr.bf16.mxu0 %v8318_v17  ;;  %5845 = vmatprep.subr.bf16.mxu1 %v8321_v18 }
 0x351   :  { %5354 = vmatpush1.bf16.msra.mxu0 %v8316_v19  ;;  %5846 = vmatpush1.bf16.msra.mxu1 %v8319_v20 }
 0x352   :  { %5355 = vmatprep.subr.bf16.mxu0 %v8324_v40  ;;  %5847 = vmatprep.subr.bf16.mxu1 %v8327_v22 }
 0x355   :  { %5356 = vmatpush1.bf16.msra.mxu0 %v8322_v24  ;;  %5848 = vmatpush1.bf16.msra.mxu1 %v8325_v27 }
 0x356   :  { %5357 = vmatprep.subr.bf16.mxu0 %v8330_v9  ;;  %5849 = vmatprep.subr.bf16.mxu1 %v8333_v10 }
 0x359   :  { %5358 = vmatpush1.bf16.msra.mxu0 %v8328_v28  ;;  %5850 = vmatpush1.bf16.msra.mxu1 %v8331_v23 }
 0x35a   :  { %7030 = vmatprep.subr.bf16.mxu0 %v8335_v6  ;;  %7052 = vmatprep.subr.bf16.mxu1 %v8336_v49  ;;  %v6997_v6 = vld [vmem:[#allocation10] ss:$0 sm:$0xff] }
 0x35c   :  { %5360 = vmatmul.mubr.bf16.vlgmr.msra.gmra.mrb[0].mxu0 %v244_v30  ;;  %5852 = vmatmul.mubr.bf16.vlgmr.msra.gmra.mrb[0].mxu1 %v244_v30 }
 0x35d   :  { %7031 = vmatpush3.bf16.msra.mxu0 %v8337_v31  ;;  %7053 = vmatpush3.bf16.msra.mxu1 %v8338_v33 }
 0x35e   :  { %7032 = vmatprep.subr.bf16.mxu0 %v8339_v34  ;;  %7054 = vmatprep.subr.bf16.mxu1 %v8340_v35 }
 0x361   :  { %7033 = vmatpush3.bf16.msra.mxu0 %v8341_v36  ;;  %7055 = vmatpush3.bf16.msra.mxu1 %v8342_v56 }
 0x362   :  { %7034 = vmatprep.subr.bf16.mxu0 %v8343_v37  ;;  %7056 = vmatprep.subr.bf16.mxu1 %v8344_v38 }
 0x365   :  { %7035 = vmatpush3.bf16.msra.mxu0 %v8345_v21  ;;  %7057 = vmatpush3.bf16.msra.mxu1 %v8346_v39 }
 0x366   :  { %7036 = vmatprep.subr.bf16.mxu0 %v8347_v26  ;;  %7058 = vmatprep.subr.bf16.mxu1 %v8348_v41 }
 0x369   :  { %7037 = vmatpush3.bf16.msra.mxu0 %v8349_v42  ;;  %7059 = vmatpush3.bf16.msra.mxu1 %v8350_v45 }
 0x36a   :  { %7038 = vmatprep.subr.bf16.mxu0 %v8351_v29  ;;  %7060 = vmatprep.subr.bf16.mxu1 %v8352_v46 }
 0x36d   :  { %7039 = vmatpush3.bf16.msra.mxu0 %v8353_v47  ;;  %7061 = vmatpush3.bf16.msra.mxu1 %v8354_v48 }
 0x36e   :  { %7040 = vmatprep.subr.bf16.mxu0 %v8355_v50  ;;  %7062 = vmatprep.subr.bf16.mxu1 %v8356_v51 }
 0x371   :  { %7041 = vmatpush3.bf16.msra.mxu0 %v8357_v52  ;;  %7063 = vmatpush3.bf16.msra.mxu1 %v8358_v53 }
 0x372   :  { %7042 = vmatprep.subr.bf16.mxu0 %v8359_v54  ;;  %7064 = vmatprep.subr.bf16.mxu1 %v8360_v55 }
 0x375   :  { %7043 = vmatpush3.bf16.msra.mxu0 %v8361_v32  ;;  %7065 = vmatpush3.bf16.msra.mxu1 %v8362_v57 }
 0x376   :  { %7044 = vmatprep.subr.bf16.mxu0 %v8363_v58  ;;  %7066 = vmatprep.subr.bf16.mxu1 %v8364_v60 }
 0x379   :  { %7045 = vmatpush3.bf16.msra.mxu0 %v8365_v44  ;;  %7067 = vmatpush3.bf16.msra.mxu1 %v8366_v61 }
 0x42f   :  { %v5361_v7 = vpop.f32.mrb[0].mxu0  ;;  %v5853_v8 = vpop.f32.mrb[0].mxu1 }
 0x430   :  { %v7074_v11 = vadd.f32 %v5361_v7, %v1019_v3  ;;  %v7076_v59 = vadd.f32 %v5853_v8, %v1027_v4  ;;  %v5363_v12 = vpop.f32.mrb[1].mxu0  ;;  %v5855_v13 = vpop.f32.mrb[1].mxu1 }
 0x431   :  { %v7075_v14 = vadd.f32 %v5363_v12, %v1023_v5  ;;  %v7077_v15 = vadd.f32 %v5855_v13, %v1031_v25  ;;  %v5365_v16 = vpop.f32.mrb[2].mxu0  ;;  %v5857_v17 = vpop.f32.mrb[2].mxu1 }
 0x432   :  { %v5860_v18 = vmax.f32 %v7074_v11, 0.0  ;;  %v5862_v19 = vmax.f32 %v7076_v59, 0.0  ;;  %v5366_v20 = vpop.f32.mrb[3].mxu0  ;;  %v5858_v40 = vpop.f32.mrb[3].mxu1 }
 0x433   :  { %v5861_v22 = vmax.f32 %v7075_v14, 0.0  ;;  %v5863_v43 = vmax.f32 %v7077_v15, 0.0 }
 0x434   :  { %v5864_v9 = vpack.c.bf16 %v5860_v18, %v5860_v18  ;;  %v5866_v10 = vpack.c.bf16 %v5862_v19, %v5862_v19 }
 0x435   :  { %v5865_v24 = vpack.c.bf16 %v5861_v22, %v5861_v22  ;;  %v5867_v27 = vpack.c.bf16 %v5863_v43, %v5863_v43 }
 0x437   :  { %6163 = vmatprep.mubr.bf16.mxu0 %v5865_v24  ;;  %6203 = vmatprep.mubr.bf16.mxu1 %v5867_v27 }
 0x438   :  { %6164 = vmatmul.mubr.bf16.vlgmr.msra.gmra.mrb[4].mxu0 %v5864_v9  ;;  %6204 = vmatmul.mubr.bf16.vlgmr.msra.gmra.mrb[4].mxu1 %v5866_v10 }
 0x50b   :  { %v7046_v28 = vpop.f32.mrb[4].mxu0  ;;  %v7068_v23 = vpop.f32.mrb[4].mxu1 }
 0x50c   :  { %v7047_v49 = vpop.f32.mrb[5].mxu0  ;;  %v7069_v30 = vpop.f32.mrb[5].mxu1 }
 0x50d   :  { %v7048_v31 = vadd.f32 %v7047_v49, %v7046_v28  ;;  %v7070_v33 = vadd.f32 %v7069_v30, %v7068_v23  ;;  %v7049_v34 = vpop.f32.mrb[6].mxu0  ;;  %v7071_v35 = vpop.f32.mrb[6].mxu1 }
 0x50e   :  { %v7050_v36 = vpop.f32.mrb[7].mxu0  ;;  %v7072_v56 = vpop.f32.mrb[7].mxu1 }
 0x50f   :  { %v6166_v37 = vadd.f32 %v7048_v31, %v6997_v6 }
 0x511   :  { %v6206_v38 = vadd.f32 %v7070_v33, %v6166_v37 }
 0x513   :  { %6211 = vst [vmem:[#allocation11] sm:$0x3] %v6206_v38 }
 0x514   :  { %8488 = shalt.err (!%p8485_p2)
}
 0x515   :  { %s8489_s6 = scalar_lea.hbm %s8737_s5, 32 }
 0x516   :  { %p8490_p3 = scmp.ne.s32.totalorder %s8737_s5, %s8489_s6  ;;  %p8493_p4 = scmp.lt.u32.totalorder %s8489_s6, %s8737_s5 }
 0x518   :  { %p8495_p5 = pnand %p8493_p4, %p8490_p3 }
 0x51a   :  { %8498 = shalt.err (!%p8495_p5)
}
 0x51b   :  { %6221 = dma.vmem_to_hbm [thread:$0]  %s6219_s28, 32, %s8737_s5, [#allocation4]  }
 0x51c   :  { %8505 = dma.done.wait [#allocation4], 32  }
 0x51d   :  { %8506 = vsyncadd [#allocation4], 4294967264 }
 0x51e   :  { %6225 = vsyncpa [#allocation3], 1 }
 0x51f   :  { %6226 = vsyncpa [#allocation6], 1 }
 0x520   :  { %6227 = vsyncpa [#allocation9], 1 }
 0x521   :  { %6228 = vsyncpa [#allocation4], 1 }

</bundles_post_ra>
